<compile_context>
chip_gen: v7x
topology: tpu7x:2x2x1
jax: 0.10.0
libtpu: 0.0.40
codegen_flags: <defaults>
</compile_context>

<pallas_src>
import functools

import jax
import jax.numpy as jnp
from jax.experimental import pallas as pl
from jax.experimental.pallas import tpu as pltpu

PAIRDIST_EPS = 1e-6   # torch.nn.PairwiseDistance default eps
LN_EPS = 1e-5         # torch.nn.LayerNorm default eps
_SEG = 128            # lane-aligned segment width for packed bias/LN vectors
_LW = 128             # packed weight-slab lane width (vreg friendly)


def _r8(x):
    return (x + 7) // 8 * 8


def _w_offsets(d, top_k, h):
    """Row offsets of each weight block inside the packed (rows, 128) slab."""
    o_we = 0                      # encoder weight^T (D, F)
    o_w1 = o_we + _r8(d)          # fc1 weight (K, 2H)
    o_w2 = o_w1 + _r8(top_k)      # fc2 weight (2H, H)
    o_w3 = o_w2 + _r8(2 * h)      # fc3 weight stored as a row (1, H)
    o_be = o_w3 + 8               # encoder bias as a column (D, 1)
    rows = o_be + _r8(d)
    return o_we, o_w1, o_w2, o_w3, o_be, rows


def _layernorm(x, gamma, beta):
    mu = jnp.mean(x, axis=-1, keepdims=True)
    xc = x - mu
    var = jnp.mean(xc * xc, axis=-1, keepdims=True)
    return xc * jax.lax.rsqrt(var + LN_EPS) * gamma + beta


def siamese_kernel(x1_ref, x2_ref, w_ref, v_ref, out_ref, *,
                   bt, n, f, d, h, top_k):
    o_we, o_w1, o_w2, o_w3, o_be, _ = _w_offsets(d, top_k, h)

    # ---- static parameter slices (all row starts are multiples of 8) --------
    we_t = w_ref[o_we:o_we + d, 0:f]              # (D, F)  encoder weight^T
    be_c = w_ref[o_be:o_be + d, 0:1]              # (D, 1)  encoder bias column
    w1 = w_ref[o_w1:o_w1 + top_k, 0:2 * h]        # (K, 2H)
    w2 = w_ref[o_w2:o_w2 + 2 * h, 0:h]            # (2H, H)
    w3r = w_ref[o_w3:o_w3 + 1, 0:h]               # (1, H)  fc3 weight row
    b1 = v_ref[:, 0 * _SEG:0 * _SEG + 2 * h]
    g1 = v_ref[:, 1 * _SEG:1 * _SEG + 2 * h]
    bb1 = v_ref[:, 2 * _SEG:2 * _SEG + 2 * h]
    b2 = v_ref[:, 3 * _SEG:3 * _SEG + h]
    g2 = v_ref[:, 4 * _SEG:4 * _SEG + h]
    bb2 = v_ref[:, 5 * _SEG:5 * _SEG + h]
    b3 = v_ref[:, 6 * _SEG:6 * _SEG + 1]

    m = bt * n
    dn_t = (((1,), (1,)), ((), ()))   # contract last dims of both (A @ B^T)

    # ---- shared encoder, batch folded into the lane dimension ---------------
    # TODO(synk): PyTorch takes an arbitrary GNN `encoder`; a shared
    # Linear(F,D)+ReLU node encoder is the deterministic stand-in here.
    x1f = x1_ref[...].reshape(m, f)               # (B_TILE*N, F) -- layout-trivial
    x2f = x2_ref[...].reshape(m, f)
    we_bf = we_t.astype(jnp.bfloat16)             # bf16 MXU operands, f32 accumulate
    h1 = jax.lax.dot_general(we_bf, x1f.astype(jnp.bfloat16), dn_t,
                             preferred_element_type=jnp.float32)   # (D, M)
    h2 = jax.lax.dot_general(we_bf, x2f.astype(jnp.bfloat16), dn_t,
                             preferred_element_type=jnp.float32)   # (D, M)
    h1 = jnp.maximum(h1 + be_c, 0.0)
    h2 = jnp.maximum(h2 + be_c, 0.0)

    # ---- nn.PairwiseDistance (p=2, eps=1e-6), squared, lane-major -----------
    diff = h1 - h2 + PAIRDIST_EPS                                   # (D, M)
    d2_row = jnp.sum(diff * diff, axis=0, keepdims=True)            # (1, M)
    # Regroup to one (1, N) row per pair -> (B_TILE, N), sorted in parallel.
    d2 = jnp.concatenate([d2_row[:, p * n:(p + 1) * n] for p in range(bt)],
                         axis=0)                                    # (B_TILE, N)

    # ---- torch.topk(dist, k): bitonic sort (descending) along lanes ---------
    # Exact, preserves duplicates; all B_TILE rows sorted simultaneously.
    lane = jax.lax.broadcasted_iota(jnp.int32, (bt, n), 1)
    val = d2
    klen = 2
    while klen <= n:
        j = klen // 2
        while j >= 1:
            from_hi = pltpu.roll(val, shift=n - j, axis=1)   # value from lane i+j
            from_lo = pltpu.roll(val, shift=j, axis=1)       # value from lane i-j
            lower = (lane & j) == 0                          # i is the lower partner
            partner = jnp.where(lower, from_hi, from_lo)
            asc = (lane & klen) != 0                         # flipped -> global descending
            take_min = jnp.logical_not(jnp.logical_xor(asc, lower))
            val = jnp.where(take_min, jnp.minimum(val, partner),
                            jnp.maximum(val, partner))
            j //= 2
        klen *= 2
    topk = jnp.sqrt(val[:, 0:top_k])                         # (B_TILE, K) descending

    # ---- MLP head: fc1 -> LN -> ReLU -> fc2 -> LN -> ReLU -> fc3 -> sigmoid -
    # fc1/fc2 have M=B_TILE rows now, so they stay as (small) MXU dots.
    # TODO(synk): dropout is eval-mode identity; training-mode dropout would
    # need pltpu.prng_seed/prng_random_bits.
    z = jnp.dot(topk, w1, preferred_element_type=jnp.float32) + b1
    z = jnp.maximum(_layernorm(z, g1, bb1), 0.0)
    z = jnp.dot(z, w2, preferred_element_type=jnp.float32) + b2
    z = jnp.maximum(_layernorm(z, g2, bb2), 0.0)
    # fc3 as (1,H) x (B_TILE,H)^T -> lane-dense (1, B_TILE) result row.
    logits = jax.lax.dot_general(w3r, z, dn_t,
                                 preferred_element_type=jnp.float32) + b3
    out_ref[...] = jax.nn.sigmoid(logits).reshape(1, 1, bt)


def pack_params(params, *, top_k):
    """One-time packing of the 12 parameter tensors into two VMEM slabs."""
    we, be, w1, b1, g1, bb1, w2, b2, g2, bb2, w3, b3 = params
    f, d = we.shape
    h = w2.shape[1]
    assert w1.shape == (top_k, 2 * h)
    assert max(f, 2 * h, h, 1) <= _LW, "feature/hidden dims must fit 128 lanes"
    o_we, o_w1, o_w2, o_w3, o_be, rows = _w_offsets(d, top_k, h)

    def put(buf, block, row):
        r, c = block.shape
        return buf.at[row:row + r, 0:c].set(block)

    wpack = jnp.zeros((rows, _LW), jnp.float32)
    wpack = put(wpack, we.T, o_we)                  # encoder weight^T (D, F)
    wpack = put(wpack, w1, o_w1)
    wpack = put(wpack, w2, o_w2)
    wpack = put(wpack, w3.reshape(1, h), o_w3)      # fc3 weight as a row
    wpack = put(wpack, be.reshape(d, 1), o_be)      # encoder bias as a column

    vpack = jnp.zeros((1, 7 * _SEG), jnp.float32)
    for idx, vec in enumerate((b1, g1, bb1, b2, g2, bb2, b3)):
        v = vec.reshape(-1)
        vpack = vpack.at[0, idx * _SEG:idx * _SEG + v.shape[0]].set(v)

    dims = dict(f=int(f), d=int(d), h=int(h))
    return wpack, vpack, dims


def siamese_forward(x1, x2, wpack, vpack, dims, *, top_k, block_pairs=8):
    single = (x1.ndim == 2)
    if single:
        x1, x2 = x1[None], x2[None]
    b, n, f = x1.shape
    d, h = dims["d"], dims["h"]
    assert top_k <= n, "top_k must not exceed the number of nodes"
    assert n % 128 == 0 and (n & (n - 1)) == 0, \
        "N must be a lane-aligned power of two for the bitonic top-k"

    # Pad the pair batch to a multiple of the tile size (sliced off below).
    bp = pl.cdiv(b, block_pairs) * block_pairs
    if bp != b:
        pad = bp - b
        x1 = jnp.concatenate([x1, jnp.zeros((pad, n, f), x1.dtype)], axis=0)
        x2 = jnp.concatenate([x2, jnp.zeros((pad, n, f), x2.dtype)], axis=0)
    num_tiles = bp // block_pairs

    flops = int(2 * 2 * d * f * bp * n                 # two encoder branches
                + 3 * d * bp * n                       # distance
                + 2 * bp * (top_k * 2 * h + 2 * h * h + h))
    cost = pl.CostEstimate(
        flops=flops,
        transcendentals=int(bp * (3 + top_k)),
        bytes_accessed=int(4 * (2 * bp * n * f + wpack.size + vpack.size + bp)),
    )

    out = pl.pallas_call(
        functools.partial(siamese_kernel, bt=block_pairs, n=n, top_k=top_k,
                          **dims),
        out_shape=jax.ShapeDtypeStruct((num_tiles, 1, block_pairs), jnp.float32),
        grid=(num_tiles,),
        in_specs=[
            pl.BlockSpec((block_pairs, n, f), lambda t: (t, 0, 0)),   # x1 tile
            pl.BlockSpec((block_pairs, n, f), lambda t: (t, 0, 0)),   # x2 tile
            pl.BlockSpec(wpack.shape, lambda t: (0, 0)),              # weights (resident)
            pl.BlockSpec(vpack.shape, lambda t: (0, 0)),              # bias/LN (resident)
        ],
        out_specs=pl.BlockSpec((1, 1, block_pairs), lambda t: (t, 0, 0)),
        compiler_params=pltpu.CompilerParams(
            dimension_semantics=("parallel",)),
        cost_estimate=cost,
    )(x1, x2, wpack, vpack)

    flat = out.reshape(-1)[:b]
    if single:
        return flat[:1]              # matches PyTorch single-pair output shape (1,)
    return flat.reshape(b, 1)


def _reference(x1, x2, params, top_k):
    """Pure-JAX reference (bf16 encoder operands to mirror the kernel)."""
    we, be, w1, b1, g1, bb1, w2, b2, g2, bb2, w3, b3 = params
    we_b = we.astype(jnp.bfloat16)
    h1 = jnp.maximum(jnp.einsum("bnf,fd->bnd", x1.astype(jnp.bfloat16), we_b,
                                preferred_element_type=jnp.float32) + be, 0.0)
    h2 = jnp.maximum(jnp.einsum("bnf,fd->bnd", x2.astype(jnp.bfloat16), we_b,
                                preferred_element_type=jnp.float32) + be, 0.0)
    dist = jnp.sqrt(jnp.sum((h1 - h2 + PAIRDIST_EPS) ** 2, axis=-1))   # (B, N)
    vals, _ = jax.lax.top_k(dist, top_k)                               # (B, K)
    z = vals @ w1 + b1
    z = jnp.maximum(_layernorm(z, g1, bb1), 0.0)
    z = z @ w2 + b2
    z = jnp.maximum(_layernorm(z, g2, bb2), 0.0)
    z = z @ w3 + b3
    return jax.nn.sigmoid(z)                                           # (B, 1)


if __name__ == "__main__":
    B = 32                          # pairs of graphs
    N, F, D = 128, 16, 32           # nodes, node-feature dim, encoder embedding dim
    TOP_K, NHID = 8, 32             # module hyperparams: top_k, nhidden

    key = jax.random.PRNGKey(0)
    ks = jax.random.split(key, 12)
    x1 = jax.random.normal(ks[0], (B, N, F), jnp.float32)
    x2 = jax.random.normal(ks[1], (B, N, F), jnp.float32)

    def uni(k, shape, fan_in):      # PyTorch Linear-style U(-1/sqrt(fan_in), ...)
        bound = 1.0 / float(fan_in) ** 0.5
        return jax.random.uniform(k, shape, jnp.float32, -bound, bound)

    params = (
        uni(ks[2], (F, D), F),           uni(ks[3], (1, D), F),                   # encoder
        uni(ks[4], (TOP_K, 2 * NHID), TOP_K), uni(ks[5], (1, 2 * NHID), TOP_K),   # fc1
        jnp.ones((1, 2 * NHID), jnp.float32), jnp.zeros((1, 2 * NHID), jnp.float32),  # norm1
        uni(ks[6], (2 * NHID, NHID), 2 * NHID), uni(ks[7], (1, NHID), 2 * NHID),      # fc2
        jnp.ones((1, NHID), jnp.float32), jnp.zeros((1, NHID), jnp.float32),          # norm2
        uni(ks[8], (NHID, 1), NHID),     uni(ks[9], (1, 1), NHID),                # fc3
    )

    wpack, vpack, dims = pack_params(params, top_k=TOP_K)   # one-time packing
    out = siamese_forward(x1, x2, wpack, vpack, dims, top_k=TOP_K, block_pairs=8)
    jax.block_until_ready(out)

    ref = _reference(x1, x2, params, TOP_K)
    assert out.shape == (B, 1), out.shape
    assert jnp.allclose(out, ref, atol=2e-4), (out, ref)
    print("KERNEL_OK")
</pallas_src>

<mosaic_0001>
module attributes {stable_mosaic.version = 11 : i64} {
  func.func @siamese_kernel(%arg0: i32, %arg1: memref<8x128x16xf32, #tpu.memory_space<vmem>>, %arg2: memref<8x128x16xf32, #tpu.memory_space<vmem>>, %arg3: memref<144x128xf32, #tpu.memory_space<vmem>>, %arg4: memref<1x896xf32, #tpu.memory_space<vmem>>, %arg5: memref<1x1x8xf32, #tpu.memory_space<vmem>>) attributes {dimension_semantics = [#tpu.dimension_semantics<parallel>], iteration_bounds = array<i64: 4>, scalar_prefetch = 0 : i64, scratch_operands = 0 : i64, tpu.core_type = #tpu.core_type<tc>, window_params = [{transform_indices = @transform_0, window_bounds = array<i64: 8, 128, 16>}, {transform_indices = @transform_1, window_bounds = array<i64: 8, 128, 16>}, {pipeline_mode = #tpu.pipeline_mode<synchronous>, transform_indices = @transform_2, window_bounds = array<i64: 144, 128>}, {pipeline_mode = #tpu.pipeline_mode<synchronous>, transform_indices = @transform_3, window_bounds = array<i64: 1, 896>}, {transform_indices = @transform_4, window_bounds = array<i64: 1, 1, 8>}]} {
    %c0 = arith.constant 0 : index
    %c0_0 = arith.constant 0 : index
    %0 = vector.load %arg3[%c0, %c0_0] : memref<144x128xf32, #tpu.memory_space<vmem>>, vector<32x16xf32>
    %c112 = arith.constant 112 : index
    %c0_1 = arith.constant 0 : index
    %1 = vector.load %arg3[%c112, %c0_1] : memref<144x128xf32, #tpu.memory_space<vmem>>, vector<32x1xf32>
    %c32 = arith.constant 32 : index
    %c0_2 = arith.constant 0 : index
    %2 = vector.load %arg3[%c32, %c0_2] : memref<144x128xf32, #tpu.memory_space<vmem>>, vector<8x64xf32>
    %c40 = arith.constant 40 : index
    %c0_3 = arith.constant 0 : index
    %3 = vector.load %arg3[%c40, %c0_3] : memref<144x128xf32, #tpu.memory_space<vmem>>, vector<64x32xf32>
    %c104 = arith.constant 104 : index
    %c0_4 = arith.constant 0 : index
    %4 = vector.load %arg3[%c104, %c0_4] : memref<144x128xf32, #tpu.memory_space<vmem>>, vector<1x32xf32>
    %c0_5 = arith.constant 0 : index
    %c0_6 = arith.constant 0 : index
    %5 = vector.load %arg4[%c0_5, %c0_6] : memref<1x896xf32, #tpu.memory_space<vmem>>, vector<1x64xf32>
    %c0_7 = arith.constant 0 : index
    %c128 = arith.constant 128 : index
    %6 = vector.load %arg4[%c0_7, %c128] : memref<1x896xf32, #tpu.memory_space<vmem>>, vector<1x64xf32>
    %c0_8 = arith.constant 0 : index
    %c256 = arith.constant 256 : index
    %7 = vector.load %arg4[%c0_8, %c256] : memref<1x896xf32, #tpu.memory_space<vmem>>, vector<1x64xf32>
    %c0_9 = arith.constant 0 : index
    %c384 = arith.constant 384 : index
    %8 = vector.load %arg4[%c0_9, %c384] : memref<1x896xf32, #tpu.memory_space<vmem>>, vector<1x32xf32>
    %c0_10 = arith.constant 0 : index
    %c512 = arith.constant 512 : index
    %9 = vector.load %arg4[%c0_10, %c512] : memref<1x896xf32, #tpu.memory_space<vmem>>, vector<1x32xf32>
    %c0_11 = arith.constant 0 : index
    %c640 = arith.constant 640 : index
    %10 = vector.load %arg4[%c0_11, %c640] : memref<1x896xf32, #tpu.memory_space<vmem>>, vector<1x32xf32>
    %c0_12 = arith.constant 0 : index
    %c768 = arith.constant 768 : index
    %11 = vector.load %arg4[%c0_12, %c768] : memref<1x896xf32, #tpu.memory_space<vmem>>, vector<1x1xf32>
    %c0_13 = arith.constant 0 : index
    %c0_14 = arith.constant 0 : index
    %c0_15 = arith.constant 0 : index
    %12 = vector.load %arg1[%c0_13, %c0_14, %c0_15] : memref<8x128x16xf32, #tpu.memory_space<vmem>>, vector<8x128x16xf32>
    %13 = vector.shape_cast %12 : vector<8x128x16xf32> to vector<1024x16xf32>
    %c0_16 = arith.constant 0 : index
    %c0_17 = arith.constant 0 : index
    %c0_18 = arith.constant 0 : index
    %14 = vector.load %arg2[%c0_16, %c0_17, %c0_18] : memref<8x128x16xf32, #tpu.memory_space<vmem>>, vector<8x128x16xf32>
    %15 = vector.shape_cast %14 : vector<8x128x16xf32> to vector<1024x16xf32>
    %16 = arith.truncf %0 : vector<32x16xf32> to vector<32x16xbf16>
    %17 = arith.truncf %13 : vector<1024x16xf32> to vector<1024x16xbf16>
    %cst = arith.constant dense<0.000000e+00> : vector<32x1024xf32>
    %18 = tpu.matmul %16, %17, %cst {dimension_numbers = #tpu.dot_dimension_numbers<[1], [1], [0], [0], [0, 0, 1, 0], [], []>} : vector<32x16xbf16>, vector<1024x16xbf16>, vector<32x1024xf32> -> vector<32x1024xf32>
    %19 = arith.truncf %15 : vector<1024x16xf32> to vector<1024x16xbf16>
    %cst_19 = arith.constant dense<0.000000e+00> : vector<32x1024xf32>
    %20 = tpu.matmul %16, %19, %cst_19 {dimension_numbers = #tpu.dot_dimension_numbers<[1], [1], [0], [0], [0, 0, 1, 0], [], []>} : vector<32x16xbf16>, vector<1024x16xbf16>, vector<32x1024xf32> -> vector<32x1024xf32>
    %21 = vector.broadcast %1 : vector<32x1xf32> to vector<32x1024xf32>
    %22 = arith.addf %18, %21 : vector<32x1024xf32>
    %cst_20 = arith.constant 0.000000e+00 : f32
    %23 = vector.broadcast %cst_20 : f32 to vector<32x1024xf32>
    %24 = arith.maximumf %22, %23 : vector<32x1024xf32>
    %25 = vector.broadcast %1 : vector<32x1xf32> to vector<32x1024xf32>
    %26 = arith.addf %20, %25 : vector<32x1024xf32>
    %cst_21 = arith.constant 0.000000e+00 : f32
    %27 = vector.broadcast %cst_21 : f32 to vector<32x1024xf32>
    %28 = arith.maximumf %26, %27 : vector<32x1024xf32>
    %29 = arith.subf %24, %28 : vector<32x1024xf32>
    %cst_22 = arith.constant 9.99999997E-7 : f32
    %30 = vector.broadcast %cst_22 : f32 to vector<32x1024xf32>
    %31 = arith.addf %29, %30 : vector<32x1024xf32>
    %32 = arith.mulf %31, %31 : vector<32x1024xf32>
    %cst_23 = arith.constant dense<0.000000e+00> : vector<1024xf32>
    %33 = vector.multi_reduction <add>, %32, %cst_23 [0] : vector<32x1024xf32> to vector<1024xf32>
    %34 = vector.shape_cast %33 : vector<1024xf32> to vector<1x1024xf32>
    %35 = vector.extract_strided_slice %34 {offsets = [0, 0], sizes = [1, 128], strides = [1, 1]} : vector<1x1024xf32> to vector<1x128xf32>
    %36 = vector.extract_strided_slice %34 {offsets = [0, 128], sizes = [1, 128], strides = [1, 1]} : vector<1x1024xf32> to vector<1x128xf32>
    %37 = vector.extract_strided_slice %34 {offsets = [0, 256], sizes = [1, 128], strides = [1, 1]} : vector<1x1024xf32> to vector<1x128xf32>
    %38 = vector.extract_strided_slice %34 {offsets = [0, 384], sizes = [1, 128], strides = [1, 1]} : vector<1x1024xf32> to vector<1x128xf32>
    %39 = vector.extract_strided_slice %34 {offsets = [0, 512], sizes = [1, 128], strides = [1, 1]} : vector<1x1024xf32> to vector<1x128xf32>
    %40 = vector.extract_strided_slice %34 {offsets = [0, 640], sizes = [1, 128], strides = [1, 1]} : vector<1x1024xf32> to vector<1x128xf32>
    %41 = vector.extract_strided_slice %34 {offsets = [0, 768], sizes = [1, 128], strides = [1, 1]} : vector<1x1024xf32> to vector<1x128xf32>
    %42 = vector.extract_strided_slice %34 {offsets = [0, 896], sizes = [1, 128], strides = [1, 1]} : vector<1x1024xf32> to vector<1x128xf32>
    %43 = tpu.concatenate %35, %36, %37, %38, %39, %40, %41, %42 in 0 : vector<1x128xf32>, vector<1x128xf32>, vector<1x128xf32>, vector<1x128xf32>, vector<1x128xf32>, vector<1x128xf32>, vector<1x128xf32>, vector<1x128xf32> -> vector<8x128xf32>
    %44 = tpu.iota {dimensions = array<i32: 1>} : vector<8x128xi32>
    %c127_i32 = arith.constant 127 : i32
    %45 = tpu.dynamic_rotate %43 by %c127_i32 dim 1 : vector<8x128xf32>, i32 -> vector<8x128xf32>
    %c1_i32 = arith.constant 1 : i32
    %46 = tpu.dynamic_rotate %43 by %c1_i32 dim 1 : vector<8x128xf32>, i32 -> vector<8x128xf32>
    %c1_i32_24 = arith.constant 1 : i32
    %47 = vector.broadcast %c1_i32_24 : i32 to vector<8x128xi32>
    %48 = arith.andi %44, %47 : vector<8x128xi32>
    %c0_i32 = arith.constant 0 : i32
    %49 = vector.broadcast %c0_i32 : i32 to vector<8x128xi32>
    %50 = arith.cmpi eq, %48, %49 : vector<8x128xi32>
    %51 = arith.select %50, %45, %46 : vector<8x128xi1>, vector<8x128xf32>
    %c2_i32 = arith.constant 2 : i32
    %52 = vector.broadcast %c2_i32 : i32 to vector<8x128xi32>
    %53 = arith.andi %44, %52 : vector<8x128xi32>
    %c0_i32_25 = arith.constant 0 : i32
    %54 = vector.broadcast %c0_i32_25 : i32 to vector<8x128xi32>
    %55 = arith.cmpi ne, %53, %54 : vector<8x128xi32>
    %56 = arith.xori %55, %50 : vector<8x128xi1>
    %cst_26 = arith.constant dense<true> : vector<8x128xi1>
    %57 = arith.xori %56, %cst_26 : vector<8x128xi1>
    %58 = arith.minimumf %43, %51 : vector<8x128xf32>
    %59 = arith.maximumf %43, %51 : vector<8x128xf32>
    %60 = arith.select %57, %58, %59 : vector<8x128xi1>, vector<8x128xf32>
    %c126_i32 = arith.constant 126 : i32
    %61 = tpu.dynamic_rotate %60 by %c126_i32 dim 1 : vector<8x128xf32>, i32 -> vector<8x128xf32>
    %c2_i32_27 = arith.constant 2 : i32
    %62 = tpu.dynamic_rotate %60 by %c2_i32_27 dim 1 : vector<8x128xf32>, i32 -> vector<8x128xf32>
    %c2_i32_28 = arith.constant 2 : i32
    %63 = vector.broadcast %c2_i32_28 : i32 to vector<8x128xi32>
    %64 = arith.andi %44, %63 : vector<8x128xi32>
    %c0_i32_29 = arith.constant 0 : i32
    %65 = vector.broadcast %c0_i32_29 : i32 to vector<8x128xi32>
    %66 = arith.cmpi eq, %64, %65 : vector<8x128xi32>
    %67 = arith.select %66, %61, %62 : vector<8x128xi1>, vector<8x128xf32>
    %c4_i32 = arith.constant 4 : i32
    %68 = vector.broadcast %c4_i32 : i32 to vector<8x128xi32>
    %69 = arith.andi %44, %68 : vector<8x128xi32>
    %c0_i32_30 = arith.constant 0 : i32
    %70 = vector.broadcast %c0_i32_30 : i32 to vector<8x128xi32>
    %71 = arith.cmpi ne, %69, %70 : vector<8x128xi32>
    %72 = arith.xori %71, %66 : vector<8x128xi1>
    %cst_31 = arith.constant dense<true> : vector<8x128xi1>
    %73 = arith.xori %72, %cst_31 : vector<8x128xi1>
    %74 = arith.minimumf %60, %67 : vector<8x128xf32>
    %75 = arith.maximumf %60, %67 : vector<8x128xf32>
    %76 = arith.select %73, %74, %75 : vector<8x128xi1>, vector<8x128xf32>
    %c127_i32_32 = arith.constant 127 : i32
    %77 = tpu.dynamic_rotate %76 by %c127_i32_32 dim 1 : vector<8x128xf32>, i32 -> vector<8x128xf32>
    %c1_i32_33 = arith.constant 1 : i32
    %78 = tpu.dynamic_rotate %76 by %c1_i32_33 dim 1 : vector<8x128xf32>, i32 -> vector<8x128xf32>
    %c1_i32_34 = arith.constant 1 : i32
    %79 = vector.broadcast %c1_i32_34 : i32 to vector<8x128xi32>
    %80 = arith.andi %44, %79 : vector<8x128xi32>
    %c0_i32_35 = arith.constant 0 : i32
    %81 = vector.broadcast %c0_i32_35 : i32 to vector<8x128xi32>
    %82 = arith.cmpi eq, %80, %81 : vector<8x128xi32>
    %83 = arith.select %82, %77, %78 : vector<8x128xi1>, vector<8x128xf32>
    %c4_i32_36 = arith.constant 4 : i32
    %84 = vector.broadcast %c4_i32_36 : i32 to vector<8x128xi32>
    %85 = arith.andi %44, %84 : vector<8x128xi32>
    %c0_i32_37 = arith.constant 0 : i32
    %86 = vector.broadcast %c0_i32_37 : i32 to vector<8x128xi32>
    %87 = arith.cmpi ne, %85, %86 : vector<8x128xi32>
    %88 = arith.xori %87, %82 : vector<8x128xi1>
    %cst_38 = arith.constant dense<true> : vector<8x128xi1>
    %89 = arith.xori %88, %cst_38 : vector<8x128xi1>
    %90 = arith.minimumf %76, %83 : vector<8x128xf32>
    %91 = arith.maximumf %76, %83 : vector<8x128xf32>
    %92 = arith.select %89, %90, %91 : vector<8x128xi1>, vector<8x128xf32>
    %c124_i32 = arith.constant 124 : i32
    %93 = tpu.dynamic_rotate %92 by %c124_i32 dim 1 : vector<8x128xf32>, i32 -> vector<8x128xf32>
    %c4_i32_39 = arith.constant 4 : i32
    %94 = tpu.dynamic_rotate %92 by %c4_i32_39 dim 1 : vector<8x128xf32>, i32 -> vector<8x128xf32>
    %c4_i32_40 = arith.constant 4 : i32
    %95 = vector.broadcast %c4_i32_40 : i32 to vector<8x128xi32>
    %96 = arith.andi %44, %95 : vector<8x128xi32>
    %c0_i32_41 = arith.constant 0 : i32
    %97 = vector.broadcast %c0_i32_41 : i32 to vector<8x128xi32>
    %98 = arith.cmpi eq, %96, %97 : vector<8x128xi32>
    %99 = arith.select %98, %93, %94 : vector<8x128xi1>, vector<8x128xf32>
    %c8_i32 = arith.constant 8 : i32
    %100 = vector.broadcast %c8_i32 : i32 to vector<8x128xi32>
    %101 = arith.andi %44, %100 : vector<8x128xi32>
    %c0_i32_42 = arith.constant 0 : i32
    %102 = vector.broadcast %c0_i32_42 : i32 to vector<8x128xi32>
    %103 = arith.cmpi ne, %101, %102 : vector<8x128xi32>
    %104 = arith.xori %103, %98 : vector<8x128xi1>
    %cst_43 = arith.constant dense<true> : vector<8x128xi1>
    %105 = arith.xori %104, %cst_43 : vector<8x128xi1>
    %106 = arith.minimumf %92, %99 : vector<8x128xf32>
    %107 = arith.maximumf %92, %99 : vector<8x128xf32>
    %108 = arith.select %105, %106, %107 : vector<8x128xi1>, vector<8x128xf32>
    %c126_i32_44 = arith.constant 126 : i32
    %109 = tpu.dynamic_rotate %108 by %c126_i32_44 dim 1 : vector<8x128xf32>, i32 -> vector<8x128xf32>
    %c2_i32_45 = arith.constant 2 : i32
    %110 = tpu.dynamic_rotate %108 by %c2_i32_45 dim 1 : vector<8x128xf32>, i32 -> vector<8x128xf32>
    %c2_i32_46 = arith.constant 2 : i32
    %111 = vector.broadcast %c2_i32_46 : i32 to vector<8x128xi32>
    %112 = arith.andi %44, %111 : vector<8x128xi32>
    %c0_i32_47 = arith.constant 0 : i32
    %113 = vector.broadcast %c0_i32_47 : i32 to vector<8x128xi32>
    %114 = arith.cmpi eq, %112, %113 : vector<8x128xi32>
    %115 = arith.select %114, %109, %110 : vector<8x128xi1>, vector<8x128xf32>
    %c8_i32_48 = arith.constant 8 : i32
    %116 = vector.broadcast %c8_i32_48 : i32 to vector<8x128xi32>
    %117 = arith.andi %44, %116 : vector<8x128xi32>
    %c0_i32_49 = arith.constant 0 : i32
    %118 = vector.broadcast %c0_i32_49 : i32 to vector<8x128xi32>
    %119 = arith.cmpi ne, %117, %118 : vector<8x128xi32>
    %120 = arith.xori %119, %114 : vector<8x128xi1>
    %cst_50 = arith.constant dense<true> : vector<8x128xi1>
    %121 = arith.xori %120, %cst_50 : vector<8x128xi1>
    %122 = arith.minimumf %108, %115 : vector<8x128xf32>
    %123 = arith.maximumf %108, %115 : vector<8x128xf32>
    %124 = arith.select %121, %122, %123 : vector<8x128xi1>, vector<8x128xf32>
    %c127_i32_51 = arith.constant 127 : i32
    %125 = tpu.dynamic_rotate %124 by %c127_i32_51 dim 1 : vector<8x128xf32>, i32 -> vector<8x128xf32>
    %c1_i32_52 = arith.constant 1 : i32
    %126 = tpu.dynamic_rotate %124 by %c1_i32_52 dim 1 : vector<8x128xf32>, i32 -> vector<8x128xf32>
    %c1_i32_53 = arith.constant 1 : i32
    %127 = vector.broadcast %c1_i32_53 : i32 to vector<8x128xi32>
    %128 = arith.andi %44, %127 : vector<8x128xi32>
    %c0_i32_54 = arith.constant 0 : i32
    %129 = vector.broadcast %c0_i32_54 : i32 to vector<8x128xi32>
    %130 = arith.cmpi eq, %128, %129 : vector<8x128xi32>
    %131 = arith.select %130, %125, %126 : vector<8x128xi1>, vector<8x128xf32>
    %c8_i32_55 = arith.constant 8 : i32
    %132 = vector.broadcast %c8_i32_55 : i32 to vector<8x128xi32>
    %133 = arith.andi %44, %132 : vector<8x128xi32>
    %c0_i32_56 = arith.constant 0 : i32
    %134 = vector.broadcast %c0_i32_56 : i32 to vector<8x128xi32>
    %135 = arith.cmpi ne, %133, %134 : vector<8x128xi32>
    %136 = arith.xori %135, %130 : vector<8x128xi1>
    %cst_57 = arith.constant dense<true> : vector<8x128xi1>
    %137 = arith.xori %136, %cst_57 : vector<8x128xi1>
    %138 = arith.minimumf %124, %131 : vector<8x128xf32>
    %139 = arith.maximumf %124, %131 : vector<8x128xf32>
    %140 = arith.select %137, %138, %139 : vector<8x128xi1>, vector<8x128xf32>
    %c120_i32 = arith.constant 120 : i32
    %141 = tpu.dynamic_rotate %140 by %c120_i32 dim 1 : vector<8x128xf32>, i32 -> vector<8x128xf32>
    %c8_i32_58 = arith.constant 8 : i32
    %142 = tpu.dynamic_rotate %140 by %c8_i32_58 dim 1 : vector<8x128xf32>, i32 -> vector<8x128xf32>
    %c8_i32_59 = arith.constant 8 : i32
    %143 = vector.broadcast %c8_i32_59 : i32 to vector<8x128xi32>
    %144 = arith.andi %44, %143 : vector<8x128xi32>
    %c0_i32_60 = arith.constant 0 : i32
    %145 = vector.broadcast %c0_i32_60 : i32 to vector<8x128xi32>
    %146 = arith.cmpi eq, %144, %145 : vector<8x128xi32>
    %147 = arith.select %146, %141, %142 : vector<8x128xi1>, vector<8x128xf32>
    %c16_i32 = arith.constant 16 : i32
    %148 = vector.broadcast %c16_i32 : i32 to vector<8x128xi32>
    %149 = arith.andi %44, %148 : vector<8x128xi32>
    %c0_i32_61 = arith.constant 0 : i32
    %150 = vector.broadcast %c0_i32_61 : i32 to vector<8x128xi32>
    %151 = arith.cmpi ne, %149, %150 : vector<8x128xi32>
    %152 = arith.xori %151, %146 : vector<8x128xi1>
    %cst_62 = arith.constant dense<true> : vector<8x128xi1>
    %153 = arith.xori %152, %cst_62 : vector<8x128xi1>
    %154 = arith.minimumf %140, %147 : vector<8x128xf32>
    %155 = arith.maximumf %140, %147 : vector<8x128xf32>
    %156 = arith.select %153, %154, %155 : vector<8x128xi1>, vector<8x128xf32>
    %c124_i32_63 = arith.constant 124 : i32
    %157 = tpu.dynamic_rotate %156 by %c124_i32_63 dim 1 : vector<8x128xf32>, i32 -> vector<8x128xf32>
    %c4_i32_64 = arith.constant 4 : i32
    %158 = tpu.dynamic_rotate %156 by %c4_i32_64 dim 1 : vector<8x128xf32>, i32 -> vector<8x128xf32>
    %c4_i32_65 = arith.constant 4 : i32
    %159 = vector.broadcast %c4_i32_65 : i32 to vector<8x128xi32>
    %160 = arith.andi %44, %159 : vector<8x128xi32>
    %c0_i32_66 = arith.constant 0 : i32
    %161 = vector.broadcast %c0_i32_66 : i32 to vector<8x128xi32>
    %162 = arith.cmpi eq, %160, %161 : vector<8x128xi32>
    %163 = arith.select %162, %157, %158 : vector<8x128xi1>, vector<8x128xf32>
    %c16_i32_67 = arith.constant 16 : i32
    %164 = vector.broadcast %c16_i32_67 : i32 to vector<8x128xi32>
    %165 = arith.andi %44, %164 : vector<8x128xi32>
    %c0_i32_68 = arith.constant 0 : i32
    %166 = vector.broadcast %c0_i32_68 : i32 to vector<8x128xi32>
    %167 = arith.cmpi ne, %165, %166 : vector<8x128xi32>
    %168 = arith.xori %167, %162 : vector<8x128xi1>
    %cst_69 = arith.constant dense<true> : vector<8x128xi1>
    %169 = arith.xori %168, %cst_69 : vector<8x128xi1>
    %170 = arith.minimumf %156, %163 : vector<8x128xf32>
    %171 = arith.maximumf %156, %163 : vector<8x128xf32>
    %172 = arith.select %169, %170, %171 : vector<8x128xi1>, vector<8x128xf32>
    %c126_i32_70 = arith.constant 126 : i32
    %173 = tpu.dynamic_rotate %172 by %c126_i32_70 dim 1 : vector<8x128xf32>, i32 -> vector<8x128xf32>
    %c2_i32_71 = arith.constant 2 : i32
    %174 = tpu.dynamic_rotate %172 by %c2_i32_71 dim 1 : vector<8x128xf32>, i32 -> vector<8x128xf32>
    %c2_i32_72 = arith.constant 2 : i32
    %175 = vector.broadcast %c2_i32_72 : i32 to vector<8x128xi32>
    %176 = arith.andi %44, %175 : vector<8x128xi32>
    %c0_i32_73 = arith.constant 0 : i32
    %177 = vector.broadcast %c0_i32_73 : i32 to vector<8x128xi32>
    %178 = arith.cmpi eq, %176, %177 : vector<8x128xi32>
    %179 = arith.select %178, %173, %174 : vector<8x128xi1>, vector<8x128xf32>
    %c16_i32_74 = arith.constant 16 : i32
    %180 = vector.broadcast %c16_i32_74 : i32 to vector<8x128xi32>
    %181 = arith.andi %44, %180 : vector<8x128xi32>
    %c0_i32_75 = arith.constant 0 : i32
    %182 = vector.broadcast %c0_i32_75 : i32 to vector<8x128xi32>
    %183 = arith.cmpi ne, %181, %182 : vector<8x128xi32>
    %184 = arith.xori %183, %178 : vector<8x128xi1>
    %cst_76 = arith.constant dense<true> : vector<8x128xi1>
    %185 = arith.xori %184, %cst_76 : vector<8x128xi1>
    %186 = arith.minimumf %172, %179 : vector<8x128xf32>
    %187 = arith.maximumf %172, %179 : vector<8x128xf32>
    %188 = arith.select %185, %186, %187 : vector<8x128xi1>, vector<8x128xf32>
    %c127_i32_77 = arith.constant 127 : i32
    %189 = tpu.dynamic_rotate %188 by %c127_i32_77 dim 1 : vector<8x128xf32>, i32 -> vector<8x128xf32>
    %c1_i32_78 = arith.constant 1 : i32
    %190 = tpu.dynamic_rotate %188 by %c1_i32_78 dim 1 : vector<8x128xf32>, i32 -> vector<8x128xf32>
    %c1_i32_79 = arith.constant 1 : i32
    %191 = vector.broadcast %c1_i32_79 : i32 to vector<8x128xi32>
    %192 = arith.andi %44, %191 : vector<8x128xi32>
    %c0_i32_80 = arith.constant 0 : i32
    %193 = vector.broadcast %c0_i32_80 : i32 to vector<8x128xi32>
    %194 = arith.cmpi eq, %192, %193 : vector<8x128xi32>
    %195 = arith.select %194, %189, %190 : vector<8x128xi1>, vector<8x128xf32>
    %c16_i32_81 = arith.constant 16 : i32
    %196 = vector.broadcast %c16_i32_81 : i32 to vector<8x128xi32>
    %197 = arith.andi %44, %196 : vector<8x128xi32>
    %c0_i32_82 = arith.constant 0 : i32
    %198 = vector.broadcast %c0_i32_82 : i32 to vector<8x128xi32>
    %199 = arith.cmpi ne, %197, %198 : vector<8x128xi32>
    %200 = arith.xori %199, %194 : vector<8x128xi1>
    %cst_83 = arith.constant dense<true> : vector<8x128xi1>
    %201 = arith.xori %200, %cst_83 : vector<8x128xi1>
    %202 = arith.minimumf %188, %195 : vector<8x128xf32>
    %203 = arith.maximumf %188, %195 : vector<8x128xf32>
    %204 = arith.select %201, %202, %203 : vector<8x128xi1>, vector<8x128xf32>
    %c112_i32 = arith.constant 112 : i32
    %205 = tpu.dynamic_rotate %204 by %c112_i32 dim 1 : vector<8x128xf32>, i32 -> vector<8x128xf32>
    %c16_i32_84 = arith.constant 16 : i32
    %206 = tpu.dynamic_rotate %204 by %c16_i32_84 dim 1 : vector<8x128xf32>, i32 -> vector<8x128xf32>
    %c16_i32_85 = arith.constant 16 : i32
    %207 = vector.broadcast %c16_i32_85 : i32 to vector<8x128xi32>
    %208 = arith.andi %44, %207 : vector<8x128xi32>
    %c0_i32_86 = arith.constant 0 : i32
    %209 = vector.broadcast %c0_i32_86 : i32 to vector<8x128xi32>
    %210 = arith.cmpi eq, %208, %209 : vector<8x128xi32>
    %211 = arith.select %210, %205, %206 : vector<8x128xi1>, vector<8x128xf32>
    %c32_i32 = arith.constant 32 : i32
    %212 = vector.broadcast %c32_i32 : i32 to vector<8x128xi32>
    %213 = arith.andi %44, %212 : vector<8x128xi32>
    %c0_i32_87 = arith.constant 0 : i32
    %214 = vector.broadcast %c0_i32_87 : i32 to vector<8x128xi32>
    %215 = arith.cmpi ne, %213, %214 : vector<8x128xi32>
    %216 = arith.xori %215, %210 : vector<8x128xi1>
    %cst_88 = arith.constant dense<true> : vector<8x128xi1>
    %217 = arith.xori %216, %cst_88 : vector<8x128xi1>
    %218 = arith.minimumf %204, %211 : vector<8x128xf32>
    %219 = arith.maximumf %204, %211 : vector<8x128xf32>
    %220 = arith.select %217, %218, %219 : vector<8x128xi1>, vector<8x128xf32>
    %c120_i32_89 = arith.constant 120 : i32
    %221 = tpu.dynamic_rotate %220 by %c120_i32_89 dim 1 : vector<8x128xf32>, i32 -> vector<8x128xf32>
    %c8_i32_90 = arith.constant 8 : i32
    %222 = tpu.dynamic_rotate %220 by %c8_i32_90 dim 1 : vector<8x128xf32>, i32 -> vector<8x128xf32>
    %c8_i32_91 = arith.constant 8 : i32
    %223 = vector.broadcast %c8_i32_91 : i32 to vector<8x128xi32>
    %224 = arith.andi %44, %223 : vector<8x128xi32>
    %c0_i32_92 = arith.constant 0 : i32
    %225 = vector.broadcast %c0_i32_92 : i32 to vector<8x128xi32>
    %226 = arith.cmpi eq, %224, %225 : vector<8x128xi32>
    %227 = arith.select %226, %221, %222 : vector<8x128xi1>, vector<8x128xf32>
    %c32_i32_93 = arith.constant 32 : i32
    %228 = vector.broadcast %c32_i32_93 : i32 to vector<8x128xi32>
    %229 = arith.andi %44, %228 : vector<8x128xi32>
    %c0_i32_94 = arith.constant 0 : i32
    %230 = vector.broadcast %c0_i32_94 : i32 to vector<8x128xi32>
    %231 = arith.cmpi ne, %229, %230 : vector<8x128xi32>
    %232 = arith.xori %231, %226 : vector<8x128xi1>
    %cst_95 = arith.constant dense<true> : vector<8x128xi1>
    %233 = arith.xori %232, %cst_95 : vector<8x128xi1>
    %234 = arith.minimumf %220, %227 : vector<8x128xf32>
    %235 = arith.maximumf %220, %227 : vector<8x128xf32>
    %236 = arith.select %233, %234, %235 : vector<8x128xi1>, vector<8x128xf32>
    %c124_i32_96 = arith.constant 124 : i32
    %237 = tpu.dynamic_rotate %236 by %c124_i32_96 dim 1 : vector<8x128xf32>, i32 -> vector<8x128xf32>
    %c4_i32_97 = arith.constant 4 : i32
    %238 = tpu.dynamic_rotate %236 by %c4_i32_97 dim 1 : vector<8x128xf32>, i32 -> vector<8x128xf32>
    %c4_i32_98 = arith.constant 4 : i32
    %239 = vector.broadcast %c4_i32_98 : i32 to vector<8x128xi32>
    %240 = arith.andi %44, %239 : vector<8x128xi32>
    %c0_i32_99 = arith.constant 0 : i32
    %241 = vector.broadcast %c0_i32_99 : i32 to vector<8x128xi32>
    %242 = arith.cmpi eq, %240, %241 : vector<8x128xi32>
    %243 = arith.select %242, %237, %238 : vector<8x128xi1>, vector<8x128xf32>
    %c32_i32_100 = arith.constant 32 : i32
    %244 = vector.broadcast %c32_i32_100 : i32 to vector<8x128xi32>
    %245 = arith.andi %44, %244 : vector<8x128xi32>
    %c0_i32_101 = arith.constant 0 : i32
    %246 = vector.broadcast %c0_i32_101 : i32 to vector<8x128xi32>
    %247 = arith.cmpi ne, %245, %246 : vector<8x128xi32>
    %248 = arith.xori %247, %242 : vector<8x128xi1>
    %cst_102 = arith.constant dense<true> : vector<8x128xi1>
    %249 = arith.xori %248, %cst_102 : vector<8x128xi1>
    %250 = arith.minimumf %236, %243 : vector<8x128xf32>
    %251 = arith.maximumf %236, %243 : vector<8x128xf32>
    %252 = arith.select %249, %250, %251 : vector<8x128xi1>, vector<8x128xf32>
    %c126_i32_103 = arith.constant 126 : i32
    %253 = tpu.dynamic_rotate %252 by %c126_i32_103 dim 1 : vector<8x128xf32>, i32 -> vector<8x128xf32>
    %c2_i32_104 = arith.constant 2 : i32
    %254 = tpu.dynamic_rotate %252 by %c2_i32_104 dim 1 : vector<8x128xf32>, i32 -> vector<8x128xf32>
    %c2_i32_105 = arith.constant 2 : i32
    %255 = vector.broadcast %c2_i32_105 : i32 to vector<8x128xi32>
    %256 = arith.andi %44, %255 : vector<8x128xi32>
    %c0_i32_106 = arith.constant 0 : i32
    %257 = vector.broadcast %c0_i32_106 : i32 to vector<8x128xi32>
    %258 = arith.cmpi eq, %256, %257 : vector<8x128xi32>
    %259 = arith.select %258, %253, %254 : vector<8x128xi1>, vector<8x128xf32>
    %c32_i32_107 = arith.constant 32 : i32
    %260 = vector.broadcast %c32_i32_107 : i32 to vector<8x128xi32>
    %261 = arith.andi %44, %260 : vector<8x128xi32>
    %c0_i32_108 = arith.constant 0 : i32
    %262 = vector.broadcast %c0_i32_108 : i32 to vector<8x128xi32>
    %263 = arith.cmpi ne, %261, %262 : vector<8x128xi32>
    %264 = arith.xori %263, %258 : vector<8x128xi1>
    %cst_109 = arith.constant dense<true> : vector<8x128xi1>
    %265 = arith.xori %264, %cst_109 : vector<8x128xi1>
    %266 = arith.minimumf %252, %259 : vector<8x128xf32>
    %267 = arith.maximumf %252, %259 : vector<8x128xf32>
    %268 = arith.select %265, %266, %267 : vector<8x128xi1>, vector<8x128xf32>
    %c127_i32_110 = arith.constant 127 : i32
    %269 = tpu.dynamic_rotate %268 by %c127_i32_110 dim 1 : vector<8x128xf32>, i32 -> vector<8x128xf32>
    %c1_i32_111 = arith.constant 1 : i32
    %270 = tpu.dynamic_rotate %268 by %c1_i32_111 dim 1 : vector<8x128xf32>, i32 -> vector<8x128xf32>
    %c1_i32_112 = arith.constant 1 : i32
    %271 = vector.broadcast %c1_i32_112 : i32 to vector<8x128xi32>
    %272 = arith.andi %44, %271 : vector<8x128xi32>
    %c0_i32_113 = arith.constant 0 : i32
    %273 = vector.broadcast %c0_i32_113 : i32 to vector<8x128xi32>
    %274 = arith.cmpi eq, %272, %273 : vector<8x128xi32>
    %275 = arith.select %274, %269, %270 : vector<8x128xi1>, vector<8x128xf32>
    %c32_i32_114 = arith.constant 32 : i32
    %276 = vector.broadcast %c32_i32_114 : i32 to vector<8x128xi32>
    %277 = arith.andi %44, %276 : vector<8x128xi32>
    %c0_i32_115 = arith.constant 0 : i32
    %278 = vector.broadcast %c0_i32_115 : i32 to vector<8x128xi32>
    %279 = arith.cmpi ne, %277, %278 : vector<8x128xi32>
    %280 = arith.xori %279, %274 : vector<8x128xi1>
    %cst_116 = arith.constant dense<true> : vector<8x128xi1>
    %281 = arith.xori %280, %cst_116 : vector<8x128xi1>
    %282 = arith.minimumf %268, %275 : vector<8x128xf32>
    %283 = arith.maximumf %268, %275 : vector<8x128xf32>
    %284 = arith.select %281, %282, %283 : vector<8x128xi1>, vector<8x128xf32>
    %c96_i32 = arith.constant 96 : i32
    %285 = tpu.dynamic_rotate %284 by %c96_i32 dim 1 : vector<8x128xf32>, i32 -> vector<8x128xf32>
    %c32_i32_117 = arith.constant 32 : i32
    %286 = tpu.dynamic_rotate %284 by %c32_i32_117 dim 1 : vector<8x128xf32>, i32 -> vector<8x128xf32>
    %c32_i32_118 = arith.constant 32 : i32
    %287 = vector.broadcast %c32_i32_118 : i32 to vector<8x128xi32>
    %288 = arith.andi %44, %287 : vector<8x128xi32>
    %c0_i32_119 = arith.constant 0 : i32
    %289 = vector.broadcast %c0_i32_119 : i32 to vector<8x128xi32>
    %290 = arith.cmpi eq, %288, %289 : vector<8x128xi32>
    %291 = arith.select %290, %285, %286 : vector<8x128xi1>, vector<8x128xf32>
    %c64_i32 = arith.constant 64 : i32
    %292 = vector.broadcast %c64_i32 : i32 to vector<8x128xi32>
    %293 = arith.andi %44, %292 : vector<8x128xi32>
    %c0_i32_120 = arith.constant 0 : i32
    %294 = vector.broadcast %c0_i32_120 : i32 to vector<8x128xi32>
    %295 = arith.cmpi ne, %293, %294 : vector<8x128xi32>
    %296 = arith.xori %295, %290 : vector<8x128xi1>
    %cst_121 = arith.constant dense<true> : vector<8x128xi1>
    %297 = arith.xori %296, %cst_121 : vector<8x128xi1>
    %298 = arith.minimumf %284, %291 : vector<8x128xf32>
    %299 = arith.maximumf %284, %291 : vector<8x128xf32>
    %300 = arith.select %297, %298, %299 : vector<8x128xi1>, vector<8x128xf32>
    %c112_i32_122 = arith.constant 112 : i32
    %301 = tpu.dynamic_rotate %300 by %c112_i32_122 dim 1 : vector<8x128xf32>, i32 -> vector<8x128xf32>
    %c16_i32_123 = arith.constant 16 : i32
    %302 = tpu.dynamic_rotate %300 by %c16_i32_123 dim 1 : vector<8x128xf32>, i32 -> vector<8x128xf32>
    %c16_i32_124 = arith.constant 16 : i32
    %303 = vector.broadcast %c16_i32_124 : i32 to vector<8x128xi32>
    %304 = arith.andi %44, %303 : vector<8x128xi32>
    %c0_i32_125 = arith.constant 0 : i32
    %305 = vector.broadcast %c0_i32_125 : i32 to vector<8x128xi32>
    %306 = arith.cmpi eq, %304, %305 : vector<8x128xi32>
    %307 = arith.select %306, %301, %302 : vector<8x128xi1>, vector<8x128xf32>
    %c64_i32_126 = arith.constant 64 : i32
    %308 = vector.broadcast %c64_i32_126 : i32 to vector<8x128xi32>
    %309 = arith.andi %44, %308 : vector<8x128xi32>
    %c0_i32_127 = arith.constant 0 : i32
    %310 = vector.broadcast %c0_i32_127 : i32 to vector<8x128xi32>
    %311 = arith.cmpi ne, %309, %310 : vector<8x128xi32>
    %312 = arith.xori %311, %306 : vector<8x128xi1>
    %cst_128 = arith.constant dense<true> : vector<8x128xi1>
    %313 = arith.xori %312, %cst_128 : vector<8x128xi1>
    %314 = arith.minimumf %300, %307 : vector<8x128xf32>
    %315 = arith.maximumf %300, %307 : vector<8x128xf32>
    %316 = arith.select %313, %314, %315 : vector<8x128xi1>, vector<8x128xf32>
    %c120_i32_129 = arith.constant 120 : i32
    %317 = tpu.dynamic_rotate %316 by %c120_i32_129 dim 1 : vector<8x128xf32>, i32 -> vector<8x128xf32>
    %c8_i32_130 = arith.constant 8 : i32
    %318 = tpu.dynamic_rotate %316 by %c8_i32_130 dim 1 : vector<8x128xf32>, i32 -> vector<8x128xf32>
    %c8_i32_131 = arith.constant 8 : i32
    %319 = vector.broadcast %c8_i32_131 : i32 to vector<8x128xi32>
    %320 = arith.andi %44, %319 : vector<8x128xi32>
    %c0_i32_132 = arith.constant 0 : i32
    %321 = vector.broadcast %c0_i32_132 : i32 to vector<8x128xi32>
    %322 = arith.cmpi eq, %320, %321 : vector<8x128xi32>
    %323 = arith.select %322, %317, %318 : vector<8x128xi1>, vector<8x128xf32>
    %c64_i32_133 = arith.constant 64 : i32
    %324 = vector.broadcast %c64_i32_133 : i32 to vector<8x128xi32>
    %325 = arith.andi %44, %324 : vector<8x128xi32>
    %c0_i32_134 = arith.constant 0 : i32
    %326 = vector.broadcast %c0_i32_134 : i32 to vector<8x128xi32>
    %327 = arith.cmpi ne, %325, %326 : vector<8x128xi32>
    %328 = arith.xori %327, %322 : vector<8x128xi1>
    %cst_135 = arith.constant dense<true> : vector<8x128xi1>
    %329 = arith.xori %328, %cst_135 : vector<8x128xi1>
    %330 = arith.minimumf %316, %323 : vector<8x128xf32>
    %331 = arith.maximumf %316, %323 : vector<8x128xf32>
    %332 = arith.select %329, %330, %331 : vector<8x128xi1>, vector<8x128xf32>
    %c124_i32_136 = arith.constant 124 : i32
    %333 = tpu.dynamic_rotate %332 by %c124_i32_136 dim 1 : vector<8x128xf32>, i32 -> vector<8x128xf32>
    %c4_i32_137 = arith.constant 4 : i32
    %334 = tpu.dynamic_rotate %332 by %c4_i32_137 dim 1 : vector<8x128xf32>, i32 -> vector<8x128xf32>
    %c4_i32_138 = arith.constant 4 : i32
    %335 = vector.broadcast %c4_i32_138 : i32 to vector<8x128xi32>
    %336 = arith.andi %44, %335 : vector<8x128xi32>
    %c0_i32_139 = arith.constant 0 : i32
    %337 = vector.broadcast %c0_i32_139 : i32 to vector<8x128xi32>
    %338 = arith.cmpi eq, %336, %337 : vector<8x128xi32>
    %339 = arith.select %338, %333, %334 : vector<8x128xi1>, vector<8x128xf32>
    %c64_i32_140 = arith.constant 64 : i32
    %340 = vector.broadcast %c64_i32_140 : i32 to vector<8x128xi32>
    %341 = arith.andi %44, %340 : vector<8x128xi32>
    %c0_i32_141 = arith.constant 0 : i32
    %342 = vector.broadcast %c0_i32_141 : i32 to vector<8x128xi32>
    %343 = arith.cmpi ne, %341, %342 : vector<8x128xi32>
    %344 = arith.xori %343, %338 : vector<8x128xi1>
    %cst_142 = arith.constant dense<true> : vector<8x128xi1>
    %345 = arith.xori %344, %cst_142 : vector<8x128xi1>
    %346 = arith.minimumf %332, %339 : vector<8x128xf32>
    %347 = arith.maximumf %332, %339 : vector<8x128xf32>
    %348 = arith.select %345, %346, %347 : vector<8x128xi1>, vector<8x128xf32>
    %c126_i32_143 = arith.constant 126 : i32
    %349 = tpu.dynamic_rotate %348 by %c126_i32_143 dim 1 : vector<8x128xf32>, i32 -> vector<8x128xf32>
    %c2_i32_144 = arith.constant 2 : i32
    %350 = tpu.dynamic_rotate %348 by %c2_i32_144 dim 1 : vector<8x128xf32>, i32 -> vector<8x128xf32>
    %c2_i32_145 = arith.constant 2 : i32
    %351 = vector.broadcast %c2_i32_145 : i32 to vector<8x128xi32>
    %352 = arith.andi %44, %351 : vector<8x128xi32>
    %c0_i32_146 = arith.constant 0 : i32
    %353 = vector.broadcast %c0_i32_146 : i32 to vector<8x128xi32>
    %354 = arith.cmpi eq, %352, %353 : vector<8x128xi32>
    %355 = arith.select %354, %349, %350 : vector<8x128xi1>, vector<8x128xf32>
    %c64_i32_147 = arith.constant 64 : i32
    %356 = vector.broadcast %c64_i32_147 : i32 to vector<8x128xi32>
    %357 = arith.andi %44, %356 : vector<8x128xi32>
    %c0_i32_148 = arith.constant 0 : i32
    %358 = vector.broadcast %c0_i32_148 : i32 to vector<8x128xi32>
    %359 = arith.cmpi ne, %357, %358 : vector<8x128xi32>
    %360 = arith.xori %359, %354 : vector<8x128xi1>
    %cst_149 = arith.constant dense<true> : vector<8x128xi1>
    %361 = arith.xori %360, %cst_149 : vector<8x128xi1>
    %362 = arith.minimumf %348, %355 : vector<8x128xf32>
    %363 = arith.maximumf %348, %355 : vector<8x128xf32>
    %364 = arith.select %361, %362, %363 : vector<8x128xi1>, vector<8x128xf32>
    %c127_i32_150 = arith.constant 127 : i32
    %365 = tpu.dynamic_rotate %364 by %c127_i32_150 dim 1 : vector<8x128xf32>, i32 -> vector<8x128xf32>
    %c1_i32_151 = arith.constant 1 : i32
    %366 = tpu.dynamic_rotate %364 by %c1_i32_151 dim 1 : vector<8x128xf32>, i32 -> vector<8x128xf32>
    %c1_i32_152 = arith.constant 1 : i32
    %367 = vector.broadcast %c1_i32_152 : i32 to vector<8x128xi32>
    %368 = arith.andi %44, %367 : vector<8x128xi32>
    %c0_i32_153 = arith.constant 0 : i32
    %369 = vector.broadcast %c0_i32_153 : i32 to vector<8x128xi32>
    %370 = arith.cmpi eq, %368, %369 : vector<8x128xi32>
    %371 = arith.select %370, %365, %366 : vector<8x128xi1>, vector<8x128xf32>
    %c64_i32_154 = arith.constant 64 : i32
    %372 = vector.broadcast %c64_i32_154 : i32 to vector<8x128xi32>
    %373 = arith.andi %44, %372 : vector<8x128xi32>
    %c0_i32_155 = arith.constant 0 : i32
    %374 = vector.broadcast %c0_i32_155 : i32 to vector<8x128xi32>
    %375 = arith.cmpi ne, %373, %374 : vector<8x128xi32>
    %376 = arith.xori %375, %370 : vector<8x128xi1>
    %cst_156 = arith.constant dense<true> : vector<8x128xi1>
    %377 = arith.xori %376, %cst_156 : vector<8x128xi1>
    %378 = arith.minimumf %364, %371 : vector<8x128xf32>
    %379 = arith.maximumf %364, %371 : vector<8x128xf32>
    %380 = arith.select %377, %378, %379 : vector<8x128xi1>, vector<8x128xf32>
    %c64_i32_157 = arith.constant 64 : i32
    %381 = tpu.dynamic_rotate %380 by %c64_i32_157 dim 1 : vector<8x128xf32>, i32 -> vector<8x128xf32>
    %c64_i32_158 = arith.constant 64 : i32
    %382 = tpu.dynamic_rotate %380 by %c64_i32_158 dim 1 : vector<8x128xf32>, i32 -> vector<8x128xf32>
    %c64_i32_159 = arith.constant 64 : i32
    %383 = vector.broadcast %c64_i32_159 : i32 to vector<8x128xi32>
    %384 = arith.andi %44, %383 : vector<8x128xi32>
    %c0_i32_160 = arith.constant 0 : i32
    %385 = vector.broadcast %c0_i32_160 : i32 to vector<8x128xi32>
    %386 = arith.cmpi eq, %384, %385 : vector<8x128xi32>
    %387 = arith.select %386, %381, %382 : vector<8x128xi1>, vector<8x128xf32>
    %c128_i32 = arith.constant 128 : i32
    %388 = vector.broadcast %c128_i32 : i32 to vector<8x128xi32>
    %389 = arith.andi %44, %388 : vector<8x128xi32>
    %c0_i32_161 = arith.constant 0 : i32
    %390 = vector.broadcast %c0_i32_161 : i32 to vector<8x128xi32>
    %391 = arith.cmpi ne, %389, %390 : vector<8x128xi32>
    %392 = arith.xori %391, %386 : vector<8x128xi1>
    %cst_162 = arith.constant dense<true> : vector<8x128xi1>
    %393 = arith.xori %392, %cst_162 : vector<8x128xi1>
    %394 = arith.minimumf %380, %387 : vector<8x128xf32>
    %395 = arith.maximumf %380, %387 : vector<8x128xf32>
    %396 = arith.select %393, %394, %395 : vector<8x128xi1>, vector<8x128xf32>
    %c96_i32_163 = arith.constant 96 : i32
    %397 = tpu.dynamic_rotate %396 by %c96_i32_163 dim 1 : vector<8x128xf32>, i32 -> vector<8x128xf32>
    %c32_i32_164 = arith.constant 32 : i32
    %398 = tpu.dynamic_rotate %396 by %c32_i32_164 dim 1 : vector<8x128xf32>, i32 -> vector<8x128xf32>
    %c32_i32_165 = arith.constant 32 : i32
    %399 = vector.broadcast %c32_i32_165 : i32 to vector<8x128xi32>
    %400 = arith.andi %44, %399 : vector<8x128xi32>
    %c0_i32_166 = arith.constant 0 : i32
    %401 = vector.broadcast %c0_i32_166 : i32 to vector<8x128xi32>
    %402 = arith.cmpi eq, %400, %401 : vector<8x128xi32>
    %403 = arith.select %402, %397, %398 : vector<8x128xi1>, vector<8x128xf32>
    %c128_i32_167 = arith.constant 128 : i32
    %404 = vector.broadcast %c128_i32_167 : i32 to vector<8x128xi32>
    %405 = arith.andi %44, %404 : vector<8x128xi32>
    %c0_i32_168 = arith.constant 0 : i32
    %406 = vector.broadcast %c0_i32_168 : i32 to vector<8x128xi32>
    %407 = arith.cmpi ne, %405, %406 : vector<8x128xi32>
    %408 = arith.xori %407, %402 : vector<8x128xi1>
    %cst_169 = arith.constant dense<true> : vector<8x128xi1>
    %409 = arith.xori %408, %cst_169 : vector<8x128xi1>
    %410 = arith.minimumf %396, %403 : vector<8x128xf32>
    %411 = arith.maximumf %396, %403 : vector<8x128xf32>
    %412 = arith.select %409, %410, %411 : vector<8x128xi1>, vector<8x128xf32>
    %c112_i32_170 = arith.constant 112 : i32
    %413 = tpu.dynamic_rotate %412 by %c112_i32_170 dim 1 : vector<8x128xf32>, i32 -> vector<8x128xf32>
    %c16_i32_171 = arith.constant 16 : i32
    %414 = tpu.dynamic_rotate %412 by %c16_i32_171 dim 1 : vector<8x128xf32>, i32 -> vector<8x128xf32>
    %c16_i32_172 = arith.constant 16 : i32
    %415 = vector.broadcast %c16_i32_172 : i32 to vector<8x128xi32>
    %416 = arith.andi %44, %415 : vector<8x128xi32>
    %c0_i32_173 = arith.constant 0 : i32
    %417 = vector.broadcast %c0_i32_173 : i32 to vector<8x128xi32>
    %418 = arith.cmpi eq, %416, %417 : vector<8x128xi32>
    %419 = arith.select %418, %413, %414 : vector<8x128xi1>, vector<8x128xf32>
    %c128_i32_174 = arith.constant 128 : i32
    %420 = vector.broadcast %c128_i32_174 : i32 to vector<8x128xi32>
    %421 = arith.andi %44, %420 : vector<8x128xi32>
    %c0_i32_175 = arith.constant 0 : i32
    %422 = vector.broadcast %c0_i32_175 : i32 to vector<8x128xi32>
    %423 = arith.cmpi ne, %421, %422 : vector<8x128xi32>
    %424 = arith.xori %423, %418 : vector<8x128xi1>
    %cst_176 = arith.constant dense<true> : vector<8x128xi1>
    %425 = arith.xori %424, %cst_176 : vector<8x128xi1>
    %426 = arith.minimumf %412, %419 : vector<8x128xf32>
    %427 = arith.maximumf %412, %419 : vector<8x128xf32>
    %428 = arith.select %425, %426, %427 : vector<8x128xi1>, vector<8x128xf32>
    %c120_i32_177 = arith.constant 120 : i32
    %429 = tpu.dynamic_rotate %428 by %c120_i32_177 dim 1 : vector<8x128xf32>, i32 -> vector<8x128xf32>
    %c8_i32_178 = arith.constant 8 : i32
    %430 = tpu.dynamic_rotate %428 by %c8_i32_178 dim 1 : vector<8x128xf32>, i32 -> vector<8x128xf32>
    %c8_i32_179 = arith.constant 8 : i32
    %431 = vector.broadcast %c8_i32_179 : i32 to vector<8x128xi32>
    %432 = arith.andi %44, %431 : vector<8x128xi32>
    %c0_i32_180 = arith.constant 0 : i32
    %433 = vector.broadcast %c0_i32_180 : i32 to vector<8x128xi32>
    %434 = arith.cmpi eq, %432, %433 : vector<8x128xi32>
    %435 = arith.select %434, %429, %430 : vector<8x128xi1>, vector<8x128xf32>
    %c128_i32_181 = arith.constant 128 : i32
    %436 = vector.broadcast %c128_i32_181 : i32 to vector<8x128xi32>
    %437 = arith.andi %44, %436 : vector<8x128xi32>
    %c0_i32_182 = arith.constant 0 : i32
    %438 = vector.broadcast %c0_i32_182 : i32 to vector<8x128xi32>
    %439 = arith.cmpi ne, %437, %438 : vector<8x128xi32>
    %440 = arith.xori %439, %434 : vector<8x128xi1>
    %cst_183 = arith.constant dense<true> : vector<8x128xi1>
    %441 = arith.xori %440, %cst_183 : vector<8x128xi1>
    %442 = arith.minimumf %428, %435 : vector<8x128xf32>
    %443 = arith.maximumf %428, %435 : vector<8x128xf32>
    %444 = arith.select %441, %442, %443 : vector<8x128xi1>, vector<8x128xf32>
    %c124_i32_184 = arith.constant 124 : i32
    %445 = tpu.dynamic_rotate %444 by %c124_i32_184 dim 1 : vector<8x128xf32>, i32 -> vector<8x128xf32>
    %c4_i32_185 = arith.constant 4 : i32
    %446 = tpu.dynamic_rotate %444 by %c4_i32_185 dim 1 : vector<8x128xf32>, i32 -> vector<8x128xf32>
    %c4_i32_186 = arith.constant 4 : i32
    %447 = vector.broadcast %c4_i32_186 : i32 to vector<8x128xi32>
    %448 = arith.andi %44, %447 : vector<8x128xi32>
    %c0_i32_187 = arith.constant 0 : i32
    %449 = vector.broadcast %c0_i32_187 : i32 to vector<8x128xi32>
    %450 = arith.cmpi eq, %448, %449 : vector<8x128xi32>
    %451 = arith.select %450, %445, %446 : vector<8x128xi1>, vector<8x128xf32>
    %c128_i32_188 = arith.constant 128 : i32
    %452 = vector.broadcast %c128_i32_188 : i32 to vector<8x128xi32>
    %453 = arith.andi %44, %452 : vector<8x128xi32>
    %c0_i32_189 = arith.constant 0 : i32
    %454 = vector.broadcast %c0_i32_189 : i32 to vector<8x128xi32>
    %455 = arith.cmpi ne, %453, %454 : vector<8x128xi32>
    %456 = arith.xori %455, %450 : vector<8x128xi1>
    %cst_190 = arith.constant dense<true> : vector<8x128xi1>
    %457 = arith.xori %456, %cst_190 : vector<8x128xi1>
    %458 = arith.minimumf %444, %451 : vector<8x128xf32>
    %459 = arith.maximumf %444, %451 : vector<8x128xf32>
    %460 = arith.select %457, %458, %459 : vector<8x128xi1>, vector<8x128xf32>
    %c126_i32_191 = arith.constant 126 : i32
    %461 = tpu.dynamic_rotate %460 by %c126_i32_191 dim 1 : vector<8x128xf32>, i32 -> vector<8x128xf32>
    %c2_i32_192 = arith.constant 2 : i32
    %462 = tpu.dynamic_rotate %460 by %c2_i32_192 dim 1 : vector<8x128xf32>, i32 -> vector<8x128xf32>
    %c2_i32_193 = arith.constant 2 : i32
    %463 = vector.broadcast %c2_i32_193 : i32 to vector<8x128xi32>
    %464 = arith.andi %44, %463 : vector<8x128xi32>
    %c0_i32_194 = arith.constant 0 : i32
    %465 = vector.broadcast %c0_i32_194 : i32 to vector<8x128xi32>
    %466 = arith.cmpi eq, %464, %465 : vector<8x128xi32>
    %467 = arith.select %466, %461, %462 : vector<8x128xi1>, vector<8x128xf32>
    %c128_i32_195 = arith.constant 128 : i32
    %468 = vector.broadcast %c128_i32_195 : i32 to vector<8x128xi32>
    %469 = arith.andi %44, %468 : vector<8x128xi32>
    %c0_i32_196 = arith.constant 0 : i32
    %470 = vector.broadcast %c0_i32_196 : i32 to vector<8x128xi32>
    %471 = arith.cmpi ne, %469, %470 : vector<8x128xi32>
    %472 = arith.xori %471, %466 : vector<8x128xi1>
    %cst_197 = arith.constant dense<true> : vector<8x128xi1>
    %473 = arith.xori %472, %cst_197 : vector<8x128xi1>
    %474 = arith.minimumf %460, %467 : vector<8x128xf32>
    %475 = arith.maximumf %460, %467 : vector<8x128xf32>
    %476 = arith.select %473, %474, %475 : vector<8x128xi1>, vector<8x128xf32>
    %c127_i32_198 = arith.constant 127 : i32
    %477 = tpu.dynamic_rotate %476 by %c127_i32_198 dim 1 : vector<8x128xf32>, i32 -> vector<8x128xf32>
    %c1_i32_199 = arith.constant 1 : i32
    %478 = tpu.dynamic_rotate %476 by %c1_i32_199 dim 1 : vector<8x128xf32>, i32 -> vector<8x128xf32>
    %c1_i32_200 = arith.constant 1 : i32
    %479 = vector.broadcast %c1_i32_200 : i32 to vector<8x128xi32>
    %480 = arith.andi %44, %479 : vector<8x128xi32>
    %c0_i32_201 = arith.constant 0 : i32
    %481 = vector.broadcast %c0_i32_201 : i32 to vector<8x128xi32>
    %482 = arith.cmpi eq, %480, %481 : vector<8x128xi32>
    %483 = arith.select %482, %477, %478 : vector<8x128xi1>, vector<8x128xf32>
    %c128_i32_202 = arith.constant 128 : i32
    %484 = vector.broadcast %c128_i32_202 : i32 to vector<8x128xi32>
    %485 = arith.andi %44, %484 : vector<8x128xi32>
    %c0_i32_203 = arith.constant 0 : i32
    %486 = vector.broadcast %c0_i32_203 : i32 to vector<8x128xi32>
    %487 = arith.cmpi ne, %485, %486 : vector<8x128xi32>
    %488 = arith.xori %487, %482 : vector<8x128xi1>
    %cst_204 = arith.constant dense<true> : vector<8x128xi1>
    %489 = arith.xori %488, %cst_204 : vector<8x128xi1>
    %490 = arith.minimumf %476, %483 : vector<8x128xf32>
    %491 = arith.maximumf %476, %483 : vector<8x128xf32>
    %492 = arith.select %489, %490, %491 : vector<8x128xi1>, vector<8x128xf32>
    %493 = vector.extract_strided_slice %492 {offsets = [0, 0], sizes = [8, 8], strides = [1, 1]} : vector<8x128xf32> to vector<8x8xf32>
    %494 = math.sqrt %493 : vector<8x8xf32>
    %cst_205 = arith.constant dense<0.000000e+00> : vector<8x64xf32>
    %495 = tpu.matmul %494, %2, %cst_205 {dimension_numbers = #tpu.dot_dimension_numbers<[1], [0], [0], [1], [0, 0, 1, 1], [], []>} : vector<8x8xf32>, vector<8x64xf32>, vector<8x64xf32> -> vector<8x64xf32>
    %496 = vector.broadcast %5 : vector<1x64xf32> to vector<8x64xf32>
    %497 = arith.addf %495, %496 : vector<8x64xf32>
    %cst_206 = arith.constant dense<0.000000e+00> : vector<8xf32>
    %498 = vector.multi_reduction <add>, %497, %cst_206 [1] : vector<8x64xf32> to vector<8xf32>
    %499 = vector.shape_cast %498 : vector<8xf32> to vector<8x1xf32>
    %cst_207 = arith.constant 6.400000e+01 : f32
    %500 = vector.broadcast %cst_207 : f32 to vector<8x1xf32>
    %501 = arith.divf %499, %500 : vector<8x1xf32>
    %502 = vector.broadcast %501 : vector<8x1xf32> to vector<8x64xf32>
    %503 = arith.subf %497, %502 : vector<8x64xf32>
    %504 = arith.mulf %503, %503 : vector<8x64xf32>
    %cst_208 = arith.constant dense<0.000000e+00> : vector<8xf32>
    %505 = vector.multi_reduction <add>, %504, %cst_208 [1] : vector<8x64xf32> to vector<8xf32>
    %506 = vector.shape_cast %505 : vector<8xf32> to vector<8x1xf32>
    %cst_209 = arith.constant 6.400000e+01 : f32
    %507 = vector.broadcast %cst_209 : f32 to vector<8x1xf32>
    %508 = arith.divf %506, %507 : vector<8x1xf32>
    %cst_210 = arith.constant 9.99999974E-6 : f32
    %509 = vector.broadcast %cst_210 : f32 to vector<8x1xf32>
    %510 = arith.addf %508, %509 : vector<8x1xf32>
    %511 = math.rsqrt %510 : vector<8x1xf32>
    %512 = vector.broadcast %511 : vector<8x1xf32> to vector<8x64xf32>
    %513 = arith.mulf %503, %512 : vector<8x64xf32>
    %514 = vector.broadcast %6 : vector<1x64xf32> to vector<8x64xf32>
    %515 = arith.mulf %513, %514 : vector<8x64xf32>
    %516 = vector.broadcast %7 : vector<1x64xf32> to vector<8x64xf32>
    %517 = arith.addf %515, %516 : vector<8x64xf32>
    %cst_211 = arith.constant 0.000000e+00 : f32
    %518 = vector.broadcast %cst_211 : f32 to vector<8x64xf32>
    %519 = arith.maximumf %517, %518 : vector<8x64xf32>
    %cst_212 = arith.constant dense<0.000000e+00> : vector<8x32xf32>
    %520 = tpu.matmul %519, %3, %cst_212 {dimension_numbers = #tpu.dot_dimension_numbers<[1], [0], [0], [1], [0, 0, 1, 1], [], []>} : vector<8x64xf32>, vector<64x32xf32>, vector<8x32xf32> -> vector<8x32xf32>
    %521 = vector.broadcast %8 : vector<1x32xf32> to vector<8x32xf32>
    %522 = arith.addf %520, %521 : vector<8x32xf32>
    %cst_213 = arith.constant dense<0.000000e+00> : vector<8xf32>
    %523 = vector.multi_reduction <add>, %522, %cst_213 [1] : vector<8x32xf32> to vector<8xf32>
    %524 = vector.shape_cast %523 : vector<8xf32> to vector<8x1xf32>
    %cst_214 = arith.constant 3.200000e+01 : f32
    %525 = vector.broadcast %cst_214 : f32 to vector<8x1xf32>
    %526 = arith.divf %524, %525 : vector<8x1xf32>
    %527 = vector.broadcast %526 : vector<8x1xf32> to vector<8x32xf32>
    %528 = arith.subf %522, %527 : vector<8x32xf32>
    %529 = arith.mulf %528, %528 : vector<8x32xf32>
    %cst_215 = arith.constant dense<0.000000e+00> : vector<8xf32>
    %530 = vector.multi_reduction <add>, %529, %cst_215 [1] : vector<8x32xf32> to vector<8xf32>
    %531 = vector.shape_cast %530 : vector<8xf32> to vector<8x1xf32>
    %cst_216 = arith.constant 3.200000e+01 : f32
    %532 = vector.broadcast %cst_216 : f32 to vector<8x1xf32>
    %533 = arith.divf %531, %532 : vector<8x1xf32>
    %cst_217 = arith.constant 9.99999974E-6 : f32
    %534 = vector.broadcast %cst_217 : f32 to vector<8x1xf32>
    %535 = arith.addf %533, %534 : vector<8x1xf32>
    %536 = math.rsqrt %535 : vector<8x1xf32>
    %537 = vector.broadcast %536 : vector<8x1xf32> to vector<8x32xf32>
    %538 = arith.mulf %528, %537 : vector<8x32xf32>
    %539 = vector.broadcast %9 : vector<1x32xf32> to vector<8x32xf32>
    %540 = arith.mulf %538, %539 : vector<8x32xf32>
    %541 = vector.broadcast %10 : vector<1x32xf32> to vector<8x32xf32>
    %542 = arith.addf %540, %541 : vector<8x32xf32>
    %cst_218 = arith.constant 0.000000e+00 : f32
    %543 = vector.broadcast %cst_218 : f32 to vector<8x32xf32>
    %544 = arith.maximumf %542, %543 : vector<8x32xf32>
    %cst_219 = arith.constant dense<0.000000e+00> : vector<1x8xf32>
    %545 = tpu.matmul %4, %544, %cst_219 {dimension_numbers = #tpu.dot_dimension_numbers<[1], [1], [0], [0], [0, 0, 1, 0], [], []>} : vector<1x32xf32>, vector<8x32xf32>, vector<1x8xf32> -> vector<1x8xf32>
    %546 = vector.broadcast %11 : vector<1x1xf32> to vector<1x8xf32>
    %547 = arith.addf %545, %546 : vector<1x8xf32>
    %548 = arith.negf %547 : vector<1x8xf32>
    %549 = math.exp %548 : vector<1x8xf32>
    %cst_220 = arith.constant 1.000000e+00 : f32
    %550 = vector.broadcast %cst_220 : f32 to vector<1x8xf32>
    %551 = arith.addf %550, %549 : vector<1x8xf32>
    %552 = arith.divf %550, %551 : vector<1x8xf32>
    %553 = vector.shape_cast %552 : vector<1x8xf32> to vector<1x1x8xf32>
    %c0_221 = arith.constant 0 : index
    %c0_222 = arith.constant 0 : index
    %c0_223 = arith.constant 0 : index
    %554 = vector.load %arg5[%c0_221, %c0_222, %c0_223] : memref<1x1x8xf32, #tpu.memory_space<vmem>>, vector<1x1x8xf32>
    tpu.vector_store %arg5[%c0_221, %c0_222, %c0_223], %553 {strides = array<i32>} : memref<1x1x8xf32, #tpu.memory_space<vmem>>, vector<1x1x8xf32>,
    return
  }
  func.func @transform_0(%arg0: i32) -> (i32, i32, i32) {
    %c0_i32 = arith.constant 0 : i32
    %c0_i32_0 = arith.constant 0 : i32
    %c0_i32_1 = arith.constant 0 : i32
    return %arg0, %c0_i32, %c0_i32_0 : i32, i32, i32
  }
  func.func @transform_1(%arg0: i32) -> (i32, i32, i32) {
    %c0_i32 = arith.constant 0 : i32
    %c0_i32_0 = arith.constant 0 : i32
    %c0_i32_1 = arith.constant 0 : i32
    return %arg0, %c0_i32, %c0_i32_0 : i32, i32, i32
  }
  func.func @transform_2(%arg0: i32) -> (i32, i32) {
    %c0_i32 = arith.constant 0 : i32
    %c0_i32_0 = arith.constant 0 : i32
    %c0_i32_1 = arith.constant 0 : i32
    return %c0_i32, %c0_i32_0 : i32, i32
  }
  func.func @transform_3(%arg0: i32) -> (i32, i32) {
    %c0_i32 = arith.constant 0 : i32
    %c0_i32_0 = arith.constant 0 : i32
    %c0_i32_1 = arith.constant 0 : i32
    return %c0_i32, %c0_i32_0 : i32, i32
  }
  func.func @transform_4(%arg0: i32) -> (i32, i32, i32) {
    %c0_i32 = arith.constant 0 : i32
    %c0_i32_0 = arith.constant 0 : i32
    %c0_i32_1 = arith.constant 0 : i32
    return %arg0, %c0_i32, %c0_i32_0 : i32, i32, i32
  }
}

</mosaic_0001>

<bundles_post_ra>
// kernel: tpu_custom_call.1
= control target key start
LH: loop header
LB: loop body
LE: loop exit
PB: predicated region body
PF: predicated region fallthrough
CT: control target
= control target key end

     0   :  { %9 = vsyncpa [#allocation3], 0  ;;  %s4059_s0 = inlined_call_operand.vmem [shape: f32[32,128,16], index: 0, kind: input, shape index: {}]   ;;  %s4060_s1 = inlined_call_operand.vmem [shape: f32[32,128,16], index: 1, kind: input, shape index: {}]   ;;  %s4061_s2 = inlined_call_operand.vmem [shape: f32[144,128], index: 2, kind: input, shape index: {}]   ;;  %s4062_s3 = inlined_call_operand.vmem [shape: f32[1,896], index: 3, kind: input, shape index: {}]   ;;  %s4063_s4 = inlined_call_operand.hbm [shape: f32[4,1,8], index: 4, kind: output, shape index: {}]  }
   0x1   :  { %11 = vsyncpa [#allocation3 + $0x1], 0  ;;  %s2915_s15 = smov 0   ;;  %s2917_s16 = smov 0  }
   0x2   :  { %s2919_s17 = smov 0   ;;  %s2921_s18 = smov 0  }
   0x3 LB: > { %s2936_s19 = sadd.s32 4294967295, %s2869_s18   ;;  %s2418_s20 = sadd.s32 4294967294, %s2869_s18   ;;  %s2869_s18 = sphi %s2921_s18, %s4098_s18   ;;  %s2865_s17 = sphi %s2919_s17, %s4097_s17   ;;  %s2861_s16 = sphi %s2917_s16, %s4096_s16   ;;  %s2857_s15 = sphi %s2915_s15, %s4095_s15  }
   0x4   : > { %s2940_s21 = sadd.s32 1, %s2869_s18   ;;  %s118_s22 = sadd.s32 1, %s2865_s17 }
   0x5   : > { %s115_s23 = ssub.s32 %s2869_s18, %s2940_s21  ;;  %p128_p0 = scmp.ne.s32.totalorder %s2865_s17, %s2861_s16 }
   0x6   : > { %p116_p1 = scmp.eq.s32.totalorder %s115_s23, 0  ;;  %p129_p2 = scmp.eq.s32.totalorder %s2936_s19, 3 }
   0x7   : > { %p134_p3 = scmp.ne.s32.totalorder %s2861_s16, %s2857_s15  ;;  %p135_p4 = scmp.eq.s32.totalorder %s2418_s20, 3 }
   0x8   : > { %s2951_s24 = scalar_select %p116_p1, %s2865_s17, %s118_s22  }
   0x9   : > { %p2953_p5 = por %p129_p2, %p128_p0  ;;  %p2957_p6 = por %p135_p4, %p134_p3 }
   0xa   : > { %p2421_p7 = scmp.ge.s32.totalorder %s2869_s18, 1  ;;  %p179_p8 = scmp.lt.s32.totalorder %s2869_s18, 5 }
   0xc   : > { %p180_p9 = pnand %p2421_p7, %p179_p8 }
   0xd   : > { %s2422_s27 = sshll.u32 (!%p180_p9), %s2936_s19, 3  ;;  %v226_v0 = vld [vmem:[%s4061_s2] sm:$0xff] (!%p180_p9)  ;;  %v227_v1 = vld [vmem:[%s4061_s2 + $0x8] sm:$0xff] (!%p180_p9)  ;;  %vm657_vm0 = vcmask (!%p180_p9), 130048   ;;  %v2871_v47 = vmov (!%p180_p9), 0   ;;  %vm1704_vm1 = vcmask (!%p180_p9), 1040384  }
   0xe   : > { %183 = sbr.rel (%p180_p9) target bundleno = 5200 (0x1450), region = 36  ;;  %p212_p10 = scmp.lt.s32.totalorder (!%p180_p9), %s2422_s27, 31  ;;  %v2970_v2 = vpack.c.bf16 (!%p180_p9), %v227_v1, %v226_v0  ;;  %2795 = vset.pattern.permute.xlu0 (!%p180_p9), %v2871_v47  ;;  %2796 = vset.pattern.permute.xlu1 (!%p180_p9), %v2871_v47  ;;  %vm1706_vm2 = vcmask (!%p180_p9), 1041408   ;;  %vm1708_vm3 = vcmask (!%p180_p9), 1042432   ;;  %vm1710_vm4 = vcmask (!%p180_p9), 1043456  }
   0xf   : > { %vm1712_vm5 = vcmask (!%p180_p9), 1044480   ;;  %vm1714_vm6 = vcmask (!%p180_p9), 1045504   ;;  %vm1716_vm7 = vcmask (!%p180_p9), 1046528   ;;  %vm2874_vm11 = vmmov (!%p180_p9), 1   ;;  %s2876_s11 = smov (!%p180_p9), 126   ;;  %s2877_s12 = smov (!%p180_p9), 4  }
  0x10   : > { %2476 = vmatprep.mubr.msk.bf16.mxu0 (!%p180_p9), %vm657_vm0, %v2970_v2  ;;  %2496 = vmatprep.mubr.msk.bf16.mxu1 (!%p180_p9), %vm657_vm0, %v2970_v2  ;;  %s2878_s13 = smov (!%p180_p9), 124   ;;  %s2879_s14 = smov (!%p180_p9), 8  }
  0x11   : > { %s2880_s20 = smov (!%p180_p9), 120   ;;  %s2881_s22 = smov (!%p180_p9), 16  }
  0x12   : > { %s2882_s23 = smov (!%p180_p9), 112   ;;  %s2883_s28 = smov (!%p180_p9), 32  }
  0x13   : > { %s2884_s29 = smov (!%p180_p9), 96   ;;  %s2885_s30 = smov (!%p180_p9), 64  }
  0x14   : > { %s209_s5 = sand.u32 (!%p180_p9), 1, %s2861_s16   ;;  %s2455_s7 = sshll.u32 (!%p180_p9), %s2936_s19, 4 }
  0x15   : > { %s4100_s27 = smov (!%p212_p10, %s2422_s27), 31  ;;  %s210_s8 = scalar_lea.vmem [#allocation2], %s209_s5 }
  0x16   : > { %s2458_s6 = sshll.u32 %s4100_s27, 7  ;;  %s2872_s27 = smov 1  }
  0x17   : > { %s2984_s9 = scalar_lea.vmem %s4059_s0, %s2458_s6  ;;  %s3213_s10 = scalar_lea.vmem %s4060_s1, %s2458_s6 }
  0x18   : > { %v267_v3 = vld [vmem:[%s2984_s9 + $0x80] sm:$0xff]  ;;  %v268_v4 = vld [vmem:[%s2984_s9 + $0x88] sm:$0xff]  ;;  %v269_v14 = vld [vmem:[%s2984_s9 + $0x90] sm:$0xff]  ;;  %s2873_s6 = smov 127   ;;  %s2889_s19 = smov [#allocation2]  }
  0x19   : > { %v299_v5 = vld [vmem:[%s2984_s9 + $0x180] sm:$0xff]  ;;  %v517_v6 = vpack.c.bf16 %v268_v4, %v267_v3  ;;  %v300_v7 = vld [vmem:[%s2984_s9 + $0x188] sm:$0xff]  ;;  %v270_v16 = vld [vmem:[%s2984_s9 + $0x98] sm:$0xff] }
  0x1a   : > { %v251_v8 = vld [vmem:[%s2984_s9] sm:$0xff]  ;;  %v252_v9 = vld [vmem:[%s2984_s9 + $0x8] sm:$0xff]  ;;  %v533_v10 = vpack.c.bf16 %v300_v7, %v299_v5  ;;  %v301_v17 = vld [vmem:[%s2984_s9 + $0x190] sm:$0xff]  ;;  %v518_v20 = vpack.c.bf16 %v270_v16, %v269_v14 }
  0x1b   : > { %v509_v11 = vpack.c.bf16 %v252_v9, %v251_v8  ;;  %v283_v12 = vld [vmem:[%s2984_s9 + $0x100] sm:$0xff]  ;;  %v284_v13 = vld [vmem:[%s2984_s9 + $0x108] sm:$0xff]  ;;  %2674 = vmatprep.subr.msk.bf16.mxu0 %vm657_vm0, %v517_v6  ;;  %v302_v18 = vld [vmem:[%s2984_s9 + $0x198] sm:$0xff] }
  0x1c   : > { %v525_v15 = vpack.c.bf16 %v284_v13, %v283_v12  ;;  %2682 = vmatprep.subr.msk.bf16.mxu1 %vm657_vm0, %v533_v10  ;;  %v534_v21 = vpack.c.bf16 %v302_v18, %v301_v17  ;;  %v253_v22 = vld [vmem:[%s2984_s9 + $0x10] sm:$0xff]  ;;  %v254_v23 = vld [vmem:[%s2984_s9 + $0x18] sm:$0xff]  ;;  %v271_v29 = vld [vmem:[%s2984_s9 + $0xa0] sm:$0xff] }
  0x1d   : > { %v665_v19 = vsel %vm657_vm0, %v509_v11, 0  ;;  %v285_v24 = vld [vmem:[%s2984_s9 + $0x110] sm:$0xff]  ;;  %v286_v26 = vld [vmem:[%s2984_s9 + $0x118] sm:$0xff]  ;;  %v510_v27 = vpack.c.bf16 %v254_v23, %v253_v22  ;;  %v272_v30 = vld [vmem:[%s2984_s9 + $0xa8] sm:$0xff] }
  0x1e   : > { %2461 = vmatpush3.bf16.xpose.msra.mxu0 %v665_v19  ;;  %v713_v25 = vsel %vm657_vm0, %v525_v15, 0  ;;  %v526_v28 = vpack.c.bf16 %v286_v26, %v285_v24  ;;  %v303_v31 = vld [vmem:[%s2984_s9 + $0x1a0] sm:$0xff]  ;;  %v304_v32 = vld [vmem:[%s2984_s9 + $0x1a8] sm:$0xff]  ;;  %v519_v34 = vpack.c.bf16 %v272_v30, %v271_v29  ;;  %v273_v43 = vld [vmem:[%s2984_s9 + $0xb0] sm:$0xff] }
  0x1f   : > { %2481 = vmatpush3.bf16.xpose.msra.mxu1 %v713_v25  ;;  %2675 = vmatprep.subr.msk.bf16.mxu0 %vm657_vm0, %v518_v20  ;;  %v668_v33 = vsel %vm657_vm0, %v510_v27, 0  ;;  %v535_v36 = vpack.c.bf16 %v304_v32, %v303_v31  ;;  %v255_v37 = vld [vmem:[%s2984_s9 + $0x20] sm:$0xff]  ;;  %v256_v38 = vld [vmem:[%s2984_s9 + $0x28] sm:$0xff]  ;;  %v274_v44 = vld [vmem:[%s2984_s9 + $0xb8] sm:$0xff] }
  0x20   : > { %2683 = vmatprep.subr.msk.bf16.mxu1 %vm657_vm0, %v534_v21  ;;  %v716_v35 = vsel %vm657_vm0, %v526_v28, 0  ;;  %v287_v39 = vld [vmem:[%s2984_s9 + $0x120] sm:$0xff]  ;;  %v288_v40 = vld [vmem:[%s2984_s9 + $0x128] sm:$0xff]  ;;  %v511_v41 = vpack.c.bf16 %v256_v38, %v255_v37  ;;  %v305_v45 = vld [vmem:[%s2984_s9 + $0x1b0] sm:$0xff]  ;;  %v520_v49 = vpack.c.bf16 %v274_v44, %v273_v43 }
  0x21   : > { %v527_v42 = vpack.c.bf16 %v288_v40, %v287_v39  ;;  %v306_v46 = vld [vmem:[%s2984_s9 + $0x1b8] sm:$0xff]  ;;  %v257_v52 = vld [vmem:[%s2984_s9 + $0x30] sm:$0xff]  ;;  %v275_v58 = vld [vmem:[%s2984_s9 + $0xc0] sm:$0xff] }
  0x22   : > { %v671_v48 = vsel %vm657_vm0, %v511_v41, 0  ;;  %v536_v51 = vpack.c.bf16 %v306_v46, %v305_v45  ;;  %v258_v53 = vld [vmem:[%s2984_s9 + $0x38] sm:$0xff]  ;;  %v289_v54 = vld [vmem:[%s2984_s9 + $0x130] sm:$0xff]  ;;  %v276_v59 = vld [vmem:[%s2984_s9 + $0xc8] sm:$0xff] }
  0x23   : > { %v719_v50 = vsel %vm657_vm0, %v527_v42, 0  ;;  %v290_v55 = vld [vmem:[%s2984_s9 + $0x138] sm:$0xff]  ;;  %v512_v56 = vpack.c.bf16 %v258_v53, %v257_v52  ;;  %v307_v60 = vld [vmem:[%s2984_s9 + $0x1c0] sm:$0xff]  ;;  %v308_v61 = vld [vmem:[%s2984_s9 + $0x1c8] sm:$0xff]  ;;  %v521_v63 = vpack.c.bf16 %v276_v59, %v275_v58 }
  0x24   : > { %v528_v57 = vpack.c.bf16 %v290_v55, %v289_v54  ;;  %v537_v1 = vpack.c.bf16 %v308_v61, %v307_v60  ;;  %v259_v3 = vld [vmem:[%s2984_s9 + $0x40] sm:$0xff]  ;;  %v260_v4 = vld [vmem:[%s2984_s9 + $0x48] sm:$0xff]  ;;  %v277_v9 = vld [vmem:[%s2984_s9 + $0xd0] sm:$0xff] }
  0x25   : > { %v674_v62 = vsel %vm657_vm0, %v512_v56, 0  ;;  %v291_v5 = vld [vmem:[%s2984_s9 + $0x140] sm:$0xff]  ;;  %v292_v6 = vld [vmem:[%s2984_s9 + $0x148] sm:$0xff]  ;;  %v513_v7 = vpack.c.bf16 %v260_v4, %v259_v3  ;;  %v278_v10 = vld [vmem:[%s2984_s9 + $0xd8] sm:$0xff] }
  0x26   : > { %2463 = vmatpush3.bf16.xpose.msra.mxu0 %v668_v33  ;;  %v722_v0 = vsel %vm657_vm0, %v528_v57, 0  ;;  %v529_v8 = vpack.c.bf16 %v292_v6, %v291_v5  ;;  %v309_v11 = vld [vmem:[%s2984_s9 + $0x1d0] sm:$0xff]  ;;  %v310_v12 = vld [vmem:[%s2984_s9 + $0x1d8] sm:$0xff]  ;;  %v522_v14 = vpack.c.bf16 %v278_v10, %v277_v9  ;;  %v279_v23 = vld [vmem:[%s2984_s9 + $0xe0] sm:$0xff] }
  0x27   : > { %2483 = vmatpush3.bf16.xpose.msra.mxu1 %v716_v35  ;;  %2676 = vmatprep.subr.msk.bf16.mxu0 %vm657_vm0, %v519_v34  ;;  %v677_v13 = vsel %vm657_vm0, %v513_v7, 0  ;;  %v538_v16 = vpack.c.bf16 %v310_v12, %v309_v11  ;;  %v261_v17 = vld [vmem:[%s2984_s9 + $0x50] sm:$0xff]  ;;  %v262_v18 = vld [vmem:[%s2984_s9 + $0x58] sm:$0xff]  ;;  %v280_v24 = vld [vmem:[%s2984_s9 + $0xe8] sm:$0xff] }
  0x28   : > { %2684 = vmatprep.subr.msk.bf16.mxu1 %vm657_vm0, %v535_v36  ;;  %v725_v15 = vsel %vm657_vm0, %v529_v8, 0  ;;  %v293_v19 = vld [vmem:[%s2984_s9 + $0x150] sm:$0xff]  ;;  %v294_v20 = vld [vmem:[%s2984_s9 + $0x158] sm:$0xff]  ;;  %v514_v21 = vpack.c.bf16 %v262_v18, %v261_v17  ;;  %v311_v25 = vld [vmem:[%s2984_s9 + $0x1e0] sm:$0xff]  ;;  %v523_v28 = vpack.c.bf16 %v280_v24, %v279_v23 }
  0x29   : > { %v530_v22 = vpack.c.bf16 %v294_v20, %v293_v19  ;;  %v312_v26 = vld [vmem:[%s2984_s9 + $0x1e8] sm:$0xff]  ;;  %v263_v31 = vld [vmem:[%s2984_s9 + $0x60] sm:$0xff]  ;;  %v281_v37 = vld [vmem:[%s2984_s9 + $0xf0] sm:$0xff] }
  0x2a   : > { %v680_v27 = vsel %vm657_vm0, %v514_v21, 0  ;;  %v539_v30 = vpack.c.bf16 %v312_v26, %v311_v25  ;;  %v264_v32 = vld [vmem:[%s2984_s9 + $0x68] sm:$0xff]  ;;  %v295_v33 = vld [vmem:[%s2984_s9 + $0x160] sm:$0xff]  ;;  %v282_v38 = vld [vmem:[%s2984_s9 + $0xf8] sm:$0xff] }
  0x2b   : > { %v728_v29 = vsel %vm657_vm0, %v530_v22, 0  ;;  %v296_v34 = vld [vmem:[%s2984_s9 + $0x168] sm:$0xff]  ;;  %v515_v35 = vpack.c.bf16 %v264_v32, %v263_v31  ;;  %v313_v39 = vld [vmem:[%s2984_s9 + $0x1f0] sm:$0xff]  ;;  %v314_v40 = vld [vmem:[%s2984_s9 + $0x1f8] sm:$0xff]  ;;  %v524_v42 = vpack.c.bf16 %v282_v38, %v281_v37 }
  0x2c   : > { %v531_v36 = vpack.c.bf16 %v296_v34, %v295_v33  ;;  %v230_v43 = vld [vmem:[%s4061_s2 + $0x70] sm:$0xff]  ;;  %v540_v45 = vpack.c.bf16 %v314_v40, %v313_v39  ;;  %v266_v47 = vld [vmem:[%s2984_s9 + $0x78] sm:$0xff]  ;;  %v331_v53 = vld [vmem:[%s2984_s9 + $0x280] sm:$0xff] }
  0x2d   : > { %v683_v41 = vsel %vm657_vm0, %v515_v35, 0  ;;  %v265_v46 = vld [vmem:[%s2984_s9 + $0x70] sm:$0xff]  ;;  %639 = vperm.xlu0 %2795, %v230_v43   ;;  %v332_v54 = vld [vmem:[%s2984_s9 + $0x288] sm:$0xff]  ;;  %v363_v55 = vld [vmem:[%s2984_s9 + $0x380] sm:$0xff] }
  0x2e   : > { %2465 = vmatpush3.bf16.xpose.msra.mxu0 %v671_v48  ;;  %v731_v44 = vsel %vm657_vm0, %v531_v36, 0  ;;  %v297_v48 = vld [vmem:[%s2984_s9 + $0x170] sm:$0xff]  ;;  %v364_v56 = vld [vmem:[%s2984_s9 + $0x388] sm:$0xff]  ;;  %v549_v58 = vpack.c.bf16 %v332_v54, %v331_v53  ;;  %v315_v61 = vld [vmem:[%s2984_s9 + $0x200] sm:$0xff] }
  0x2f   : > { %2485 = vmatpush3.bf16.xpose.msra.mxu1 %v719_v50  ;;  %2677 = vmatprep.subr.msk.bf16.mxu0 %vm657_vm0, %v520_v49  ;;  %v298_v49 = vld [vmem:[%s2984_s9 + $0x178] sm:$0xff]  ;;  %v565_v60 = vpack.c.bf16 %v364_v56, %v363_v55  ;;  %v333_v4 = vld [vmem:[%s2984_s9 + $0x290] sm:$0xff]  ;;  %v335_v21 = vld [vmem:[%s2984_s9 + $0x2a0] sm:$0xff] }
  0x30   : > { %2685 = vmatprep.subr.msk.bf16.mxu1 %vm657_vm0, %v536_v51  ;;  %v231_v50 = vld [vmem:[%s4061_s2 + $0x78] sm:$0xff]  ;;  %v516_v51 = vpack.c.bf16 %v266_v47, %v265_v46  ;;  %v532_v52 = vpack.c.bf16 %v298_v49, %v297_v48  ;;  %v228_v6 = vld [vmem:[%s4061_s2 + $0x10] sm:$0xff]  ;;  %v336_v22 = vld [vmem:[%s2984_s9 + $0x2a8] sm:$0xff] }
  0x31   : > { %644 = vperm.xlu0 %2795, %v231_v50   ;;  %v334_v5 = vld [vmem:[%s2984_s9 + $0x298] sm:$0xff]  ;;  %v365_v7 = vld [vmem:[%s2984_s9 + $0x390] sm:$0xff]  ;;  %v367_v23 = vld [vmem:[%s2984_s9 + $0x3a0] sm:$0xff]  ;;  %v551_v26 = vpack.c.bf16 %v336_v22, %v335_v21 }
  0x32   : > { %v686_v57 = vsel %vm657_vm0, %v516_v51, 0  ;;  %v734_v59 = vsel %vm657_vm0, %v532_v52, 0  ;;  %v366_v8 = vld [vmem:[%s2984_s9 + $0x398] sm:$0xff]  ;;  %v550_v11 = vpack.c.bf16 %v334_v5, %v333_v4  ;;  %v349_v17 = vld [vmem:[%s2984_s9 + $0x310] sm:$0xff]  ;;  %v368_v24 = vld [vmem:[%s2984_s9 + $0x3a8] sm:$0xff] }
  0x33   : > { %v229_v9 = vld [vmem:[%s4061_s2 + $0x18] sm:$0xff]  ;;  %v351_v31 = vld [vmem:[%s2984_s9 + $0x320] sm:$0xff]  ;;  %v352_v32 = vld [vmem:[%s2984_s9 + $0x328] sm:$0xff] }
  0x34   : > { %v350_v18 = vld [vmem:[%s2984_s9 + $0x318] sm:$0xff]  ;;  %v232_v33 = vld [vmem:[%s4061_s2 + $0x80] sm:$0xff]  ;;  %v559_v35 = vpack.c.bf16 %v352_v32, %v351_v31  ;;  %v337_v36 = vld [vmem:[%s2984_s9 + $0x2b0] sm:$0xff] }
  0x35   : > { %v558_v20 = vpack.c.bf16 %v350_v18, %v349_v17  ;;  %v338_v37 = vld [vmem:[%s2984_s9 + $0x2b8] sm:$0xff]  ;;  %v369_v38 = vld [vmem:[%s2984_s9 + $0x3b0] sm:$0xff]  ;;  %649 = vperm.xlu1 %2796, %v232_v33   ;;  %v233_v40 = vld [vmem:[%s4061_s2 + $0x88] sm:$0xff] }
  0x36   : > { %2467 = vmatpush3.bf16.xpose.msra.mxu0 %v674_v62  ;;  %v316_v62 = vld [vmem:[%s2984_s9 + $0x208] sm:$0xff]  ;;  %v370_v39 = vld [vmem:[%s2984_s9 + $0x3b8] sm:$0xff]  ;;  %v815_v43 = vsel %vm657_vm0, %v559_v35, 0  ;;  %v353_v47 = vld [vmem:[%s2984_s9 + $0x330] sm:$0xff] }
  0x37   : > { %2487 = vmatpush3.bf16.xpose.msra.mxu1 %v722_v0  ;;  %2678 = vmatprep.subr.msk.bf16.mxu0 %vm657_vm0, %v521_v63  ;;  %v347_v63 = vld [vmem:[%s2984_s9 + $0x300] sm:$0xff]  ;;  %v348_v0 = vld [vmem:[%s2984_s9 + $0x308] sm:$0xff]  ;;  %v322_v46 = vld [vmem:[%s2984_s9 + $0x238] sm:$0xff] }
  0x38   : > { %2686 = vmatprep.subr.msk.bf16.mxu1 %vm657_vm0, %v537_v1  ;;  %v541_v1 = vpack.c.bf16 %v316_v62, %v315_v61  ;;  %v557_v3 = vpack.c.bf16 %v348_v0, %v347_v63  ;;  %v354_v48 = vld [vmem:[%s2984_s9 + $0x338] sm:$0xff]  ;;  %v339_v51 = vld [vmem:[%s2984_s9 + $0x2c0] sm:$0xff]  ;;  %v340_v52 = vld [vmem:[%s2984_s9 + $0x2c8] sm:$0xff] }
  0x39   : > { %654 = vperm.xlu1 %2796, %v233_v40   ;;  %v560_v50 = vpack.c.bf16 %v354_v48, %v353_v47  ;;  %v371_v53 = vld [vmem:[%s2984_s9 + $0x3c0] sm:$0xff]  ;;  %v372_v54 = vld [vmem:[%s2984_s9 + $0x3c8] sm:$0xff]  ;;  %v553_v56 = vpack.c.bf16 %v340_v52, %v339_v51  ;;  %v373_v4 = vld [vmem:[%s2984_s9 + $0x3d0] sm:$0xff] }
  0x3a   : > { %v761_v10 = vsel %vm657_vm0, %v541_v1, 0  ;;  %v809_v12 = vsel %vm657_vm0, %v557_v3, 0  ;;  %v355_v61 = vld [vmem:[%s2984_s9 + $0x340] sm:$0xff]  ;;  %v356_v62 = vld [vmem:[%s2984_s9 + $0x348] sm:$0xff]  ;;  %v341_v1 = vld [vmem:[%s2984_s9 + $0x2d0] sm:$0xff] }
  0x3b   : > { %v561_v0 = vpack.c.bf16 %v356_v62, %v355_v61  ;;  %v342_v3 = vld [vmem:[%s2984_s9 + $0x2d8] sm:$0xff]  ;;  %v343_v17 = vld [vmem:[%s2984_s9 + $0x2e0] sm:$0xff]  ;;  %v344_v18 = vld [vmem:[%s2984_s9 + $0x2e8] sm:$0xff] }
  0x3c   : > { %v374_v5 = vld [vmem:[%s2984_s9 + $0x3d8] sm:$0xff]  ;;  %v555_v22 = vpack.c.bf16 %v344_v18, %v343_v17  ;;  %v345_v31 = vld [vmem:[%s2984_s9 + $0x2f0] sm:$0xff]  ;;  %v427_v47 = vld [vmem:[%s3213_s10 + $0x180] sm:$0xff] }
  0x3d   : > { %v346_v32 = vld [vmem:[%s2984_s9 + $0x2f8] sm:$0xff]  ;;  %v377_v33 = vld [vmem:[%s2984_s9 + $0x3f0] sm:$0xff]  ;;  %v428_v48 = vld [vmem:[%s3213_s10 + $0x188] sm:$0xff] }
  0x3e   : > { %2469 = vmatpush3.bf16.xpose.msra.mxu0 %v677_v13  ;;  %v566_v13 = vpack.c.bf16 %v366_v8, %v365_v7  ;;  %v554_v7 = vpack.c.bf16 %v342_v3, %v341_v1  ;;  %v821_v8 = vsel %vm657_vm0, %v561_v0, 0  ;;  %v330_v40 = vld [vmem:[%s2984_s9 + $0x278] sm:$0xff]  ;;  %v597_v52 = vpack.c.bf16 %v428_v48, %v427_v47  ;;  %v429_v61 = vld [vmem:[%s3213_s10 + $0x190] sm:$0xff]  ;;  %v387_v47 = vld [vmem:[%s3213_s10 + $0x40] sm:$0xff] }
  0x3f   : > { %2489 = vmatpush3.bf16.xpose.msra.mxu1 %v725_v15  ;;  %2679 = vmatprep.subr.msk.bf16.mxu0 %vm657_vm0, %v522_v14  ;;  %v317_v14 = vld [vmem:[%s2984_s9 + $0x210] sm:$0xff]  ;;  %v318_v15 = vld [vmem:[%s2984_s9 + $0x218] sm:$0xff]  ;;  %v388_v48 = vld [vmem:[%s3213_s10 + $0x48] sm:$0xff] }
  0x40   : > { %2687 = vmatprep.subr.msk.bf16.mxu1 %vm657_vm0, %v538_v16  ;;  %v3112_v16 = vpack.c.bf16 %v229_v9, %v228_v6  ;;  %v542_v19 = vpack.c.bf16 %v318_v15, %v317_v14  ;;  %v570_v9 = vpack.c.bf16 %v374_v5, %v373_v4  ;;  %v430_v62 = vld [vmem:[%s3213_s10 + $0x198] sm:$0xff]  ;;  %v381_v4 = vld [vmem:[%s3213_s10 + $0x10] sm:$0xff] }
  0x41   : > { %v598_v3 = vpack.c.bf16 %v430_v62, %v429_v61  ;;  %v382_v5 = vld [vmem:[%s3213_s10 + $0x18] sm:$0xff]  ;;  %v389_v61 = vld [vmem:[%s3213_s10 + $0x50] sm:$0xff] }
  0x42   : > { %v764_v25 = vsel %vm657_vm0, %v542_v19, 0  ;;  %v375_v19 = vld [vmem:[%s2984_s9 + $0x3e0] sm:$0xff]  ;;  %v390_v62 = vld [vmem:[%s3213_s10 + $0x58] sm:$0xff] }
  0x46   : > { %2471 = vmatpush3.bf16.xpose.msra.mxu0 %v680_v27  ;;  %v812_v27 = vsel %vm657_vm0, %v558_v20, 0  ;;  %v376_v20 = vld [vmem:[%s2984_s9 + $0x3e8] sm:$0xff] }
  0x47   : > { %2491 = vmatpush3.bf16.xpose.msra.mxu1 %v728_v29  ;;  %2680 = vmatprep.subr.msk.bf16.mxu0 %vm657_vm0, %v523_v28  ;;  %v567_v28 = vpack.c.bf16 %v368_v24, %v367_v23  ;;  %v319_v29 = vld [vmem:[%s2984_s9 + $0x220] sm:$0xff]  ;;  %v571_v24 = vpack.c.bf16 %v376_v20, %v375_v19  ;;  %v384_v20 = vld [vmem:[%s3213_s10 + $0x28] sm:$0xff] }
  0x48   : > { %2688 = vmatprep.subr.msk.bf16.mxu1 %vm657_vm0, %v539_v30  ;;  %v320_v30 = vld [vmem:[%s2984_s9 + $0x228] sm:$0xff]  ;;  %v383_v19 = vld [vmem:[%s3213_s10 + $0x20] sm:$0xff] }
  0x49   : > { %v543_v34 = vpack.c.bf16 %v320_v30, %v319_v29 }
  0x4e   : > { %2473 = vmatpush3.bf16.xpose.msra.mxu0 %v683_v41  ;;  %v767_v41 = vsel %vm657_vm0, %v543_v34, 0  ;;  %v378_v34 = vld [vmem:[%s2984_s9 + $0x3f8] sm:$0xff] }
  0x4f   : > { %2493 = vmatpush3.bf16.xpose.msra.mxu1 %v731_v44  ;;  %2681 = vmatprep.subr.msk.bf16.mxu0 %vm657_vm0, %v524_v42  ;;  %v552_v42 = vpack.c.bf16 %v338_v37, %v337_v36  ;;  %v568_v44 = vpack.c.bf16 %v370_v39, %v369_v38  ;;  %v556_v36 = vpack.c.bf16 %v346_v32, %v345_v31  ;;  %v329_v39 = vld [vmem:[%s2984_s9 + $0x270] sm:$0xff] }
  0x50   : > { %2689 = vmatprep.subr.msk.bf16.mxu1 %vm657_vm0, %v540_v45  ;;  %v321_v45 = vld [vmem:[%s2984_s9 + $0x230] sm:$0xff]  ;;  %v572_v38 = vpack.c.bf16 %v378_v34, %v377_v33  ;;  %v386_v34 = vld [vmem:[%s3213_s10 + $0x38] sm:$0xff] }
  0x51   : > { %v544_v49 = vpack.c.bf16 %v322_v46, %v321_v45  ;;  %v395_v45 = vld [vmem:[%s3213_s10 + $0x80] sm:$0xff]  ;;  %v396_v46 = vld [vmem:[%s3213_s10 + $0x88] sm:$0xff]  ;;  %v385_v33 = vld [vmem:[%s3213_s10 + $0x30] sm:$0xff] }
  0x53   : > { %v770_v55 = vsel %vm657_vm0, %v544_v49, 0 }
  0x56   : > { %2475 = vmatpush3.bf16.xpose.msra.mxu0 %v686_v57  ;;  %v818_v57 = vsel %vm657_vm0, %v560_v50, 0  ;;  %v581_v50 = vpack.c.bf16 %v396_v46, %v395_v45 }
  0x57   : > { %2495 = vmatpush3.bf16.xpose.msra.mxu1 %v734_v59  ;;  %2690 = vmatprep.subr.msk.bf16.mxu0 %vm657_vm0, %v549_v58  ;;  %v569_v58 = vpack.c.bf16 %v372_v54, %v371_v53  ;;  %v323_v59 = vld [vmem:[%s2984_s9 + $0x240] sm:$0xff]  ;;  %v380_v54 = vld [vmem:[%s3213_s10 + $0x8] sm:$0xff] }
  0x58   : > { %2698 = vmatprep.subr.msk.bf16.mxu1 %vm657_vm0, %v565_v60  ;;  %v324_v60 = vld [vmem:[%s2984_s9 + $0x248] sm:$0xff]  ;;  %v379_v53 = vld [vmem:[%s3213_s10] sm:$0xff] }
  0x59   : > { %v545_v63 = vpack.c.bf16 %v324_v60, %v323_v59  ;;  %v397_v59 = vld [vmem:[%s3213_s10 + $0x90] sm:$0xff]  ;;  %v398_v60 = vld [vmem:[%s3213_s10 + $0x98] sm:$0xff] }
  0x5a   : > { %v582_v0 = vpack.c.bf16 %v398_v60, %v397_v59 }
  0x5b   : > { %v773_v6 = vsel %vm657_vm0, %v545_v63, 0 }
  0x5d   : > { %2477 = vmatmul.mubr.msk.bf16.vlgmr.msra.gmra.mrb[0].mxu0 %vm657_vm0, %v2970_v2 }
  0x5e   : > { %2497 = vmatmul.mubr.msk.bf16.vlgmr.msra.gmra.mrb[0].mxu1 %vm657_vm0, %v2970_v2  ;;  %2501 = vmatpush3.bf16.xpose.msra.mxu0 %v761_v10  ;;  %v325_v10 = vld [vmem:[%s2984_s9 + $0x250] sm:$0xff] }
  0x5f   : > { %2521 = vmatpush3.bf16.xpose.msra.mxu1 %v809_v12  ;;  %2691 = vmatprep.subr.msk.bf16.mxu0 %vm657_vm0, %v550_v11  ;;  %v326_v11 = vld [vmem:[%s2984_s9 + $0x258] sm:$0xff]  ;;  %v357_v12 = vld [vmem:[%s2984_s9 + $0x350] sm:$0xff] }
  0x60   : > { %2699 = vmatprep.subr.msk.bf16.mxu1 %vm657_vm0, %v566_v13  ;;  %2478 = vmatprep.mubr.msk.bf16.mxu0 %vm657_vm0, %v3112_v16  ;;  %v358_v13 = vld [vmem:[%s2984_s9 + $0x358] sm:$0xff]  ;;  %v546_v14 = vpack.c.bf16 %v326_v11, %v325_v10  ;;  %v399_v10 = vld [vmem:[%s3213_s10 + $0xa0] sm:$0xff]  ;;  %v400_v11 = vld [vmem:[%s3213_s10 + $0xa8] sm:$0xff] }
  0x61   : > { %2498 = vmatprep.mubr.msk.bf16.mxu1 %vm657_vm0, %v3112_v16  ;;  %v562_v15 = vpack.c.bf16 %v358_v13, %v357_v12  ;;  %v431_v12 = vld [vmem:[%s3213_s10 + $0x1a0] sm:$0xff]  ;;  %v432_v13 = vld [vmem:[%s3213_s10 + $0x1a8] sm:$0xff] }
  0x62   : > { %v776_v21 = vsel %vm657_vm0, %v546_v14, 0  ;;  %v599_v18 = vpack.c.bf16 %v432_v13, %v431_v12  ;;  %v391_v12 = vld [vmem:[%s3213_s10 + $0x60] sm:$0xff]  ;;  %v392_v13 = vld [vmem:[%s3213_s10 + $0x68] sm:$0xff] }
  0x63   : > { %v824_v23 = vsel %vm657_vm0, %v562_v15, 0  ;;  %v583_v15 = vpack.c.bf16 %v400_v11, %v399_v10 }
  0x65   : > { %2479 = vmatmul.mubr.msk.bf16.gmra.mrb[4].mxu0 %vm657_vm0, %v3112_v16 }
  0x66   : > { %2503 = vmatpush3.bf16.xpose.msra.mxu0 %v764_v25  ;;  %2499 = vmatmul.mubr.msk.bf16.gmra.mrb[4].mxu1 %vm657_vm0, %v3112_v16  ;;  %v327_v25 = vld [vmem:[%s2984_s9 + $0x260] sm:$0xff] }
  0x67   : > { %2523 = vmatpush3.bf16.xpose.msra.mxu1 %v812_v27  ;;  %2692 = vmatprep.subr.msk.bf16.mxu0 %vm657_vm0, %v551_v26  ;;  %v328_v26 = vld [vmem:[%s2984_s9 + $0x268] sm:$0xff]  ;;  %v359_v27 = vld [vmem:[%s2984_s9 + $0x360] sm:$0xff] }
  0x68   : > { %2700 = vmatprep.subr.msk.bf16.mxu1 %vm657_vm0, %v567_v28  ;;  %2516 = vmatprep.mubr.msk.bf16.mxu0 %vm657_vm0, %v2970_v2  ;;  %v360_v28 = vld [vmem:[%s2984_s9 + $0x368] sm:$0xff]  ;;  %v547_v29 = vpack.c.bf16 %v328_v26, %v327_v25  ;;  %v401_v25 = vld [vmem:[%s3213_s10 + $0xb0] sm:$0xff]  ;;  %v402_v26 = vld [vmem:[%s3213_s10 + $0xb8] sm:$0xff] }
  0x69   : > { %2536 = vmatprep.mubr.msk.bf16.mxu1 %vm657_vm0, %v2970_v2  ;;  %v563_v30 = vpack.c.bf16 %v360_v28, %v359_v27  ;;  %v433_v27 = vld [vmem:[%s3213_s10 + $0x1b0] sm:$0xff]  ;;  %v434_v28 = vld [vmem:[%s3213_s10 + $0x1b8] sm:$0xff] }
  0x6a   : > { %v779_v35 = vsel %vm657_vm0, %v547_v29, 0  ;;  %v600_v32 = vpack.c.bf16 %v434_v28, %v433_v27  ;;  %v393_v27 = vld [vmem:[%s3213_s10 + $0x70] sm:$0xff]  ;;  %v394_v28 = vld [vmem:[%s3213_s10 + $0x78] sm:$0xff] }
  0x6b   : > { %v827_v37 = vsel %vm657_vm0, %v563_v30, 0  ;;  %v584_v30 = vpack.c.bf16 %v402_v26, %v401_v25 }
  0x6e   : > { %2505 = vmatpush3.bf16.xpose.msra.mxu0 %v767_v41  ;;  %v361_v41 = vld [vmem:[%s2984_s9 + $0x370] sm:$0xff] }
  0x6f   : > { %2525 = vmatpush3.bf16.xpose.msra.mxu1 %v815_v43  ;;  %2693 = vmatprep.subr.msk.bf16.mxu0 %vm657_vm0, %v552_v42  ;;  %v362_v42 = vld [vmem:[%s2984_s9 + $0x378] sm:$0xff]  ;;  %v548_v43 = vpack.c.bf16 %v330_v40, %v329_v39  ;;  %v403_v39 = vld [vmem:[%s3213_s10 + $0xc0] sm:$0xff]  ;;  %v404_v40 = vld [vmem:[%s3213_s10 + $0xc8] sm:$0xff]  ;;  %s2875_s9 = smov 2  }
  0x70   : > { %2701 = vmatprep.subr.msk.bf16.mxu1 %vm657_vm0, %v568_v44  ;;  %v564_v44 = vpack.c.bf16 %v362_v42, %v361_v41  ;;  %v435_v41 = vld [vmem:[%s3213_s10 + $0x1c0] sm:$0xff]  ;;  %v436_v42 = vld [vmem:[%s3213_s10 + $0x1c8] sm:$0xff] }
  0x71   : > { %v782_v49 = vsel %vm657_vm0, %v548_v43, 0  ;;  %v601_v46 = vpack.c.bf16 %v436_v42, %v435_v41  ;;  %v443_v41 = vld [vmem:[%s3213_s10 + $0x200] sm:$0xff]  ;;  %v444_v42 = vld [vmem:[%s3213_s10 + $0x208] sm:$0xff] }
  0x72   : > { %v830_v51 = vsel %vm657_vm0, %v564_v44, 0  ;;  %v585_v44 = vpack.c.bf16 %v404_v40, %v403_v39 }
  0x76   : > { %2507 = vmatpush3.bf16.xpose.msra.mxu0 %v770_v55  ;;  %v411_v55 = vld [vmem:[%s3213_s10 + $0x100] sm:$0xff] }
  0x77   : > { %2527 = vmatpush3.bf16.xpose.msra.mxu1 %v818_v57  ;;  %2694 = vmatprep.subr.msk.bf16.mxu0 %vm657_vm0, %v553_v56  ;;  %v412_v56 = vld [vmem:[%s3213_s10 + $0x108] sm:$0xff]  ;;  %v573_v57 = vpack.c.bf16 %v380_v54, %v379_v53  ;;  %v405_v53 = vld [vmem:[%s3213_s10 + $0xd0] sm:$0xff]  ;;  %v406_v54 = vld [vmem:[%s3213_s10 + $0xd8] sm:$0xff] }
  0x78   : > { %2702 = vmatprep.subr.msk.bf16.mxu1 %vm657_vm0, %v569_v58  ;;  %v589_v58 = vpack.c.bf16 %v412_v56, %v411_v55  ;;  %v437_v55 = vld [vmem:[%s3213_s10 + $0x1d0] sm:$0xff]  ;;  %v438_v56 = vld [vmem:[%s3213_s10 + $0x1d8] sm:$0xff] }
  0x79   : > { %v1101_v63 = vsel %vm657_vm0, %v573_v57, 0  ;;  %v602_v60 = vpack.c.bf16 %v438_v56, %v437_v55  ;;  %v446_v55 = vld [vmem:[%s3213_s10 + $0x218] sm:$0xff] }
  0x7a   : > { %v1149_v1 = vsel %vm657_vm0, %v589_v58, 0  ;;  %v586_v58 = vpack.c.bf16 %v406_v54, %v405_v53  ;;  %v445_v54 = vld [vmem:[%s3213_s10 + $0x210] sm:$0xff] }
  0x7e   : > { %2509 = vmatpush3.bf16.xpose.msra.mxu0 %v773_v6  ;;  %v413_v6 = vld [vmem:[%s3213_s10 + $0x110] sm:$0xff] }
  0x7f   : > { %2529 = vmatpush3.bf16.xpose.msra.mxu1 %v821_v8  ;;  %2695 = vmatprep.subr.msk.bf16.mxu0 %vm657_vm0, %v554_v7  ;;  %v414_v7 = vld [vmem:[%s3213_s10 + $0x118] sm:$0xff]  ;;  %v574_v8 = vpack.c.bf16 %v382_v5, %v381_v4  ;;  %v407_v4 = vld [vmem:[%s3213_s10 + $0xe0] sm:$0xff]  ;;  %v408_v5 = vld [vmem:[%s3213_s10 + $0xe8] sm:$0xff] }
  0x80   : > { %2703 = vmatprep.subr.msk.bf16.mxu1 %vm657_vm0, %v570_v9  ;;  %v590_v9 = vpack.c.bf16 %v414_v7, %v413_v6  ;;  %v439_v6 = vld [vmem:[%s3213_s10 + $0x1e0] sm:$0xff]  ;;  %v440_v7 = vld [vmem:[%s3213_s10 + $0x1e8] sm:$0xff] }
  0x81   : > { %v1104_v14 = vsel %vm657_vm0, %v574_v8, 0  ;;  %v603_v11 = vpack.c.bf16 %v440_v7, %v439_v6  ;;  %v447_v6 = vld [vmem:[%s3213_s10 + $0x220] sm:$0xff]  ;;  %v448_v7 = vld [vmem:[%s3213_s10 + $0x228] sm:$0xff] }
  0x82   : > { %v1152_v17 = vsel %vm657_vm0, %v590_v9, 0  ;;  %v587_v9 = vpack.c.bf16 %v408_v5, %v407_v4 }
  0x86   : > { %2511 = vmatpush3.bf16.xpose.msra.mxu0 %v776_v21  ;;  %v415_v21 = vld [vmem:[%s3213_s10 + $0x120] sm:$0xff] }
  0x87   : > { %2531 = vmatpush3.bf16.xpose.msra.mxu1 %v824_v23  ;;  %2696 = vmatprep.subr.msk.bf16.mxu0 %vm657_vm0, %v555_v22  ;;  %v416_v22 = vld [vmem:[%s3213_s10 + $0x128] sm:$0xff]  ;;  %v575_v23 = vpack.c.bf16 %v384_v20, %v383_v19  ;;  %v409_v19 = vld [vmem:[%s3213_s10 + $0xf0] sm:$0xff]  ;;  %v410_v20 = vld [vmem:[%s3213_s10 + $0xf8] sm:$0xff] }
  0x88   : > { %2704 = vmatprep.subr.msk.bf16.mxu1 %vm657_vm0, %v571_v24  ;;  %v591_v24 = vpack.c.bf16 %v416_v22, %v415_v21  ;;  %v441_v21 = vld [vmem:[%s3213_s10 + $0x1f0] sm:$0xff]  ;;  %v442_v22 = vld [vmem:[%s3213_s10 + $0x1f8] sm:$0xff] }
  0x89   : > { %v1107_v29 = vsel %vm657_vm0, %v575_v23, 0  ;;  %v604_v26 = vpack.c.bf16 %v442_v22, %v441_v21  ;;  %v449_v21 = vld [vmem:[%s3213_s10 + $0x230] sm:$0xff]  ;;  %v450_v22 = vld [vmem:[%s3213_s10 + $0x238] sm:$0xff] }
  0x8a   : > { %v1155_v31 = vsel %vm657_vm0, %v591_v24, 0  ;;  %v588_v24 = vpack.c.bf16 %v410_v20, %v409_v19 }
  0x8e   : > { %2513 = vmatpush3.bf16.xpose.msra.mxu0 %v779_v35  ;;  %v417_v35 = vld [vmem:[%s3213_s10 + $0x130] sm:$0xff] }
  0x8f   : > { %2533 = vmatpush3.bf16.xpose.msra.mxu1 %v827_v37  ;;  %2697 = vmatprep.subr.msk.bf16.mxu0 %vm657_vm0, %v556_v36  ;;  %v418_v36 = vld [vmem:[%s3213_s10 + $0x138] sm:$0xff]  ;;  %v576_v37 = vpack.c.bf16 %v386_v34, %v385_v33  ;;  %v459_v33 = vld [vmem:[%s3213_s10 + $0x280] sm:$0xff]  ;;  %v460_v34 = vld [vmem:[%s3213_s10 + $0x288] sm:$0xff] }
  0x90   : > { %2705 = vmatprep.subr.msk.bf16.mxu1 %vm657_vm0, %v572_v38  ;;  %v592_v38 = vpack.c.bf16 %v418_v36, %v417_v35  ;;  %v491_v35 = vld [vmem:[%s3213_s10 + $0x380] sm:$0xff]  ;;  %v492_v36 = vld [vmem:[%s3213_s10 + $0x388] sm:$0xff] }
  0x91   : > { %v1110_v43 = vsel %vm657_vm0, %v576_v37, 0  ;;  %v629_v40 = vpack.c.bf16 %v492_v36, %v491_v35  ;;  %v451_v35 = vld [vmem:[%s3213_s10 + $0x240] sm:$0xff]  ;;  %v452_v36 = vld [vmem:[%s3213_s10 + $0x248] sm:$0xff] }
  0x92   : > { %v1158_v45 = vsel %vm657_vm0, %v592_v38, 0  ;;  %v613_v38 = vpack.c.bf16 %v460_v34, %v459_v33 }
  0x96   : > { %2515 = vmatpush3.bf16.xpose.msra.mxu0 %v782_v49  ;;  %v419_v49 = vld [vmem:[%s3213_s10 + $0x140] sm:$0xff] }
  0x97   : > { %2535 = vmatpush3.bf16.xpose.msra.mxu1 %v830_v51  ;;  %2706 = vmatprep.subr.msk.bf16.mxu0 %vm657_vm0, %v581_v50  ;;  %v420_v50 = vld [vmem:[%s3213_s10 + $0x148] sm:$0xff]  ;;  %v577_v51 = vpack.c.bf16 %v388_v48, %v387_v47  ;;  %v461_v47 = vld [vmem:[%s3213_s10 + $0x290] sm:$0xff]  ;;  %v462_v48 = vld [vmem:[%s3213_s10 + $0x298] sm:$0xff] }
  0x98   : > { %2714 = vmatprep.subr.msk.bf16.mxu1 %vm657_vm0, %v597_v52  ;;  %v593_v52 = vpack.c.bf16 %v420_v50, %v419_v49  ;;  %v493_v49 = vld [vmem:[%s3213_s10 + $0x390] sm:$0xff]  ;;  %v494_v50 = vld [vmem:[%s3213_s10 + $0x398] sm:$0xff]  ;;  %v614_v53 = vpack.c.bf16 %v462_v48, %v461_v47 }
  0x99   : > { %v1113_v57 = vsel %vm657_vm0, %v577_v51, 0  ;;  %v630_v56 = vpack.c.bf16 %v494_v50, %v493_v49  ;;  %v453_v49 = vld [vmem:[%s3213_s10 + $0x250] sm:$0xff]  ;;  %v454_v50 = vld [vmem:[%s3213_s10 + $0x258] sm:$0xff] }
  0x9a   : > { %v1161_v59 = vsel %vm657_vm0, %v593_v52, 0 }
  0x9d   : > { %2517 = vmatmul.mubr.msk.bf16.vlgmr.msra.gmra.mrb[8].mxu0 %vm657_vm0, %v2970_v2 }
  0x9e   : > { %2537 = vmatmul.mubr.msk.bf16.vlgmr.msra.gmra.mrb[8].mxu1 %vm657_vm0, %v2970_v2  ;;  %2541 = vmatpush3.bf16.xpose.msra.mxu0 %v1101_v63  ;;  %v421_v63 = vld [vmem:[%s3213_s10 + $0x150] sm:$0xff] }
  0x9f   : > { %2561 = vmatpush3.bf16.xpose.msra.mxu1 %v1149_v1  ;;  %2707 = vmatprep.subr.msk.bf16.mxu0 %vm657_vm0, %v582_v0  ;;  %v422_v0 = vld [vmem:[%s3213_s10 + $0x158] sm:$0xff]  ;;  %v578_v1 = vpack.c.bf16 %v390_v62, %v389_v61  ;;  %v463_v61 = vld [vmem:[%s3213_s10 + $0x2a0] sm:$0xff]  ;;  %v464_v62 = vld [vmem:[%s3213_s10 + $0x2a8] sm:$0xff] }
  0xa0   : > { %2715 = vmatprep.subr.msk.bf16.mxu1 %vm657_vm0, %v598_v3  ;;  %2518 = vmatprep.mubr.msk.bf16.mxu0 %vm657_vm0, %v3112_v16  ;;  %v594_v3 = vpack.c.bf16 %v422_v0, %v421_v63  ;;  %v495_v63 = vld [vmem:[%s3213_s10 + $0x3a0] sm:$0xff]  ;;  %v496_v0 = vld [vmem:[%s3213_s10 + $0x3a8] sm:$0xff] }
  0xa1   : > { %2538 = vmatprep.mubr.msk.bf16.mxu1 %vm657_vm0, %v3112_v16  ;;  %v1116_v8 = vsel %vm657_vm0, %v578_v1, 0  ;;  %v631_v5 = vpack.c.bf16 %v496_v0, %v495_v63  ;;  %v455_v63 = vld [vmem:[%s3213_s10 + $0x260] sm:$0xff]  ;;  %v456_v0 = vld [vmem:[%s3213_s10 + $0x268] sm:$0xff] }
  0xa2   : > { %v1164_v10 = vsel %vm657_vm0, %v594_v3, 0  ;;  %v615_v3 = vpack.c.bf16 %v464_v62, %v463_v61 }
  0xa5   : > { %2519 = vmatmul.mubr.msk.bf16.gmra.mrb[12].mxu0 %vm657_vm0, %v3112_v16 }
  0xa6   : > { %2543 = vmatpush3.bf16.xpose.msra.mxu0 %v1104_v14  ;;  %2539 = vmatmul.mubr.msk.bf16.gmra.mrb[12].mxu1 %vm657_vm0, %v3112_v16  ;;  %v423_v14 = vld [vmem:[%s3213_s10 + $0x160] sm:$0xff] }
  0xa7   : > { %2563 = vmatpush3.bf16.xpose.msra.mxu1 %v1152_v17  ;;  %2708 = vmatprep.subr.msk.bf16.mxu0 %vm657_vm0, %v583_v15  ;;  %v424_v15 = vld [vmem:[%s3213_s10 + $0x168] sm:$0xff]  ;;  %v579_v17 = vpack.c.bf16 %v392_v13, %v391_v12  ;;  %v465_v12 = vld [vmem:[%s3213_s10 + $0x2b0] sm:$0xff]  ;;  %v466_v13 = vld [vmem:[%s3213_s10 + $0x2b8] sm:$0xff] }
  0xa8   : > { %2716 = vmatprep.subr.msk.bf16.mxu1 %vm657_vm0, %v599_v18  ;;  %2556 = vmatprep.mubr.msk.bf16.mxu0 %vm657_vm0, %v2970_v2  ;;  %v595_v18 = vpack.c.bf16 %v424_v15, %v423_v14  ;;  %v497_v14 = vld [vmem:[%s3213_s10 + $0x3b0] sm:$0xff]  ;;  %v498_v15 = vld [vmem:[%s3213_s10 + $0x3b8] sm:$0xff] }
  0xa9   : > { %2576 = vmatprep.mubr.msk.bf16.mxu1 %vm657_vm0, %v2970_v2  ;;  %v1119_v23 = vsel %vm657_vm0, %v579_v17, 0  ;;  %v632_v20 = vpack.c.bf16 %v498_v15, %v497_v14  ;;  %v457_v14 = vld [vmem:[%s3213_s10 + $0x270] sm:$0xff]  ;;  %v458_v15 = vld [vmem:[%s3213_s10 + $0x278] sm:$0xff] }
  0xaa   : > { %v1167_v25 = vsel %vm657_vm0, %v595_v18, 0  ;;  %v616_v18 = vpack.c.bf16 %v466_v13, %v465_v12 }
  0xae   : > { %2545 = vmatpush3.bf16.xpose.msra.mxu0 %v1107_v29  ;;  %v425_v29 = vld [vmem:[%s3213_s10 + $0x170] sm:$0xff] }
  0xaf   : > { %2565 = vmatpush3.bf16.xpose.msra.mxu1 %v1155_v31  ;;  %2709 = vmatprep.subr.msk.bf16.mxu0 %vm657_vm0, %v584_v30  ;;  %v426_v30 = vld [vmem:[%s3213_s10 + $0x178] sm:$0xff]  ;;  %v580_v31 = vpack.c.bf16 %v394_v28, %v393_v27  ;;  %v467_v27 = vld [vmem:[%s3213_s10 + $0x2c0] sm:$0xff]  ;;  %v468_v28 = vld [vmem:[%s3213_s10 + $0x2c8] sm:$0xff] }
  0xb0   : > { %2717 = vmatprep.subr.msk.bf16.mxu1 %vm657_vm0, %v600_v32  ;;  %v596_v32 = vpack.c.bf16 %v426_v30, %v425_v29  ;;  %v499_v29 = vld [vmem:[%s3213_s10 + $0x3c0] sm:$0xff]  ;;  %v500_v30 = vld [vmem:[%s3213_s10 + $0x3c8] sm:$0xff] }
  0xb1   : > { %v1122_v37 = vsel %vm657_vm0, %v580_v31, 0  ;;  %v633_v34 = vpack.c.bf16 %v500_v30, %v499_v29 }
  0xb2   : > { %v1170_v39 = vsel %vm657_vm0, %v596_v32, 0  ;;  %v617_v32 = vpack.c.bf16 %v468_v28, %v467_v27 }
  0xb6   : > { %2547 = vmatpush3.bf16.xpose.msra.mxu0 %v1110_v43  ;;  %v475_v43 = vld [vmem:[%s3213_s10 + $0x300] sm:$0xff] }
  0xb7   : > { %2567 = vmatpush3.bf16.xpose.msra.mxu1 %v1158_v45  ;;  %2710 = vmatprep.subr.msk.bf16.mxu0 %vm657_vm0, %v585_v44  ;;  %v476_v44 = vld [vmem:[%s3213_s10 + $0x308] sm:$0xff]  ;;  %v605_v45 = vpack.c.bf16 %v444_v42, %v443_v41  ;;  %v469_v41 = vld [vmem:[%s3213_s10 + $0x2d0] sm:$0xff]  ;;  %v470_v42 = vld [vmem:[%s3213_s10 + $0x2d8] sm:$0xff] }
  0xb8   : > { %2718 = vmatprep.subr.msk.bf16.mxu1 %vm657_vm0, %v601_v46  ;;  %v621_v46 = vpack.c.bf16 %v476_v44, %v475_v43  ;;  %v501_v43 = vld [vmem:[%s3213_s10 + $0x3d0] sm:$0xff]  ;;  %v502_v44 = vld [vmem:[%s3213_s10 + $0x3d8] sm:$0xff] }
  0xb9   : > { %v1197_v51 = vsel %vm657_vm0, %v605_v45, 0  ;;  %v634_v48 = vpack.c.bf16 %v502_v44, %v501_v43 }
  0xba   : > { %v1245_v52 = vsel %vm657_vm0, %v621_v46, 0  ;;  %v618_v46 = vpack.c.bf16 %v470_v42, %v469_v41 }
  0xbe   : > { %2549 = vmatpush3.bf16.xpose.msra.mxu0 %v1113_v57  ;;  %v477_v57 = vld [vmem:[%s3213_s10 + $0x310] sm:$0xff] }
  0xbf   : > { %2569 = vmatpush3.bf16.xpose.msra.mxu1 %v1161_v59  ;;  %2711 = vmatprep.subr.msk.bf16.mxu0 %vm657_vm0, %v586_v58  ;;  %v478_v58 = vld [vmem:[%s3213_s10 + $0x318] sm:$0xff]  ;;  %v606_v59 = vpack.c.bf16 %v446_v55, %v445_v54  ;;  %v471_v55 = vld [vmem:[%s3213_s10 + $0x2e0] sm:$0xff] }
  0xc0   : > { %2719 = vmatprep.subr.msk.bf16.mxu1 %vm657_vm0, %v602_v60  ;;  %v622_v60 = vpack.c.bf16 %v478_v58, %v477_v57  ;;  %v503_v57 = vld [vmem:[%s3213_s10 + $0x3e0] sm:$0xff]  ;;  %v504_v58 = vld [vmem:[%s3213_s10 + $0x3e8] sm:$0xff] }
  0xc1   : > { %v1200_v1 = vsel %vm657_vm0, %v606_v59, 0  ;;  %v635_v62 = vpack.c.bf16 %v504_v58, %v503_v57 }
  0xc2   : > { %v1248_v4 = vsel %vm657_vm0, %v622_v60, 0 }
  0xc6   : > { %2551 = vmatpush3.bf16.xpose.msra.mxu0 %v1116_v8  ;;  %v479_v8 = vld [vmem:[%s3213_s10 + $0x320] sm:$0xff] }
  0xc7   : > { %2571 = vmatpush3.bf16.xpose.msra.mxu1 %v1164_v10  ;;  %2712 = vmatprep.subr.msk.bf16.mxu0 %vm657_vm0, %v587_v9  ;;  %v480_v9 = vld [vmem:[%s3213_s10 + $0x328] sm:$0xff]  ;;  %v607_v10 = vpack.c.bf16 %v448_v7, %v447_v6  ;;  %v473_v6 = vld [vmem:[%s3213_s10 + $0x2f0] sm:$0xff]  ;;  %v474_v7 = vld [vmem:[%s3213_s10 + $0x2f8] sm:$0xff] }
  0xc8   : > { %2720 = vmatprep.subr.msk.bf16.mxu1 %vm657_vm0, %v603_v11  ;;  %v623_v11 = vpack.c.bf16 %v480_v9, %v479_v8  ;;  %v505_v8 = vld [vmem:[%s3213_s10 + $0x3f0] sm:$0xff]  ;;  %v506_v9 = vld [vmem:[%s3213_s10 + $0x3f8] sm:$0xff] }
  0xc9   : > { %v1203_v17 = vsel %vm657_vm0, %v607_v10, 0  ;;  %v636_v13 = vpack.c.bf16 %v506_v9, %v505_v8 }
  0xca   : > { %v1251_v19 = vsel %vm657_vm0, %v623_v11, 0  ;;  %v620_v11 = vpack.c.bf16 %v474_v7, %v473_v6 }
  0xce   : > { %2553 = vmatpush3.bf16.xpose.msra.mxu0 %v1119_v23  ;;  %v481_v23 = vld [vmem:[%s3213_s10 + $0x330] sm:$0xff] }
  0xcf   : > { %2573 = vmatpush3.bf16.xpose.msra.mxu1 %v1167_v25  ;;  %2713 = vmatprep.subr.msk.bf16.mxu0 %vm657_vm0, %v588_v24  ;;  %v482_v24 = vld [vmem:[%s3213_s10 + $0x338] sm:$0xff]  ;;  %v608_v25 = vpack.c.bf16 %v450_v22, %v449_v21 }
  0xd0   : > { %2721 = vmatprep.subr.msk.bf16.mxu1 %vm657_vm0, %v604_v26  ;;  %v624_v26 = vpack.c.bf16 %v482_v24, %v481_v23 }
  0xd1   : > { %v1206_v31 = vsel %vm657_vm0, %v608_v25, 0 }
  0xd2   : > { %v1254_v33 = vsel %vm657_vm0, %v624_v26, 0 }
  0xd6   : > { %2555 = vmatpush3.bf16.xpose.msra.mxu0 %v1122_v37  ;;  %v483_v37 = vld [vmem:[%s3213_s10 + $0x340] sm:$0xff] }
  0xd7   : > { %2575 = vmatpush3.bf16.xpose.msra.mxu1 %v1170_v39  ;;  %2722 = vmatprep.subr.msk.bf16.mxu0 %vm657_vm0, %v613_v38  ;;  %v484_v38 = vld [vmem:[%s3213_s10 + $0x348] sm:$0xff]  ;;  %v609_v39 = vpack.c.bf16 %v452_v36, %v451_v35 }
  0xd8   : > { %2730 = vmatprep.subr.msk.bf16.mxu1 %vm657_vm0, %v629_v40  ;;  %v625_v40 = vpack.c.bf16 %v484_v38, %v483_v37 }
  0xd9   : > { %v1209_v45 = vsel %vm657_vm0, %v609_v39, 0 }
  0xda   : > { %v1257_v47 = vsel %vm657_vm0, %v625_v40, 0 }
  0xdd   : > { %2557 = vmatmul.mubr.msk.bf16.vlgmr.msra.gmra.mrb[16].mxu0 %vm657_vm0, %v2970_v2 }
  0xde   : > { %2577 = vmatmul.mubr.msk.bf16.vlgmr.msra.gmra.mrb[16].mxu1 %vm657_vm0, %v2970_v2  ;;  %2581 = vmatpush3.bf16.xpose.msra.mxu0 %v1197_v51  ;;  %v485_v51 = vld [vmem:[%s3213_s10 + $0x350] sm:$0xff] }
  0xdf   : > { %2601 = vmatpush3.bf16.xpose.msra.mxu1 %v1245_v52  ;;  %2558 = vmatprep.mubr.msk.bf16.mxu0 %vm657_vm0, %v3112_v16  ;;  %v486_v52 = vld [vmem:[%s3213_s10 + $0x358] sm:$0xff] }
  0xe0   : > { %2578 = vmatprep.mubr.msk.bf16.mxu1 %vm657_vm0, %v3112_v16  ;;  %2723 = vmatprep.subr.msk.bf16.mxu0 %vm657_vm0, %v614_v53  ;;  %v610_v53 = vpack.c.bf16 %v454_v50, %v453_v49  ;;  %v626_v54 = vpack.c.bf16 %v486_v52, %v485_v51 }
  0xe1   : > { %2731 = vmatprep.subr.msk.bf16.mxu1 %vm657_vm0, %v630_v56  ;;  %v472_v56 = vld [vmem:[%s3213_s10 + $0x2e8] sm:$0xff] }
  0xe2   : > { %v1212_v59 = vsel %vm657_vm0, %v610_v53, 0  ;;  %v619_v60 = vpack.c.bf16 %v472_v56, %v471_v55  ;;  %v1260_v61 = vsel %vm657_vm0, %v626_v54, 0  ;;  %v3489_v53 = vpop.permute.xlu0 %639  ;;  %v3491_v54 = vpop.permute.xlu1 %649 }
  0xe5   : > { %2559 = vmatmul.mubr.msk.bf16.gmra.mrb[20].mxu0 %vm657_vm0, %v3112_v16 }
  0xe6   : > { %2579 = vmatmul.mubr.msk.bf16.gmra.mrb[20].mxu1 %vm657_vm0, %v3112_v16  ;;  %2583 = vmatpush3.bf16.xpose.msra.mxu0 %v1200_v1  ;;  %v487_v1 = vld [vmem:[%s3213_s10 + $0x360] sm:$0xff]  ;;  %v3493_v55 = vpop.permute.xlu0 %644 }
  0xe7   : > { %2603 = vmatpush3.bf16.xpose.msra.mxu1 %v1248_v4  ;;  %2724 = vmatprep.subr.msk.bf16.mxu0 %vm657_vm0, %v615_v3  ;;  %v488_v3 = vld [vmem:[%s3213_s10 + $0x368] sm:$0xff]  ;;  %v611_v4 = vpack.c.bf16 %v456_v0, %v455_v63 }
  0xe8   : > { %2732 = vmatprep.subr.msk.bf16.mxu1 %vm657_vm0, %v631_v5  ;;  %2596 = vmatprep.mubr.msk.bf16.mxu0 %vm657_vm0, %v2970_v2  ;;  %v627_v5 = vpack.c.bf16 %v488_v3, %v487_v1 }
  0xe9   : > { %2616 = vmatprep.mubr.msk.bf16.mxu1 %vm657_vm0, %v2970_v2  ;;  %v1215_v10 = vsel %vm657_vm0, %v611_v4, 0 }
  0xea   : > { %v1263_v12 = vsel %vm657_vm0, %v627_v5, 0 }
  0xee   : > { %2585 = vmatpush3.bf16.xpose.msra.mxu0 %v1203_v17  ;;  %v489_v17 = vld [vmem:[%s3213_s10 + $0x370] sm:$0xff] }
  0xef   : > { %2605 = vmatpush3.bf16.xpose.msra.mxu1 %v1251_v19  ;;  %2725 = vmatprep.subr.msk.bf16.mxu0 %vm657_vm0, %v616_v18  ;;  %v490_v18 = vld [vmem:[%s3213_s10 + $0x378] sm:$0xff]  ;;  %v612_v19 = vpack.c.bf16 %v458_v15, %v457_v14  ;;  %s2351_s10 = sshll.u32 %s210_s8, 4  ;;  %s4019_s10 = int_to_ptr.vmem [resolvable:$true] %s2351_s10 }
  0xf0   : > { %2733 = vmatprep.subr.msk.bf16.mxu1 %vm657_vm0, %v632_v20  ;;  %v628_v20 = vpack.c.bf16 %v490_v18, %v489_v17 }
  0xf1   : > { %v1218_v21 = vsel %vm657_vm0, %v612_v19, 0 }
  0xf2   : > { %v1266_v22 = vsel %vm657_vm0, %v628_v20, 0 }
  0xf6   : > { %2587 = vmatpush3.bf16.xpose.msra.mxu0 %v1206_v31 }
  0xf7   : > { %2607 = vmatpush3.bf16.xpose.msra.mxu1 %v1254_v33  ;;  %2726 = vmatprep.subr.msk.bf16.mxu0 %vm657_vm0, %v617_v32 }
  0xf8   : > { %2734 = vmatprep.subr.msk.bf16.mxu1 %vm657_vm0, %v633_v34 }
  0xfe   : > { %2589 = vmatpush3.bf16.xpose.msra.mxu0 %v1209_v45 }
  0xff   : > { %2609 = vmatpush3.bf16.xpose.msra.mxu1 %v1257_v47  ;;  %2727 = vmatprep.subr.msk.bf16.mxu0 %vm657_vm0, %v618_v46 }
 0x100   : > { %2735 = vmatprep.subr.msk.bf16.mxu1 %vm657_vm0, %v634_v48 }
 0x106   : > { %2591 = vmatpush3.bf16.xpose.msra.mxu0 %v1212_v59  ;;  %v3498_v59 = vpop.permute.xlu1 %654 }
 0x107   : > { %2611 = vmatpush3.bf16.xpose.msra.mxu1 %v1260_v61  ;;  %2728 = vmatprep.subr.msk.bf16.mxu0 %vm657_vm0, %v619_v60 }
 0x108   : > { %2736 = vmatprep.subr.msk.bf16.mxu1 %vm657_vm0, %v635_v62 }
 0x10e   : > { %2593 = vmatpush3.bf16.xpose.msra.mxu0 %v1215_v10 }
 0x10f   : > { %2613 = vmatpush3.bf16.xpose.msra.mxu1 %v1263_v12  ;;  %2729 = vmatprep.subr.msk.bf16.mxu0 %vm657_vm0, %v620_v11 }
 0x110   : > { %2737 = vmatprep.subr.msk.bf16.mxu1 %vm657_vm0, %v636_v13 }
 0x116   : > { %2595 = vmatpush3.bf16.xpose.msra.mxu0 %v1218_v21 }
 0x117   : > { %2615 = vmatpush3.bf16.xpose.msra.mxu1 %v1266_v22 }
 0x11d   : > { %2597 = vmatmul.mubr.msk.bf16.vlgmr.msra.gmra.mrb[24].mxu0 %vm657_vm0, %v2970_v2 }
 0x11e   : > { %2617 = vmatmul.mubr.msk.bf16.vlgmr.msra.gmra.mrb[24].mxu1 %vm657_vm0, %v2970_v2  ;;  %2598 = vmatprep.mubr.msk.bf16.mxu0 %vm657_vm0, %v3112_v16 }
 0x11f   : > { %2618 = vmatprep.mubr.msk.bf16.mxu1 %vm657_vm0, %v3112_v16 }
 0x125   : > { %2599 = vmatmul.mubr.msk.bf16.gmra.mrb[28].mxu0 %vm657_vm0, %v3112_v16 }
 0x126   : > { %2619 = vmatmul.mubr.msk.bf16.gmra.mrb[28].mxu1 %vm657_vm0, %v3112_v16 }
 0x130   : > { %v890_v23 = vpop.f32.mrb[0].mxu0 }
 0x131   : > { %v943_v24 = vpop.f32.mrb[0].mxu1  ;;  %v892_v25 = vpop.f32.mrb[1].mxu0  ;;  %v891_v56 = vadd.f32 %v890_v23, %v3489_v53 }
 0x132   : > { %v945_v26 = vpop.f32.mrb[1].mxu1  ;;  %v894_v27 = vpop.f32.mrb[2].mxu0  ;;  %v944_v57 = vadd.f32 %v943_v24, %v3489_v53  ;;  %v893_v58 = vadd.f32 %v892_v25, %v3489_v53 }
 0x133   : > { %v947_v28 = vpop.f32.mrb[2].mxu1  ;;  %v896_v29 = vpop.f32.mrb[3].mxu0  ;;  %v946_v60 = vadd.f32 %v945_v26, %v3489_v53  ;;  %v895_v61 = vadd.f32 %v894_v27, %v3493_v55  ;;  %v1068_v4 = vmax.f32 %v891_v56, 0.0 }
 0x134   : > { %v949_v2 = vpop.f32.mrb[3].mxu1  ;;  %v948_v62 = vadd.f32 %v947_v28, %v3493_v55  ;;  %v897_v63 = vadd.f32 %v896_v29, %v3493_v55  ;;  %v1070_v8 = vmax.f32 %v944_v57, 0.0  ;;  %v1069_v9 = vmax.f32 %v893_v58, 0.0 }
 0x135   : > { %v3505_v0 = vadd.f32 %v949_v2, %v3493_v55  ;;  %v1071_v12 = vmax.f32 %v946_v60, 0.0  ;;  %v1076_v13 = vmax.f32 %v895_v61, 0.0 }
 0x136   : > { %v1078_v14 = vmax.f32 %v948_v62, 0.0  ;;  %v1077_v17 = vmax.f32 %v897_v63, 0.0 }
 0x137   : > { %v1079_v18 = vmax.f32 %v3505_v0, 0.0 }
 0x138   : > { %v900_v30 = vpop.f32.mrb[4].mxu0 }
 0x139   : > { %v902_v31 = vpop.f32.mrb[5].mxu0  ;;  %v953_v32 = vpop.f32.mrb[4].mxu1  ;;  %v3508_v1 = vadd.f32 %v900_v30, %v3491_v54 }
 0x13a   : > { %v904_v33 = vpop.f32.mrb[6].mxu0  ;;  %v955_v34 = vpop.f32.mrb[5].mxu1  ;;  %v3511_v3 = vadd.f32 %v902_v31, %v3491_v54  ;;  %v3514_v5 = vadd.f32 %v953_v32, %v3491_v54 }
 0x13b   : > { %v906_v35 = vpop.f32.mrb[7].mxu0  ;;  %v957_v36 = vpop.f32.mrb[6].mxu1  ;;  %v3517_v6 = vadd.f32 %v955_v34, %v3491_v54  ;;  %v3520_v7 = vadd.f32 %v904_v33, %v3498_v59  ;;  %v1084_v19 = vmax.f32 %v3508_v1, 0.0 }
 0x13c   : > { %v959_v37 = vpop.f32.mrb[7].mxu1  ;;  %v3523_v10 = vadd.f32 %v906_v35, %v3498_v59  ;;  %v3526_v11 = vadd.f32 %v957_v36, %v3498_v59 }
 0x13d   : > { %v3529_v15 = vadd.f32 %v959_v37, %v3498_v59 }
 0x170   : > { %v3457_v38 = vpop.f32.mrb[8].mxu0 }
 0x171   : > { %v3459_v39 = vpop.f32.mrb[8].mxu1  ;;  %v3461_v16 = vpop.f32.mrb[9].mxu0 }
 0x172   : > { %v3463_v40 = vpop.f32.mrb[9].mxu1  ;;  %v3465_v41 = vpop.f32.mrb[10].mxu0 }
 0x173   : > { %v3467_v42 = vpop.f32.mrb[10].mxu1  ;;  %v3469_v43 = vpop.f32.mrb[11].mxu0 }
 0x174   : > { %v3471_v44 = vpop.f32.mrb[11].mxu1 }
 0x178   : > { %v3473_v45 = vpop.f32.mrb[12].mxu0 }
 0x179   : > { %v3475_v46 = vpop.f32.mrb[13].mxu0  ;;  %v3477_v47 = vpop.f32.mrb[12].mxu1 }
 0x17a   : > { %v3479_v48 = vpop.f32.mrb[14].mxu0  ;;  %v3481_v49 = vpop.f32.mrb[13].mxu1 }
 0x17b   : > { %v3483_v50 = vpop.f32.mrb[15].mxu0  ;;  %v3485_v51 = vpop.f32.mrb[14].mxu1 }
 0x17c   : > { %v3487_v52 = vpop.f32.mrb[15].mxu1 }
 0x1b0   : > { %v1326_v21 = vpop.f32.mrb[16].mxu0 }
 0x1b1   : > { %v1327_v24 = vadd.f32 %v1326_v21, %v3489_v53  ;;  %v1379_v25 = vpop.f32.mrb[16].mxu1  ;;  %v1328_v26 = vpop.f32.mrb[17].mxu0 }
 0x1b2   : > { %v1380_v2 = vadd.f32 %v1379_v25, %v3489_v53  ;;  %v1329_v30 = vadd.f32 %v1328_v26, %v3489_v53  ;;  %v1381_v31 = vpop.f32.mrb[17].mxu1  ;;  %v1330_v32 = vpop.f32.mrb[18].mxu0 }
 0x1b3   : > { %v1504_v34 = vmax.f32 %v1327_v24, 0.0  ;;  %v1382_v35 = vadd.f32 %v1381_v31, %v3489_v53  ;;  %v1331_v36 = vadd.f32 %v1330_v32, %v3493_v55  ;;  %v1383_v37 = vpop.f32.mrb[18].mxu1  ;;  %v1332_v56 = vpop.f32.mrb[19].mxu0 }
 0x1b4   : > { %v1506_v57 = vmax.f32 %v1380_v2, 0.0  ;;  %v1505_v58 = vmax.f32 %v1329_v30, 0.0  ;;  %v1384_v60 = vadd.f32 %v1383_v37, %v3493_v55  ;;  %v1333_v61 = vadd.f32 %v1332_v56, %v3493_v55  ;;  %v1385_v62 = vpop.f32.mrb[19].mxu1 }
 0x1b5   : > { %v1536_v63 = vsub.f32 %v1068_v4, %v1504_v34  ;;  %v1507_v0 = vmax.f32 %v1382_v35, 0.0  ;;  %v1512_v21 = vmax.f32 %v1331_v36, 0.0  ;;  %v1386_v25 = vadd.f32 %v1385_v62, %v3493_v55 }
 0x1b6   : > { %v1538_v26 = vsub.f32 %v1070_v8, %v1506_v57  ;;  %v1537_v24 = vsub.f32 %v1069_v9, %v1505_v58  ;;  %v1514_v33 = vmax.f32 %v1384_v60, 0.0  ;;  %v1513_v31 = vmax.f32 %v1333_v61, 0.0 }
 0x1b7   : > { %v1568_v28 = vadd.f32 1e-06, %v1536_v63  ;;  %v1539_v32 = vsub.f32 %v1071_v12, %v1507_v0  ;;  %v1544_v29 = vsub.f32 %v1076_v13, %v1512_v21  ;;  %v1515_v27 = vmax.f32 %v1386_v25, 0.0 }
 0x1b8   : > { %v1570_v2 = vadd.f32 1e-06, %v1538_v26  ;;  %v1569_v30 = vadd.f32 1e-06, %v1537_v24  ;;  %v1546_v23 = vsub.f32 %v1078_v14, %v1514_v33  ;;  %v1545_v37 = vsub.f32 %v1077_v17, %v1513_v31  ;;  %v1336_v20 = vpop.f32.mrb[20].mxu0 }
 0x1b9   : > { %v1600_v56 = vmul.f32 %v1568_v28, %v1568_v28  ;;  %v1571_v22 = vadd.f32 1e-06, %v1539_v32  ;;  %v1576_v4 = vadd.f32 1e-06, %v1544_v29  ;;  %v1547_v34 = vsub.f32 %v1079_v18, %v1515_v27  ;;  %v1389_v35 = vpop.f32.mrb[20].mxu1  ;;  %v1338_v36 = vpop.f32.mrb[21].mxu0 }
 0x1ba   : > { %v1602_v62 = vmul.f32 %v1570_v2, %v1570_v2  ;;  %v1601_v8 = vmul.f32 %v1569_v30, %v1569_v30  ;;  %v1578_v9 = vadd.f32 1e-06, %v1546_v23  ;;  %v1577_v57 = vadd.f32 1e-06, %v1545_v37  ;;  %v1391_v58 = vpop.f32.mrb[21].mxu1  ;;  %v1340_v60 = vpop.f32.mrb[22].mxu0 }
 0x1bb   : > { %v1603_v12 = vmul.f32 %v1571_v22, %v1571_v22  ;;  %v1608_v13 = vmul.f32 %v1576_v4, %v1576_v4  ;;  %v1579_v61 = vadd.f32 1e-06, %v1547_v34  ;;  %v1337_v63 = vadd.f32 %v1336_v20, %v3491_v54  ;;  %v1393_v14 = vpop.f32.mrb[22].mxu1  ;;  %v1342_v17 = vpop.f32.mrb[23].mxu0 }
 0x1bc   : > { %v1610_v33 = vmul.f32 %v1578_v9, %v1578_v9  ;;  %v1609_v28 = vmul.f32 %v1577_v57, %v1577_v57  ;;  %v1390_v29 = vadd.f32 %v1389_v35, %v3491_v54  ;;  %v1339_v18 = vadd.f32 %v1338_v36, %v3491_v54  ;;  %v1395_v27 = vpop.f32.mrb[23].mxu1 }
 0x1bd   : > { %v1632_v0 = vadd.f32 %v1608_v13, %v1600_v56  ;;  %v1611_v21 = vmul.f32 %v1579_v61, %v1579_v61  ;;  %v1520_v23 = vmax.f32 %v1337_v63, 0.0  ;;  %v1392_v25 = vadd.f32 %v1391_v58, %v3491_v54 }
 0x1be   : > { %v1650_v26 = vadd.f32 %v1610_v33, %v1602_v62  ;;  %v1641_v22 = vadd.f32 %v1609_v28, %v1601_v8  ;;  %v1522_v24 = vmax.f32 %v1390_v29, 0.0  ;;  %v1521_v31 = vmax.f32 %v1339_v18, 0.0 }
 0x1bf   : > { %v1659_v32 = vadd.f32 %v1611_v21, %v1603_v12  ;;  %v1552_v20 = vsub.f32 %v1084_v19, %v1520_v23  ;;  %v1523_v2 = vmax.f32 %v1392_v25, 0.0  ;;  %v1341_v30 = vadd.f32 %v1340_v60, %v3498_v59 }
 0x1c0   : > { %v4066_v37 = vmax.f32 %v3514_v5, 0.0  ;;  %v4067_v56 = vmax.f32 %v3511_v3, 0.0  ;;  %v1394_v35 = vadd.f32 %v1393_v14, %v3498_v59  ;;  %v1343_v36 = vadd.f32 %v1342_v17, %v3498_v59 }
 0x1c1   : > { %v1584_v62 = vadd.f32 1e-06, %v1552_v20  ;;  %v4068_v8 = vmax.f32 %v3517_v6, 0.0  ;;  %v1528_v57 = vmax.f32 %v1341_v30, 0.0  ;;  %v1396_v1 = vadd.f32 %v1395_v27, %v3498_v59 }
 0x1c2   : > { %v1554_v4 = vsub.f32 %v4066_v37, %v1522_v24  ;;  %v1553_v34 = vsub.f32 %v4067_v56, %v1521_v31  ;;  %v1530_v60 = vmax.f32 %v1394_v35, 0.0  ;;  %v1529_v12 = vmax.f32 %v1343_v36, 0.0 }
 0x1c3   : > { %v1555_v9 = vsub.f32 %v4068_v8, %v1523_v2  ;;  %v1616_v5 = vmul.f32 %v1584_v62, %v1584_v62  ;;  %v4069_v3 = vmax.f32 %v3520_v7, 0.0  ;;  %v1531_v63 = vmax.f32 %v1396_v1, 0.0 }
 0x1c4   : > { %v1586_v19 = vadd.f32 1e-06, %v1554_v4  ;;  %v1585_v58 = vadd.f32 1e-06, %v1553_v34  ;;  %v4070_v17 = vmax.f32 %v3526_v11, 0.0  ;;  %v4071_v6 = vmax.f32 %v3523_v10, 0.0 }
 0x1c5   : > { %v1587_v13 = vadd.f32 1e-06, %v1555_v9  ;;  %v1560_v61 = vsub.f32 %v4069_v3, %v1528_v57  ;;  %v1633_v18 = vadd.f32 %v1632_v0, %v1616_v5  ;;  %v4072_v23 = vmax.f32 %v3529_v15, 0.0 }
 0x1c6   : > { %v1618_v14 = vmul.f32 %v1586_v19, %v1586_v19  ;;  %v1617_v33 = vmul.f32 %v1585_v58, %v1585_v58  ;;  %v1562_v28 = vsub.f32 %v4070_v17, %v1530_v60  ;;  %v1561_v29 = vsub.f32 %v4071_v6, %v1529_v12 }
 0x1c7   : > { %v1619_v27 = vmul.f32 %v1587_v13, %v1587_v13  ;;  %v1592_v21 = vadd.f32 1e-06, %v1560_v61  ;;  %v1563_v25 = vsub.f32 %v4072_v23, %v1531_v63  ;;  %v1050_v23 = vadd.f32 %v3459_v39, %v3489_v53 }
 0x1c8   : > { %v1651_v24 = vadd.f32 %v1650_v26, %v1618_v14  ;;  %v1642_v31 = vadd.f32 %v1641_v22, %v1617_v33  ;;  %v1594_v20 = vadd.f32 1e-06, %v1562_v28  ;;  %v1593_v7 = vadd.f32 1e-06, %v1561_v29 }
 0x1c9   : > { %v1660_v2 = vadd.f32 %v1659_v32, %v1619_v27  ;;  %v1624_v30 = vmul.f32 %v1592_v21, %v1592_v21  ;;  %v1595_v37 = vadd.f32 1e-06, %v1563_v25  ;;  %v997_v21 = vadd.f32 %v3457_v38, %v3489_v53 }
 0x1ca   : > { %v1626_v4 = vmul.f32 %v1594_v20, %v1594_v20  ;;  %v1625_v56 = vmul.f32 %v1593_v7, %v1593_v7  ;;  %v999_v25 = vadd.f32 %v3461_v16, %v3489_v53  ;;  %v1054_v20 = vadd.f32 %v3467_v42, %v3493_v55 }
 0x1cb   : > { %v1634_v11 = vadd.f32 %v1633_v18, %v1624_v30  ;;  %v1627_v34 = vmul.f32 %v1595_v37, %v1595_v37  ;;  %v1003_v7 = vadd.f32 %v3469_v43, %v3493_v55  ;;  %v3590_v38 = vadd.f32 %v3471_v44, %v3493_v55 }
 0x1cc   : > { %v1652_v35 = vadd.f32 %v1651_v24, %v1626_v4  ;;  %v1643_v10 = vadd.f32 %v1642_v31, %v1625_v56  ;;  %v1052_v24 = vadd.f32 %v3463_v40, %v3489_v53  ;;  %v1001_v31 = vadd.f32 %v3465_v41, %v3493_v55 }
 0x1cd   : > { %v1635_v36 = vrot.slane %v1634_v11, 4  ;;  %v1661_v0 = vadd.f32 %v1660_v2, %v1627_v34  ;;  %v3594_v39 = vadd.f32 %v3473_v45, %v3491_v54  ;;  %v3598_v16 = vadd.f32 %v3475_v46, %v3491_v54 }
 0x1ce   : > { %v1653_v62 = vrot.slane %v1652_v35, 4  ;;  %v1644_v8 = vrot.slane %v1643_v10, 4  ;;  %v1072_v40 = vmax.f32 %v997_v21, 0.0  ;;  %v3602_v41 = vadd.f32 %v3479_v48, %v3498_v59 }
 0x1cf   : > { %v1636_v9 = vadd.f32 %v1635_v36, %v1634_v11  ;;  %v1662_v15 = vrot.slane %v1661_v0, 4  ;;  %v3606_v42 = vadd.f32 %v3477_v47, %v3491_v54  ;;  %v3610_v43 = vadd.f32 %v3481_v49, %v3491_v54 }
 0x1d0   : > { %v1654_v57 = vadd.f32 %v1653_v62, %v1652_v35  ;;  %v1645_v26 = vadd.f32 %v1644_v8, %v1643_v10  ;;  %v1074_v44 = vmax.f32 %v1050_v23, 0.0  ;;  %v1073_v45 = vmax.f32 %v999_v25, 0.0 }
 0x1d1   : > { %v1637_v22 = vrot.slane %v1636_v9, 2  ;;  %v1663_v1 = vadd.f32 %v1662_v15, %v1661_v0  ;;  %v3614_v2 = vadd.f32 %v3483_v50, %v3498_v59  ;;  %v3618_v46 = vadd.f32 %v3485_v51, %v3498_v59 }
 0x1d2   : > { %v1655_v19 = vrot.slane %v1654_v57, 2  ;;  %v1646_v32 = vrot.slane %v1645_v26, 2  ;;  %v1075_v48 = vmax.f32 %v1052_v24, 0.0  ;;  %v1080_v30 = vmax.f32 %v1001_v31, 0.0 }
 0x1d3   : > { %v1638_v58 = vadd.f32 %v1637_v22, %v1636_v9  ;;  %v1664_v60 = vrot.slane %v1663_v1, 2  ;;  %v1082_v37 = vmax.f32 %v1054_v20, 0.0  ;;  %v3622_v47 = vadd.f32 %v3487_v52, %v3498_v59 }
 0x1d4   : > { %v1656_v12 = vadd.f32 %v1655_v19, %v1654_v57  ;;  %v1647_v5 = vadd.f32 %v1646_v32, %v1645_v26  ;;  %v1081_v4 = vmax.f32 %v1003_v7, 0.0  ;;  %v1083_v49 = vmax.f32 %v3590_v38, 0.0 }
 0x1d5   : > { %v1639_v13 = vrot.slane %v1638_v58, 1  ;;  %v1665_v3 = vadd.f32 %v1664_v60, %v1663_v1  ;;  %v1088_v56 = vmax.f32 %v3594_v39, 0.0  ;;  %v1089_v11 = vmax.f32 %v3598_v16, 0.0 }
 0x1d6   : > { %v1657_v61 = vrot.slane %v1656_v12, 1  ;;  %v1648_v63 = vrot.slane %v1647_v5, 1  ;;  %v1096_v34 = vmax.f32 %v3602_v41, 0.0  ;;  %v1090_v51 = vmax.f32 %v3606_v42, 0.0 }
 0x1d7   : > { %v1640_v14 = vadd.f32 %v1639_v13, %v1638_v58  ;;  %v1666_v33 = vrot.slane %v1665_v3, 1  ;;  %v1091_v35 = vmax.f32 %v3610_v43, 0.0  ;;  %v1097_v52 = vmax.f32 %v3614_v2, 0.0 }
 0x1d8   : > { %v1649_v17 = vadd.f32 %v1648_v63, %v1647_v5  ;;  %v1658_v28 = vadd.f32 %v1657_v61, %v1656_v12  ;;  %v1098_v62 = vmax.f32 %v3618_v46, 0.0  ;;  %v1099_v26 = vmax.f32 %v3622_v47, 0.0 }
 0x1d9   : > { %v1667_v29 = vadd.f32 %v1666_v33, %v1665_v3 }
 0x1da   : > { %v1705_v6 = vsel %vm1704_vm1, %v1640_v14, %v1649_v17 }
 0x1db   : > { %v1707_v18 = vsel %vm1706_vm2, %v1705_v6, %v1658_v28 }
 0x1dc   : > { %v3572_v27 = vsel %vm1708_vm3, %v1707_v18, %v1667_v29 }
 0x1f0   : > { %v1432_v50 = vpop.f32.mrb[24].mxu0 }
 0x1f1   : > { %v1433_v10 = vadd.f32 %v1432_v50, %v3489_v53  ;;  %v1485_v36 = vpop.f32.mrb[24].mxu1  ;;  %v1434_v0 = vpop.f32.mrb[25].mxu0 }
 0x1f2   : > { %v1486_v8 = vadd.f32 %v1485_v36, %v3489_v53  ;;  %v1435_v9 = vadd.f32 %v1434_v0, %v3489_v53  ;;  %v1487_v15 = vpop.f32.mrb[25].mxu1  ;;  %v1436_v57 = vpop.f32.mrb[26].mxu0 }
 0x1f3   : > { %v1508_v22 = vmax.f32 %v1433_v10, 0.0  ;;  %v1488_v1 = vadd.f32 %v1487_v15, %v3489_v53  ;;  %v1437_v19 = vadd.f32 %v1436_v57, %v3493_v55  ;;  %v1489_v32 = vpop.f32.mrb[26].mxu1  ;;  %v1438_v58 = vpop.f32.mrb[27].mxu0 }
 0x1f4   : > { %v1510_v60 = vmax.f32 %v1486_v8, 0.0  ;;  %v1509_v12 = vmax.f32 %v1435_v9, 0.0  ;;  %v1490_v5 = vadd.f32 %v1489_v32, %v3493_v55  ;;  %v1439_v13 = vadd.f32 %v1438_v58, %v3493_v55  ;;  %v1491_v3 = vpop.f32.mrb[27].mxu1 }
 0x1f5   : > { %v1540_v61 = vsub.f32 %v1072_v40, %v1508_v22  ;;  %v1511_v63 = vmax.f32 %v1488_v1, 0.0  ;;  %v1516_v14 = vmax.f32 %v1437_v19, 0.0  ;;  %v1492_v33 = vadd.f32 %v1491_v3, %v3493_v55 }
 0x1f6   : > { %v1542_v17 = vsub.f32 %v1074_v44, %v1510_v60  ;;  %v1541_v28 = vsub.f32 %v1073_v45, %v1509_v12  ;;  %v1518_v6 = vmax.f32 %v1490_v5, 0.0  ;;  %v1517_v53 = vmax.f32 %v1439_v13, 0.0 }
 0x1f7   : > { %v1572_v29 = vadd.f32 1e-06, %v1540_v61  ;;  %v1543_v18 = vsub.f32 %v1075_v48, %v1511_v63  ;;  %v1548_v21 = vsub.f32 %v1080_v30, %v1516_v14  ;;  %v1519_v23 = vmax.f32 %v1492_v33, 0.0 }
 0x1f8   : > { %v1574_v25 = vadd.f32 1e-06, %v1542_v17  ;;  %v1573_v24 = vadd.f32 1e-06, %v1541_v28  ;;  %v1550_v31 = vsub.f32 %v1082_v37, %v1518_v6  ;;  %v1549_v20 = vsub.f32 %v1081_v4, %v1517_v53  ;;  %v1442_v7 = vpop.f32.mrb[28].mxu0 }
 0x1f9   : > { %v1604_v38 = vmul.f32 %v1572_v29, %v1572_v29  ;;  %v1575_v50 = vadd.f32 1e-06, %v1543_v18  ;;  %v1580_v40 = vadd.f32 1e-06, %v1548_v21  ;;  %v1551_v10 = vsub.f32 %v1083_v49, %v1519_v23  ;;  %v1495_v36 = vpop.f32.mrb[28].mxu1  ;;  %v1444_v0 = vpop.f32.mrb[29].mxu0 }
 0x1fa   : > { %v1606_v55 = vmul.f32 %v1574_v25, %v1574_v25  ;;  %v1605_v44 = vmul.f32 %v1573_v24, %v1573_v24  ;;  %v1582_v45 = vadd.f32 1e-06, %v1550_v31  ;;  %v1581_v8 = vadd.f32 1e-06, %v1549_v20  ;;  %v1497_v9 = vpop.f32.mrb[29].mxu1  ;;  %v1446_v15 = vpop.f32.mrb[30].mxu0 }
 0x1fb   : > { %v1607_v48 = vmul.f32 %v1575_v50, %v1575_v50  ;;  %v1612_v30 = vmul.f32 %v1580_v40, %v1580_v40  ;;  %v1583_v57 = vadd.f32 1e-06, %v1551_v10  ;;  %v1443_v22 = vadd.f32 %v1442_v7, %v3491_v54  ;;  %v1499_v37 = vpop.f32.mrb[30].mxu1  ;;  %v1448_v4 = vpop.f32.mrb[31].mxu0 }
 0x1fc   : > { %v1614_v1 = vmul.f32 %v1582_v45, %v1582_v45  ;;  %v1613_v19 = vmul.f32 %v1581_v8, %v1581_v8  ;;  %v1496_v32 = vadd.f32 %v1495_v36, %v3491_v54  ;;  %v1445_v49 = vadd.f32 %v1444_v0, %v3491_v54  ;;  %v1501_v58 = vpop.f32.mrb[31].mxu1 }
 0x1fd   : > { %v1668_v60 = vadd.f32 %v1612_v30, %v1604_v38  ;;  %v1615_v12 = vmul.f32 %v1583_v57, %v1583_v57  ;;  %v1524_v5 = vmax.f32 %v1443_v22, 0.0  ;;  %v1498_v13 = vadd.f32 %v1497_v9, %v3491_v54 }
 0x1fe   : > { %v1686_v3 = vadd.f32 %v1614_v1, %v1606_v55  ;;  %v1677_v61 = vadd.f32 %v1613_v19, %v1605_v44  ;;  %v1526_v63 = vmax.f32 %v1496_v32, 0.0  ;;  %v1525_v14 = vmax.f32 %v1445_v49, 0.0 }
 0x1ff   : > { %v1695_v33 = vadd.f32 %v1615_v12, %v1607_v48  ;;  %v1556_v17 = vsub.f32 %v1088_v56, %v1524_v5  ;;  %v1527_v28 = vmax.f32 %v1498_v13, 0.0  ;;  %v1447_v6 = vadd.f32 %v1446_v15, %v3498_v59 }
 0x200   : > { %v1558_v53 = vsub.f32 %v1090_v51, %v1526_v63  ;;  %v1557_v29 = vsub.f32 %v1089_v11, %v1525_v14  ;;  %v1500_v18 = vadd.f32 %v1499_v37, %v3498_v59  ;;  %v1449_v54 = vadd.f32 %v1448_v4, %v3498_v59 }
 0x201   : > { %v1588_v21 = vadd.f32 1e-06, %v1556_v17  ;;  %v1559_v23 = vsub.f32 %v1091_v35, %v1527_v28  ;;  %v1532_v25 = vmax.f32 %v1447_v6, 0.0  ;;  %v1502_v39 = vadd.f32 %v1501_v58, %v3498_v59 }
 0x202   : > { %v1590_v56 = vadd.f32 1e-06, %v1558_v53  ;;  %v1589_v24 = vadd.f32 1e-06, %v1557_v29  ;;  %v1534_v31 = vmax.f32 %v1500_v18, 0.0  ;;  %v1533_v20 = vmax.f32 %v1449_v54, 0.0 }
 0x203   : > { %v1620_v42 = vmul.f32 %v1588_v21, %v1588_v21  ;;  %v1591_v51 = vadd.f32 1e-06, %v1559_v23  ;;  %v1564_v16 = vsub.f32 %v1096_v34, %v1532_v25  ;;  %v1535_v11 = vmax.f32 %v1502_v39, 0.0 }
 0x204   : > { %v1622_v7 = vmul.f32 %v1590_v56, %v1590_v56  ;;  %v1621_v38 = vmul.f32 %v1589_v24, %v1589_v24  ;;  %v1566_v50 = vsub.f32 %v1098_v62, %v1534_v31  ;;  %v1565_v43 = vsub.f32 %v1097_v52, %v1533_v20 }
 0x205   : > { %v1669_v35 = vadd.f32 %v1668_v60, %v1620_v42  ;;  %v1623_v59 = vmul.f32 %v1591_v51, %v1591_v51  ;;  %v1596_v40 = vadd.f32 1e-06, %v1564_v16  ;;  %v1567_v10 = vsub.f32 %v1099_v26, %v1535_v11 }
 0x206   : > { %v1687_v36 = vadd.f32 %v1686_v3, %v1622_v7  ;;  %v1678_v0 = vadd.f32 %v1677_v61, %v1621_v38  ;;  %v1598_v55 = vadd.f32 1e-06, %v1566_v50  ;;  %v1597_v41 = vadd.f32 1e-06, %v1565_v43 }
 0x207   : > { %v1696_v34 = vadd.f32 %v1695_v33, %v1623_v59  ;;  %v1628_v44 = vmul.f32 %v1596_v40, %v1596_v40  ;;  %v1599_v45 = vadd.f32 1e-06, %v1567_v10  ;;  %v1718_v54 = vlaneseq }
 0x208   : > { %v1630_v8 = vmul.f32 %v1598_v55, %v1598_v55  ;;  %v1629_v9 = vmul.f32 %v1597_v41, %v1597_v41 }
 0x209   : > { %v1670_v46 = vadd.f32 %v1669_v35, %v1628_v44  ;;  %v1631_v62 = vmul.f32 %v1599_v45, %v1599_v45  ;;  %v3669_v21 = vand.u32 127, %v1718_v54 }
 0x20a   : > { %v1688_v15 = vadd.f32 %v1687_v36, %v1630_v8  ;;  %v1679_v2 = vadd.f32 %v1678_v0, %v1629_v9 }
 0x20b   : > { %v1671_v52 = vrot.slane %v1670_v46, 4  ;;  %v1697_v48 = vadd.f32 %v1696_v34, %v1631_v62  ;;  %v1724_v23 = vand.u32 1, %v3669_v21  ;;  %v1727_v25 = vand.u32 2, %v3669_v21 }
 0x20c   : > { %v1689_v30 = vrot.slane %v1688_v15, 4  ;;  %v1680_v57 = vrot.slane %v1679_v2, 4  ;;  %v1740_v51 = vand.u32 4, %v3669_v21  ;;  %v1763_v34 = vand.u32 8, %v3669_v21 }
 0x20d   : > { %v1672_v22 = vadd.f32 %v1671_v52, %v1670_v46  ;;  %v1698_v47 = vrot.slane %v1697_v48, 4  ;;  %vm3673_vm8 = vcmp.eq.s32.totalorder %v1724_v23, 0  ;;  %vm1728_vm9 = vcmp.ne.s32.totalorder %v1727_v25, 0 }
 0x20e   : > { %v1690_v26 = vadd.f32 %v1689_v30, %v1688_v15  ;;  %v1681_v37 = vadd.f32 %v1680_v57, %v1679_v2  ;;  %vm1729_vm10 = vmxor %vm1728_vm9, %vm3673_vm8  ;;  %vm3685_vm13 = vcmp.eq.s32.totalorder %v1727_v25, 0  ;;  %vm3689_vm14 = vcmp.ne.s32.totalorder %v1740_v51, 0 }
 0x20f   : > { %v1673_v4 = vrot.slane %v1672_v22, 2  ;;  %v1699_v1 = vadd.f32 %v1698_v47, %v1697_v48  ;;  %vm1730_vm12 = vmxor %vm1729_vm10, %vm2874_vm11  ;;  %vm3712_vm3 = vcmp.eq.s32.totalorder %v1740_v51, 0 }
 0x210   : > { %v1691_v19 = vrot.slane %v1690_v26, 2  ;;  %v1682_v32 = vrot.slane %v1681_v37, 2  ;;  %vm1742_vm15 = vmxor %vm3689_vm14, %vm3685_vm13 }
 0x211   : > { %v1674_v49 = vadd.f32 %v1673_v4, %v1672_v22  ;;  %v1700_v58 = vrot.slane %v1699_v1, 2  ;;  %vm1743_vm0 = vmxor %vm1742_vm15, %vm2874_vm11 }
 0x212   : > { %v1692_v60 = vadd.f32 %v1691_v19, %v1690_v26  ;;  %v1683_v12 = vadd.f32 %v1682_v32, %v1681_v37  ;;  %vm1752_vm1 = vmxor %vm3689_vm14, %vm3673_vm8  ;;  %vm3748_vm14 = vcmp.eq.s32.totalorder %v1763_v34, 0 }
 0x213   : > { %v1675_v5 = vrot.slane %v1674_v49, 1  ;;  %v1701_v13 = vadd.f32 %v1700_v58, %v1699_v1  ;;  %vm1753_vm2 = vmxor %vm1752_vm1, %vm2874_vm11 }
 0x214   : > { %v1693_v3 = vrot.slane %v1692_v60, 1  ;;  %v1684_v61 = vrot.slane %v1683_v12, 1 }
 0x215   : > { %v1676_v63 = vadd.f32 %v1675_v5, %v1674_v49  ;;  %v1702_v14 = vrot.slane %v1701_v13, 1  ;;  %v1796_v49 = vand.u32 16, %v3669_v21 }
 0x216   : > { %v1685_v33 = vadd.f32 %v1684_v61, %v1683_v12  ;;  %v1694_v17 = vadd.f32 %v1693_v3, %v1692_v60  ;;  %v1892_v60 = vand.u32 64, %v3669_v21 }
 0x217   : > { %v1711_v28 = vsel %vm1710_vm4, %v3572_v27, %v1676_v63  ;;  %v1703_v6 = vadd.f32 %v1702_v14, %v1701_v13  ;;  %vm3716_vm4 = vcmp.ne.s32.totalorder %v1763_v34, 0  ;;  %vm3752_vm15 = vcmp.ne.s32.totalorder %v1796_v49, 0  ;;  %v2444_v27 = vld [vmem:[%s4062_s3] ss:$0 sm:$0xff] }
 0x218   : > { %v1713_v53 = vsel %vm1712_vm5, %v1711_v28, %v1685_v33  ;;  %vm1765_vm5 = vmxor %vm3716_vm4, %vm3712_vm3 }
 0x219   : > { %v1715_v29 = vsel %vm1714_vm6, %v1713_v53, %v1694_v17  ;;  %vm1766_vm6 = vmxor %vm1765_vm5, %vm2874_vm11 }
 0x21a   : > { %v1717_v18 = vsel %vm1716_vm7, %v1715_v29, %v1703_v6  ;;  %vm1775_vm7 = vmxor %vm3716_vm4, %vm3685_vm13 }
 0x21b   : > { %1722 = vrot.lane.b32.xlu1 %v1717_v18, %s2872_s27  ;;  %1720 = vrot.lane.b32.xlu0 %v1717_v18, %s2873_s6  ;;  %vm1776_vm9 = vmxor %vm1775_vm7, %vm2874_vm11 }
 0x21c   : > { %vm1785_vm10 = vmxor %vm3716_vm4, %vm3673_vm8 }
 0x21d   : > { %vm1818_vm5 = vmxor %vm3752_vm15, %vm3685_vm13 }
 0x21e   : > { %vm1828_vm7 = vmxor %vm3752_vm15, %vm3673_vm8 }
 0x28d   : > { %v1723_v39 = vpop.permute.xlu1 %1722  ;;  %v1721_v56 = vpop.permute.xlu0 %1720 }
 0x28e   : > { %v1726_v24 = vsel %vm3673_vm8, %v1721_v56, %v1723_v39 }
 0x28f   : > { %v1731_v31 = vmin.f32 %v1717_v18, %v1726_v24  ;;  %v1732_v20 = vmax.f32 %v1717_v18, %v1726_v24 }
 0x291   : > { %v1733_v42 = vsel %vm1730_vm12, %v1731_v31, %v1732_v20  ;;  %vm1786_vm12 = vmxor %vm1785_vm10, %vm2874_vm11  ;;  %vm3793_vm10 = vcmp.eq.s32.totalorder %v1796_v49, 0 }
 0x292   : > { %1736 = vrot.lane.b32.xlu1 %v1733_v42, %s2875_s9  ;;  %1734 = vrot.lane.b32.xlu0 %v1733_v42, %s2876_s11 }
 0x304   : > { %v1737_v7 = vpop.permute.xlu1 %1736  ;;  %v1735_v38 = vpop.permute.xlu0 %1734 }
 0x305   : > { %v1739_v50 = vsel %vm3685_vm13, %v1735_v38, %v1737_v7  ;;  %v1839_v7 = vand.u32 32, %v3669_v21 }
 0x306   : > { %v1744_v43 = vmin.f32 %v1733_v42, %v1739_v50  ;;  %v1745_v35 = vmax.f32 %v1733_v42, %v1739_v50 }
 0x308   : > { %v1746_v59 = vsel %vm1743_vm0, %v1744_v43, %v1745_v35  ;;  %vm1798_vm0 = vmxor %vm3752_vm15, %vm3748_vm14 }
 0x309   : > { %1749 = vrot.lane.b32.xlu1 %v1746_v59, %s2872_s27  ;;  %1747 = vrot.lane.b32.xlu0 %v1746_v59, %s2873_s6  ;;  %vm1799_vm1 = vmxor %vm1798_vm0, %vm2874_vm11 }
 0x37b   : > { %v1750_v40 = vpop.permute.xlu1 %1749  ;;  %v1748_v10 = vpop.permute.xlu0 %1747 }
 0x37c   : > { %v1751_v36 = vsel %vm3673_vm8, %v1748_v10, %v1750_v40 }
 0x37d   : > { %v1754_v0 = vmin.f32 %v1746_v59, %v1751_v36  ;;  %v1755_v55 = vmax.f32 %v1746_v59, %v1751_v36 }
 0x37f   : > { %v1756_v41 = vsel %vm1753_vm2, %v1754_v0, %v1755_v55  ;;  %vm1808_vm2 = vmxor %vm3752_vm15, %vm3712_vm3 }
 0x380   : > { %1759 = vrot.lane.b32.xlu1 %v1756_v41, %s2877_s12  ;;  %1757 = vrot.lane.b32.xlu0 %v1756_v41, %s2878_s13  ;;  %vm1809_vm4 = vmxor %vm1808_vm2, %vm2874_vm11 }
 0x3f2   : > { %v1760_v8 = vpop.permute.xlu1 %1759  ;;  %v1758_v9 = vpop.permute.xlu0 %1757 }
 0x3f3   : > { %v1762_v46 = vsel %vm3712_vm3, %v1758_v9, %v1760_v8 }
 0x3f4   : > { %v1767_v62 = vmin.f32 %v1756_v41, %v1762_v46  ;;  %v1768_v15 = vmax.f32 %v1756_v41, %v1762_v46 }
 0x3f6   : > { %v1769_v2 = vsel %vm1766_vm6, %v1767_v62, %v1768_v15  ;;  %vm1819_vm6 = vmxor %vm1818_vm5, %vm2874_vm11 }
 0x3f7   : > { %1772 = vrot.lane.b32.xlu1 %v1769_v2, %s2875_s9  ;;  %1770 = vrot.lane.b32.xlu0 %v1769_v2, %s2876_s11 }
 0x469   : > { %v1773_v52 = vpop.permute.xlu1 %1772  ;;  %v1771_v48 = vpop.permute.xlu0 %1770 }
 0x46a   : > { %v1774_v30 = vsel %vm3685_vm13, %v1771_v48, %v1773_v52 }
 0x46b   : > { %v1777_v57 = vmin.f32 %v1769_v2, %v1774_v30  ;;  %v1778_v22 = vmax.f32 %v1769_v2, %v1774_v30 }
 0x46d   : > { %v1779_v47 = vsel %vm1776_vm9, %v1777_v57, %v1778_v22  ;;  %vm1829_vm9 = vmxor %vm1828_vm7, %vm2874_vm11 }
 0x46e   : > { %1782 = vrot.lane.b32.xlu1 %v1779_v47, %s2872_s27  ;;  %1780 = vrot.lane.b32.xlu0 %v1779_v47, %s2873_s6 }
 0x4e0   : > { %v1783_v26 = vpop.permute.xlu1 %1782  ;;  %v1781_v37 = vpop.permute.xlu0 %1780 }
 0x4e1   : > { %v1784_v4 = vsel %vm3673_vm8, %v1781_v37, %v1783_v26 }
 0x4e2   : > { %v1787_v1 = vmin.f32 %v1779_v47, %v1784_v4  ;;  %v1788_v19 = vmax.f32 %v1779_v47, %v1784_v4 }
 0x4e4   : > { %v1789_v32 = vsel %vm1786_vm12, %v1787_v1, %v1788_v19  ;;  %vm3797_vm12 = vcmp.ne.s32.totalorder %v1839_v7, 0 }
 0x4e5   : > { %1792 = vrot.lane.b32.xlu1 %v1789_v32, %s2879_s14  ;;  %1790 = vrot.lane.b32.xlu0 %v1789_v32, %s2880_s20  ;;  %vm1841_vm15 = vmxor %vm3797_vm12, %vm3793_vm10 }
 0x4e6   : > { %vm1842_vm0 = vmxor %vm1841_vm15, %vm2874_vm11 }
 0x557   : > { %v1793_v12 = vpop.permute.xlu1 %1792  ;;  %v1791_v5 = vpop.permute.xlu0 %1790 }
 0x558   : > { %v1795_v13 = vsel %vm3748_vm14, %v1791_v5, %v1793_v12 }
 0x559   : > { %v1800_v3 = vmin.f32 %v1789_v32, %v1795_v13  ;;  %v1801_v61 = vmax.f32 %v1789_v32, %v1795_v13 }
 0x55b   : > { %v1802_v63 = vsel %vm1799_vm1, %v1800_v3, %v1801_v61  ;;  %vm1851_vm1 = vmxor %vm3797_vm12, %vm3748_vm14 }
 0x55c   : > { %1805 = vrot.lane.b32.xlu1 %v1802_v63, %s2877_s12  ;;  %1803 = vrot.lane.b32.xlu0 %v1802_v63, %s2878_s13  ;;  %vm1852_vm2 = vmxor %vm1851_vm1, %vm2874_vm11 }
 0x5ce   : > { %v1806_v14 = vpop.permute.xlu1 %1805  ;;  %v1804_v33 = vpop.permute.xlu0 %1803 }
 0x5cf   : > { %v1807_v17 = vsel %vm3712_vm3, %v1804_v33, %v1806_v14 }
 0x5d0   : > { %v1810_v28 = vmin.f32 %v1802_v63, %v1807_v17  ;;  %v1811_v6 = vmax.f32 %v1802_v63, %v1807_v17 }
 0x5d2   : > { %v1812_v53 = vsel %vm1809_vm4, %v1810_v28, %v1811_v6  ;;  %vm1861_vm4 = vmxor %vm3797_vm12, %vm3712_vm3 }
 0x5d3   : > { %1815 = vrot.lane.b32.xlu1 %v1812_v53, %s2875_s9  ;;  %1813 = vrot.lane.b32.xlu0 %v1812_v53, %s2876_s11  ;;  %vm1862_vm5 = vmxor %vm1861_vm4, %vm2874_vm11 }
 0x645   : > { %v1816_v29 = vpop.permute.xlu1 %1815  ;;  %v1814_v18 = vpop.permute.xlu0 %1813 }
 0x646   : > { %v1817_v23 = vsel %vm3685_vm13, %v1814_v18, %v1816_v29 }
 0x647   : > { %v1820_v25 = vmin.f32 %v1812_v53, %v1817_v23  ;;  %v1821_v39 = vmax.f32 %v1812_v53, %v1817_v23 }
 0x649   : > { %v1822_v56 = vsel %vm1819_vm6, %v1820_v25, %v1821_v39  ;;  %vm1871_vm6 = vmxor %vm3797_vm12, %vm3685_vm13 }
 0x64a   : > { %1825 = vrot.lane.b32.xlu1 %v1822_v56, %s2872_s27  ;;  %1823 = vrot.lane.b32.xlu0 %v1822_v56, %s2873_s6  ;;  %vm1872_vm7 = vmxor %vm1871_vm6, %vm2874_vm11 }
 0x6bc   : > { %v1826_v24 = vpop.permute.xlu1 %1825  ;;  %v1824_v31 = vpop.permute.xlu0 %1823 }
 0x6bd   : > { %v1827_v20 = vsel %vm3673_vm8, %v1824_v31, %v1826_v24 }
 0x6be   : > { %v1830_v42 = vmin.f32 %v1822_v56, %v1827_v20  ;;  %v1831_v51 = vmax.f32 %v1822_v56, %v1827_v20 }
 0x6c0   : > { %v1832_v11 = vsel %vm1829_vm9, %v1830_v42, %v1831_v51  ;;  %vm1881_vm9 = vmxor %vm3797_vm12, %vm3673_vm8  ;;  %vm3851_vm12 = vcmp.ne.s32.totalorder %v1892_v60, 0 }
 0x6c1   : > { %1835 = vrot.lane.b32.xlu1 %v1832_v11, %s2881_s22  ;;  %1833 = vrot.lane.b32.xlu0 %v1832_v11, %s2882_s23  ;;  %vm1882_vm15 = vmxor %vm1881_vm9, %vm2874_vm11 }
 0x6c2   : > { %vm1904_vm4 = vmxor %vm3851_vm12, %vm3793_vm10 }
 0x6c3   : > { %vm1914_vm6 = vmxor %vm3851_vm12, %vm3748_vm14 }
 0x6c4   : > { %vm1924_vm9 = vmxor %vm3851_vm12, %vm3712_vm3 }
 0x733   : > { %v1836_v43 = vpop.permute.xlu1 %1835  ;;  %v1834_v35 = vpop.permute.xlu0 %1833 }
 0x734   : > { %v1838_v59 = vsel %vm3793_vm10, %v1834_v35, %v1836_v43 }
 0x735   : > { %v1843_v40 = vmin.f32 %v1832_v11, %v1838_v59  ;;  %v1844_v10 = vmax.f32 %v1832_v11, %v1838_v59 }
 0x737   : > { %v1845_v36 = vsel %vm1842_vm0, %v1843_v40, %v1844_v10  ;;  %vm3847_vm0 = vcmp.eq.s32.totalorder %v1839_v7, 0 }
 0x738   : > { %1848 = vrot.lane.b32.xlu1 %v1845_v36, %s2879_s14  ;;  %1846 = vrot.lane.b32.xlu0 %v1845_v36, %s2880_s20  ;;  %vm1894_vm1 = vmxor %vm3851_vm12, %vm3847_vm0 }
 0x7aa   : > { %v1849_v0 = vpop.permute.xlu1 %1848  ;;  %v1847_v55 = vpop.permute.xlu0 %1846 }
 0x7ab   : > { %v1850_v41 = vsel %vm3748_vm14, %v1847_v55, %v1849_v0 }
 0x7ac   : > { %v1853_v34 = vmin.f32 %v1845_v36, %v1850_v41  ;;  %v1854_v45 = vmax.f32 %v1845_v36, %v1850_v41 }
 0x7ae   : > { %v1855_v8 = vsel %vm1852_vm2, %v1853_v34, %v1854_v45  ;;  %vm1895_vm2 = vmxor %vm1894_vm1, %vm2874_vm11 }
 0x7af   : > { %1858 = vrot.lane.b32.xlu1 %v1855_v8, %s2877_s12  ;;  %1856 = vrot.lane.b32.xlu0 %v1855_v8, %s2878_s13  ;;  %vm1934_vm1 = vmxor %vm3851_vm12, %vm3685_vm13 }
 0x821   : > { %v1859_v9 = vpop.permute.xlu1 %1858  ;;  %v1857_v46 = vpop.permute.xlu0 %1856 }
 0x822   : > { %v1860_v62 = vsel %vm3712_vm3, %v1857_v46, %v1859_v9 }
 0x823   : > { %v1863_v15 = vmin.f32 %v1855_v8, %v1860_v62  ;;  %v1864_v2 = vmax.f32 %v1855_v8, %v1860_v62 }
 0x825   : > { %v1865_v52 = vsel %vm1862_vm5, %v1863_v15, %v1864_v2  ;;  %vm1905_vm5 = vmxor %vm1904_vm4, %vm2874_vm11 }
 0x826   : > { %1868 = vrot.lane.b32.xlu1 %v1865_v52, %s2875_s9  ;;  %1866 = vrot.lane.b32.xlu0 %v1865_v52, %s2876_s11  ;;  %vm1944_vm4 = vmxor %vm3851_vm12, %vm3673_vm8 }
 0x827   : > { %vm1965_vm12 = vmxor %vm3847_vm0, %vm2874_vm11 }
 0x898   : > { %v1869_v48 = vpop.permute.xlu1 %1868  ;;  %v1867_v30 = vpop.permute.xlu0 %1866 }
 0x899   : > { %v1870_v57 = vsel %vm3685_vm13, %v1867_v30, %v1869_v48 }
 0x89a   : > { %v1873_v22 = vmin.f32 %v1865_v52, %v1870_v57  ;;  %v1874_v47 = vmax.f32 %v1865_v52, %v1870_v57 }
 0x89c   : > { %v1875_v26 = vsel %vm1872_vm7, %v1873_v22, %v1874_v47  ;;  %vm1915_vm7 = vmxor %vm1914_vm6, %vm2874_vm11  ;;  %vm1951_vm6 = vcmp.eq.s32.totalorder %v1892_v60, 0 }
 0x89d   : > { %1878 = vrot.lane.b32.xlu1 %v1875_v26, %s2872_s27  ;;  %1876 = vrot.lane.b32.xlu0 %v1875_v26, %s2873_s6 }
 0x90f   : > { %v1879_v37 = vpop.permute.xlu1 %1878  ;;  %v1877_v4 = vpop.permute.xlu0 %1876 }
 0x910   : > { %v1880_v1 = vsel %vm3673_vm8, %v1877_v4, %v1879_v37 }
 0x911   : > { %v1883_v19 = vmin.f32 %v1875_v26, %v1880_v1  ;;  %v1884_v32 = vmax.f32 %v1875_v26, %v1880_v1 }
 0x913   : > { %v1885_v49 = vsel %vm1882_vm15, %v1883_v19, %v1884_v32  ;;  %vm1925_vm15 = vmxor %vm1924_vm9, %vm2874_vm11 }
 0x914   : > { %1888 = vrot.lane.b32.xlu1 %v1885_v49, %s2883_s28  ;;  %1886 = vrot.lane.b32.xlu0 %v1885_v49, %s2884_s29  ;;  %vm1975_vm9 = vmxor %vm3793_vm10, %vm2874_vm11 }
 0x986   : > { %v1889_v13 = vpop.permute.xlu1 %1888  ;;  %v1887_v3 = vpop.permute.xlu0 %1886 }
 0x987   : > { %v1891_v61 = vsel %vm3847_vm0, %v1887_v3, %v1889_v13 }
 0x988   : > { %v1896_v21 = vmin.f32 %v1885_v49, %v1891_v61  ;;  %v1897_v63 = vmax.f32 %v1885_v49, %v1891_v61 }
 0x98a   : > { %v1898_v14 = vsel %vm1895_vm2, %v1896_v21, %v1897_v63  ;;  %vm1935_vm2 = vmxor %vm1934_vm1, %vm2874_vm11  ;;  %v234_v63 = vld [vmem:[%s4061_s2 + $0x20] sm:$0xff]  ;;  %vm2032_vm1 = vcmask 64512  }
 0x98b   : > { %1901 = vrot.lane.b32.xlu1 %v1898_v14, %s2881_s22  ;;  %1899 = vrot.lane.b32.xlu0 %v1898_v14, %s2882_s23 }
 0x9fd   : > { %v1902_v33 = vpop.permute.xlu1 %1901  ;;  %v1900_v17 = vpop.permute.xlu0 %1899 }
 0x9fe   : > { %v1903_v28 = vsel %vm3793_vm10, %v1900_v17, %v1902_v33 }
 0x9ff   : > { %v1906_v6 = vmin.f32 %v1898_v14, %v1903_v28  ;;  %v1907_v53 = vmax.f32 %v1898_v14, %v1903_v28  ;;  %v2886_v14 = vmov 0.0  }
 0xa00   : > { %2633 = vmatprep.subr.mxu0 %v2886_v14 }
 0xa01   : > { %v1908_v29 = vsel %vm1905_vm5, %v1906_v6, %v1907_v53  ;;  %vm1945_vm5 = vmxor %vm1944_vm4, %vm2874_vm11  ;;  %2634 = vmatpush3.msra.mxu0 %v234_v63  ;;  %vm2336_vm4 = vcmask 57344  }
 0xa02   : > { %1911 = vrot.lane.b32.xlu1 %v1908_v29, %s2879_s14  ;;  %1909 = vrot.lane.b32.xlu0 %v1908_v29, %s2880_s20 }
 0xa03   : > { %2657 = vmatprep.subr.mxu0 %v2886_v14 }
 0xa74   : > { %v1912_v18 = vpop.permute.xlu1 %1911  ;;  %v1910_v23 = vpop.permute.xlu0 %1909 }
 0xa75   : > { %v1913_v25 = vsel %vm3748_vm14, %v1910_v23, %v1912_v18 }
 0xa76   : > { %v1916_v39 = vmin.f32 %v1908_v29, %v1913_v25  ;;  %v1917_v56 = vmax.f32 %v1908_v29, %v1913_v25 }
 0xa78   : > { %v1918_v24 = vsel %vm1915_vm7, %v1916_v39, %v1917_v56  ;;  %vm1955_vm7 = vmxor %vm1951_vm6, %vm2874_vm11 }
 0xa79   : > { %1921 = vrot.lane.b32.xlu1 %v1918_v24, %s2877_s12  ;;  %1919 = vrot.lane.b32.xlu0 %v1918_v24, %s2878_s13 }
 0xaeb   : > { %v1922_v31 = vpop.permute.xlu1 %1921  ;;  %v1920_v20 = vpop.permute.xlu0 %1919 }
 0xaec   : > { %v1923_v42 = vsel %vm3712_vm3, %v1920_v20, %v1922_v31 }
 0xaed   : > { %v1926_v51 = vmin.f32 %v1918_v24, %v1923_v42  ;;  %v1927_v11 = vmax.f32 %v1918_v24, %v1923_v42 }
 0xaef   : > { %v1928_v7 = vsel %vm1925_vm15, %v1926_v51, %v1927_v11  ;;  %vm2015_vm15 = vmxor %vm3673_vm8, %vm2874_vm11 }
 0xaf0   : > { %1931 = vrot.lane.b32.xlu1 %v1928_v7, %s2875_s9  ;;  %1929 = vrot.lane.b32.xlu0 %v1928_v7, %s2876_s11 }
 0xb62   : > { %v1932_v50 = vpop.permute.xlu1 %1931  ;;  %v1930_v43 = vpop.permute.xlu0 %1929 }
 0xb63   : > { %v1933_v35 = vsel %vm3685_vm13, %v1930_v43, %v1932_v50 }
 0xb64   : > { %v1936_v59 = vmin.f32 %v1928_v7, %v1933_v35  ;;  %v1937_v40 = vmax.f32 %v1928_v7, %v1933_v35 }
 0xb66   : > { %v1938_v10 = vsel %vm1935_vm2, %v1936_v59, %v1937_v40 }
 0xb67   : > { %1941 = vrot.lane.b32.xlu1 %v1938_v10, %s2872_s27  ;;  %1939 = vrot.lane.b32.xlu0 %v1938_v10, %s2873_s6 }
 0xbd9   : > { %v1942_v36 = vpop.permute.xlu1 %1941  ;;  %v1940_v0 = vpop.permute.xlu0 %1939 }
 0xbda   : > { %v1943_v55 = vsel %vm3673_vm8, %v1940_v0, %v1942_v36  ;;  %v235_v36 = vld [vmem:[%s4061_s2 + $0x28] sm:$0xff]  ;;  %v236_v0 = vld [vmem:[%s4061_s2 + $0x30] sm:$0xff] }
 0xbdb   : > { %v1946_v41 = vmin.f32 %v1938_v10, %v1943_v55  ;;  %v1947_v34 = vmax.f32 %v1938_v10, %v1943_v55  ;;  %v2663_v55 = vpack.c.bf16 %v236_v0, %v235_v36 }
 0xbdd   : > { %v1948_v45 = vsel %vm1945_vm5, %v1946_v41, %v1947_v34  ;;  %v2888_v41 = vmov 0.0|0.0   ;;  %v237_v34 = vld [vmem:[%s4061_s2 + $0x38] sm:$0xff] }
 0xbde   : > { %1949 = vrot.lane.b32.xlu0 %v1948_v45, %s2885_s30  ;;  %2662 = vmatprep.subr.bf16.mxu1 %v2888_v41 }
 0xbdf   : > { %2664 = vmatpush3.bf16.msra.mxu1 %v2663_v55 }
 0xbe0   : > { %2665 = vmatprep.subr.bf16.mxu1 %v2888_v41 }
 0xc50   : > { %v1950_v8 = vpop.permute.xlu0 %1949 }
 0xc51   : > { %v1956_v9 = vmin.f32 %v1948_v45, %v1950_v8  ;;  %v1957_v46 = vmax.f32 %v1948_v45, %v1950_v8  ;;  %v238_v45 = vld [vmem:[%s4061_s2 + $0x40] sm:$0xff] }
 0xc52   : > { %v2666_v8 = vpack.c.bf16 %v238_v45, %v237_v34 }
 0xc53   : > { %v1958_v62 = vsel %vm1955_vm7, %v1956_v9, %v1957_v46  ;;  %v239_v9 = vld [vmem:[%s4061_s2 + $0x48] sm:$0xff]  ;;  %v240_v46 = vld [vmem:[%s4061_s2 + $0x50] sm:$0xff] }
 0xc54   : > { %1961 = vrot.lane.b32.xlu0 %v1958_v62, %s2883_s28  ;;  %1959 = vrot.lane.b32.xlu1 %v1958_v62, %s2884_s29 }
 0xc55   : > { %2667 = vmatpush3.bf16.msra.mxu1 %v2666_v8 }
 0xc56   : > { %2668 = vmatprep.subr.bf16.mxu1 %v2888_v41 }
 0xcc6   : > { %v1962_v15 = vpop.permute.xlu0 %1961  ;;  %v1960_v2 = vpop.permute.xlu1 %1959 }
 0xcc7   : > { %v1963_v52 = vsel %vm3847_vm0, %v1960_v2, %v1962_v15  ;;  %vm1985_vm0 = vmxor %vm3748_vm14, %vm2874_vm11  ;;  %v241_v15 = vld [vmem:[%s4061_s2 + $0x58] sm:$0xff]  ;;  %v242_v2 = vld [vmem:[%s4061_s2 + $0x60] sm:$0xff] }
 0xcc8   : > { %v1966_v48 = vmin.f32 %v1958_v62, %v1963_v52  ;;  %v1967_v30 = vmax.f32 %v1958_v62, %v1963_v52  ;;  %v2669_v62 = vpack.c.bf16 %v240_v46, %v239_v9  ;;  %v2672_v52 = vpack.c.bf16 %v242_v2, %v241_v15 }
 0xcca   : > { %v1968_v57 = vsel %vm1965_vm12, %v1966_v48, %v1967_v30  ;;  %2670 = vmatpush3.bf16.msra.mxu1 %v2669_v62 }
 0xccb   : > { %1971 = vrot.lane.b32.xlu0 %v1968_v57, %s2881_s22  ;;  %1969 = vrot.lane.b32.xlu1 %v1968_v57, %s2882_s23 }
 0xccc   : > { %2671 = vmatprep.subr.bf16.mxu1 %v2888_v41 }
 0xcce   : > { %2673 = vmatpush3.bf16.msra.mxu1 %v2672_v52 }
 0xd3d   : > { %v1972_v22 = vpop.permute.xlu0 %1971  ;;  %v1970_v47 = vpop.permute.xlu1 %1969 }
 0xd3e   : > { %v1973_v26 = vsel %vm3793_vm10, %v1970_v47, %v1972_v22  ;;  %vm1995_vm10 = vmxor %vm3712_vm3, %vm2874_vm11  ;;  %v2446_v47 = vld [vmem:[%s4062_s3 + $0x1] ss:$0 sm:$0xff] }
 0xd3f   : > { %v1976_v37 = vmin.f32 %v1968_v57, %v1973_v26  ;;  %v1977_v4 = vmax.f32 %v1968_v57, %v1973_v26 }
 0xd41   : > { %v1978_v1 = vsel %vm1975_vm9, %v1976_v37, %v1977_v4  ;;  %v2447_v37 = vld [vmem:[%s4062_s3 + $0x2] ss:$0 sm:$0xff] }
 0xd42   : > { %1981 = vrot.lane.b32.xlu0 %v1978_v1, %s2879_s14  ;;  %1979 = vrot.lane.b32.xlu1 %v1978_v1, %s2880_s20 }
 0xdb4   : > { %v1982_v19 = vpop.permute.xlu0 %1981  ;;  %v1980_v32 = vpop.permute.xlu1 %1979 }
 0xdb5   : > { %v1983_v49 = vsel %vm3748_vm14, %v1980_v32, %v1982_v19  ;;  %vm2887_vm14 = vmmov 0   ;;  %v2448_v32 = vld [vmem:[%s4062_s3 + $0x3] ss:$0 sm:$0xff] }
 0xdb6   : > { %v1986_v60 = vmin.f32 %v1978_v1, %v1983_v49  ;;  %v1987_v12 = vmax.f32 %v1978_v1, %v1983_v49  ;;  %2635 = vmatprep.mubr.msk.f32.mxu0 %vm2887_vm14, %v2886_v14  ;;  %2654 = vmatprep.mubr.msk.f32.mxu1 %vm2887_vm14, %v2886_v14 }
 0xdb8   : > { %v1988_v38 = vsel %vm1985_vm0, %v1986_v60, %v1987_v12 }
 0xdb9   : > { %1991 = vrot.lane.b32.xlu0 %v1988_v38, %s2877_s12  ;;  %1989 = vrot.lane.b32.xlu1 %v1988_v38, %s2878_s13  ;;  %s2807_s12 = scalar_lea.vmem %s4019_s10, 16  ;;  %s2811_s13 = sshll.u32 %s2889_s19, 4  ;;  %s2812_s13 = int_to_ptr.vmem [resolvable:$false] %s2811_s13 }
 0xdba   : > { %p2808_p11 = scmp.ne.s32.totalorder %s4019_s10, %s2807_s12  ;;  %s2813_s14 = scalar_lea.vmem %s2812_s13, 32 }
 0xdbb   : > { %p2814_p0 = scmp.lt.s32.totalorder %s4019_s10, %s2812_s13  ;;  %p2815_p1 = scmp.lt.s32.totalorder %s2813_s14, %s2807_s12 }
 0xdbc   : > { %p2809_p12 = pnand %p2808_p11, %p2953_p5 }
 0xdbd   : > { %p2816_p2 = por %p2815_p1, %p2814_p0 }
 0xdbe   : > { %p2810_p13 = pneg %p2809_p12 }
 0xdc0   : > { %p2817_p3 = pnand %p2816_p2, %p2810_p13 }
 0xe2b   : > { %v1992_v5 = vpop.permute.xlu0 %1991  ;;  %v1990_v13 = vpop.permute.xlu1 %1989 }
 0xe2c   : > { %v1993_v3 = vsel %vm3712_vm3, %v1990_v13, %v1992_v5  ;;  %vm2005_vm3 = vmxor %vm3685_vm13, %vm2874_vm11  ;;  %vm2215_vm11 = vcmask 261120   ;;  %v250_v5 = vld [vmem:[%s4062_s3 + $0x6] sm:$0x1] }
 0xe2d   : > { %v1996_v61 = vmin.f32 %v1988_v38, %v1993_v3  ;;  %v1997_v21 = vmax.f32 %v1988_v38, %v1993_v3 }
 0xe2f   : > { %v1998_v58 = vsel %vm1995_vm10, %v1996_v61, %v1997_v21 }
 0xe30   : > { %2001 = vrot.lane.b32.xlu0 %v1998_v58, %s2875_s9  ;;  %1999 = vrot.lane.b32.xlu1 %v1998_v58, %s2876_s11  ;;  %s4017_s9 = scalar_lea.hbm %s4063_s4, %s2455_s7  ;;  %s2339_s11 = scalar_lea.sflag [#allocation3], %s209_s5 }
 0xea2   : > { %v2002_v44 = vpop.permute.xlu0 %2001  ;;  %v2000_v33 = vpop.permute.xlu1 %1999 }
 0xea3   : > { %v2003_v17 = vsel %vm3685_vm13, %v2000_v33, %v2002_v44 }
 0xea4   : > { %v2006_v28 = vmin.f32 %v1998_v58, %v2003_v17  ;;  %v2007_v6 = vmax.f32 %v1998_v58, %v2003_v17  ;;  %v2450_v17 = vld [vmem:[%s4062_s3 + $0x4] ss:$0 sm:$0xff] }
 0xea6   : > { %v2008_v53 = vsel %vm2005_vm3, %v2006_v28, %v2007_v6  ;;  %v2451_v6 = vld [vmem:[%s4062_s3 + $0x5] ss:$0 sm:$0xff] }
 0xea7   : > { %2011 = vrot.lane.b32.xlu0 %v2008_v53, %s2872_s27  ;;  %2009 = vrot.lane.b32.xlu1 %v2008_v53, %s2873_s6 }
 0xf19   : > { %v2012_v29 = vpop.permute.xlu0 %2011  ;;  %v2010_v18 = vpop.permute.xlu1 %2009 }
 0xf1a   : > { %v2013_v23 = vsel %vm3673_vm8, %v2010_v18, %v2012_v29  ;;  %vm2106_vm8 = vcmask 523264  }
 0xf1b   : > { %v2016_v25 = vmin.f32 %v2008_v53, %v2013_v23  ;;  %v2017_v39 = vmax.f32 %v2008_v53, %v2013_v23  ;;  %v243_v23 = vld [vmem:[%s4061_s2 + $0x68] sm:$0x1] }
 0xf1d   : > { %v2018_v16 = vsel %vm2015_vm15, %v2016_v25, %v2017_v39  ;;  %v2251_v25 = vshrl.u32 %v1718_v54, 7 }
 0xf1e   : > { %2797 = vrsqrt.f32 %v2018_v16  ;;  %vm2021_vm13 = vcmp.eq.f32.partialorder %v2018_v16, inf  ;;  %v2024_v31 = vand.u32 2147483648, %v2018_v16  ;;  %vm2023_vm2 = vcmp.eq.f32.partialorder %v2018_v16, 0.0 }
 0xf1f   : > { %v2252_v39 = vsub.s32 0, %v2251_v25 }
 0xf28   : > { %v2798_v56 = vpop.eup %2797 }
 0xf29   : > { %v2020_v24 = vmul.f32 %v2798_v56, %v2018_v16 }
 0xf2b   : > { %v2022_v20 = vsel %vm2021_vm13, %v2018_v16, %v2020_v24 }
 0xf2c   : > { %v2025_v42 = vsel %vm2023_vm2, %v2024_v31, %v2022_v20 }
 0xf2d   : > { %2636 = vmatmul.mubr.msk.f32.vlgmr.msra.gmra.mrb[32].mxu0 %vm2032_vm1, %v2025_v42 }
 0xf2e   : > { %2659 = vmatprep.mubr.msk.f32.mxu0 %vm2887_vm14, %v2886_v14 }
0x1000   : > { %v2102_v51 = vpop.f32.mrb[32].mxu0 }
0x1001   : > { %v2103_v11 = vadd.f32 %v2444_v27, %v2102_v51  ;;  %v2637_v7 = vpop.f32.mrb[33].mxu0 }
0x1003   : > { %v2107_v50 = vsel %vm2106_vm8, %v2103_v11, 0.0 }
0x1004   : > { %2108 = vadd.xlane.f32.xlu1 %v2107_v50 }
0x1091   : > { %v2109_v43 = vpop.xlane.xlu1 %2108 }
0x1092   : > { %v2111_v35 = vmul.f32 0.015625, %v2109_v43 }
0x1094   : > { %v2112_v59 = vsub.f32 %v2103_v11, %v2111_v35 }
0x1096   : > { %v2113_v40 = vmul.f32 %v2112_v59, %v2112_v59 }
0x1098   : > { %v2114_v10 = vsel %vm2106_vm8, %v2113_v40, 0.0 }
0x1099   : > { %2115 = vadd.xlane.f32.xlu0 %v2114_v10 }
0x1126   : > { %v2116_v48 = vpop.xlane.xlu0 %2115 }
0x1127   : > { %v2117_v30 = vmul.f32 0.015625, %v2116_v48 }
0x1129   : > { %v2118_v57 = vadd.f32 1e-05, %v2117_v30 }
0x112b   : > { %2799 = vrsqrt.f32 %v2118_v57 }
0x1135   : > { %v2800_v22 = vpop.eup %2799 }
0x1136   : > { %v2120_v26 = vmul.f32 %v2800_v22, %v2112_v59 }
0x1138   : > { %v2127_v4 = vmul.f32 %v2446_v47, %v2120_v26 }
0x113a   : > { %v2134_v1 = vadd.f32 %v2447_v37, %v2127_v4 }
0x113c   : > { %v2135_v19 = vmax.f32 %v2134_v1, 0.0 }
0x113e   : > { %2655 = vmatmul.mubr.msk.f32.vlgmr.msra.gmra.mrb[32].mxu1 %vm2106_vm8, %v2135_v19 }
0x1211   : > { %v2211_v49 = vpop.f32.mrb[32].mxu1 }
0x1212   : > { %v2212_v60 = vadd.f32 %v2448_v32, %v2211_v49  ;;  %v2656_v12 = vpop.f32.mrb[33].mxu1 }
0x1214   : > { %v2216_v38 = vsel %vm2215_vm11, %v2212_v60, 0.0 }
0x1215   : > { %2217 = vadd.xlane.f32.xlu0 %v2216_v38 }
0x122b   : > { %2247 = vperm.xlu0 %2795, %v250_v5  }
0x12a2   : > { %v2218_v13 = vpop.xlane.xlu0 %2217 }
0x12a3   : > { %v2220_v3 = vmul.f32 0.03125, %v2218_v13 }
0x12a5   : > { %v2221_v61 = vsub.f32 %v2212_v60, %v2220_v3 }
0x12a7   : > { %v2222_v21 = vmul.f32 %v2221_v61, %v2221_v61 }
0x12a9   : > { %v2223_v58 = vsel %vm2215_vm11, %v2222_v21, 0.0 }
0x12aa   : > { %2224 = vadd.xlane.f32.xlu1 %v2223_v58  ;;  %v2248_v16 = vpop.permute.xlu0 %2247 }
0x12ab   : > { %v2253_v56 = vrot.slane %v2248_v16, %v2252_v39 }
0x1337   : > { %v2225_v63 = vpop.xlane.xlu1 %2224 }
0x1338   : > { %v2226_v14 = vmul.f32 0.03125, %v2225_v63 }
0x133a   : > { %v2227_v44 = vadd.f32 1e-05, %v2226_v14 }
0x133c   : > { %2801 = vrsqrt.f32 %v2227_v44 }
0x1346   : > { %v2802_v33 = vpop.eup %2801 }
0x1347   : > { %v2229_v28 = vmul.f32 %v2802_v33, %v2221_v61 }
0x1349   : > { %v2236_v53 = vmul.f32 %v2450_v17, %v2229_v28 }
0x134b   : > { %v2243_v29 = vadd.f32 %v2451_v6, %v2236_v53 }
0x134d   : > { %v2244_v18 = vmax.f32 %v2243_v29, 0.0 }
0x134f   : > { %2658 = vmatpush3.xpose.msk.msra.mxu0 %vm2215_vm11, %v2244_v18 }
0x1352   : > { %2660 = vmatmul.mubr.msk.f32.vlgmr.msra.gmra.mrb[34].mxu0 %vm2215_vm11, %v243_v23 }
0x1425   : > { %v2326_v24 = vpop.f32.mrb[34].mxu0 }
0x1426   : > { %v2327_v31 = vadd.f32 %v2326_v24, %v2253_v56  ;;  %v2661_v20 = vpop.f32.mrb[35].mxu0 }
0x1428   : > { %v2454_v42 = vmul.f32 -1.442695, %v2327_v31 }
0x142a   : > { %2803 = vpow2.f32 %v2454_v42 }
0x1434   : > { %v2804_v27 = vpop.eup %2803 }
0x1435   : > { %v2333_v51 = vadd.f32 1.0, %v2804_v27 }
0x1437   : > { %2805 = vrcp.f32 %v2333_v51 }
0x1441   : > { %v2806_v54 = vpop.eup %2805 }
0x1442   : > { %2337 = vst.msk [vmem:[%s210_s8] sm:$0x1] %vm2336_vm4, %v2806_v54 }
0x1443   : > { %2820 = shalt.err (!%p2817_p3)
}
0x1444   : > { %s2821_s20 = scalar_lea.hbm %s4017_s9, 16  ;;  %s2825_s28 = scalar_lea.hbm %s4063_s4, 64 }
0x1445   : > { %p2822_p4 = scmp.ne.s32.totalorder %s4017_s9, %s2821_s20  ;;  %p2826_p9 = scmp.lt.u32.totalorder %s4017_s9, %s4063_s4 }
0x1446   : > { %p2827_p10 = scmp.lt.u32.totalorder %s2825_s28, %s2821_s20  ;;  %p2829_p12 = scmp.lt.u32.totalorder %s2821_s20, %s4017_s9 }
0x1447   : > { %p2823_p7 = pnand %p2822_p4, %p2953_p5 }
0x1448   : > { %p2828_p11 = por %p2827_p10, %p2826_p9 }
0x1449   : > { %p2824_p8 = pneg %p2823_p7 }
0x144a   : > { %p2830_p13 = por %p2829_p12, %p2828_p11 }
0x144c   : > { %p2831_p0 = pnand %p2830_p13, %p2824_p8 }
0x144e   : > { %2834 = shalt.err (!%p2831_p0)
}
0x144f   : > { %2738 = dma.vmem_to_hbm [thread:$0]  (%p2953_p5), %s4019_s10, 16, %s4017_s9, %s2339_s11  }
0x1450 PF: > { %p2744_p1 = scmp.ge.s32.totalorder %s2869_s18, 2  ;;  %s2363_s5 = sand.u32 1, %s2857_s15  }
0x1451   : > { %s2364_s7 = scalar_lea.sflag [#allocation3], %s2363_s5 }
0x1452   : > { %p2741_p2 = pnand %p2744_p1, %p2957_p6 }
0x1454   : > { %2852 = dma.done.wait (!%p2741_p2), %s2364_s7, 16  }
0x1455   : > { %2854 = vsyncadd (!%p2741_p2), %s2364_s7, 4294967280  ;;  %p14_p3 = scmp.ge.s32.totalorder %s2940_s21, 6   ;;  %s4095_s15 = smov %s2861_s16 }
0x1456   : > { %s4096_s16 = smov %s2865_s17  ;;  %s4097_s17 = smov %s2951_s24 }
0x1457   : > { %s4098_s18 = smov %s2940_s21  ;;  %16 = sbr.rel (!%p14_p3) target bundleno = 3 (0x3), region = 74 }
0x145e   :  { %2368 = vsyncpa [#allocation3], 1 }
0x145f   :  { %2370 = vsyncpa [#allocation3 + $0x1], 1 }

</bundles_post_ra>
